<compile_context>
chip_gen: v7x
topology: tpu7x:2x2x1
jax: 0.10.0
libtpu: 0.0.40
codegen_flags: <defaults>
</compile_context>

<pallas_src>
import functools

import jax
import jax.numpy as jnp
from jax.experimental import pallas as pl
from jax.experimental.pallas import tpu as pltpu

_MiB = 1024 * 1024


# ----------------------------------------------------------------------------
# Shared helpers
# ----------------------------------------------------------------------------

def _round_up(x, m):
    return ((x + m - 1) // m) * m


def _apply_activation(h, activation):
    if activation == "relu":
        return jnp.maximum(h, 0.0)
    if activation == "leaky_relu":
        return jnp.where(h > 0, h, 0.01 * h)
    if activation == "gelu":
        # tanh-approx GELU lowers to a single EUP op.
        return jax.nn.gelu(h, approximate=True)
    return h


def _similarity_head(h, protT, p2, w1, b1, w2, b2):
    """sim = log((d+1)/(d+1e-4)) with d = ||h - p||^2, then Linear->GELU->Linear->sigmoid.

    d is computed in the MXU-friendly form x2 + p2 - 2*x.pT, clamped at 0.  Note:
    near d==0 this form can suffer cancellation, but prototypes are dense random
    vectors so d stays O(hidden) here (matches reference to ~1e-4).
    """
    x2 = jnp.sum(h * h, axis=-1, keepdims=True)                     # (rows, 1)
    xp = jnp.dot(h, protT, preferred_element_type=jnp.float32)      # (rows, K)
    d = jnp.maximum(x2 + p2 - 2.0 * xp, 0.0)
    sim = jnp.log((d + 1.0) / (d + 1e-4))
    hh = jax.nn.gelu(
        jnp.dot(sim, w1, preferred_element_type=jnp.float32) + b1, approximate=True)
    return jax.nn.sigmoid(
        jnp.dot(hh, w2, preferred_element_type=jnp.float32) + b2)


def _vmem_capacity_bytes():
    try:
        info = pltpu.get_tpu_info()
        cap = getattr(info, "vmem_capacity_bytes", None)
        if cap:
            return int(cap)
    except Exception:
        pass
    return 64 * _MiB  # conservative (v7x per-TensorCore)


# ----------------------------------------------------------------------------
# FUSED forward kernel (small/medium graphs — everything resident, 1 dispatch)
# ----------------------------------------------------------------------------

def _fused_forward_kernel(*refs, num_layers, activation):
    # refs = [adj_bf16, x, (w_l, b_l)*L, protT, p2, mlp_w1, mlp_b1, mlp_w2, mlp_b2, out]
    adj = refs[0][...]                          # (N, N) bf16
    h = refs[1][...].astype(jnp.float32)        # (N, F)
    idx = 2
    for _ in range(num_layers):
        w = refs[idx][...]
        b = refs[idx + 1][...]
        idx += 2
        xw = jnp.dot(h, w, preferred_element_type=jnp.float32)
        ah = jnp.dot(adj, xw.astype(jnp.bfloat16), preferred_element_type=jnp.float32)
        h = _apply_activation(ah + b, activation)

    protT = refs[idx][...]        # (H, K)
    p2 = refs[idx + 1][...]       # (1, K)
    w1 = refs[idx + 2][...]
    b1 = refs[idx + 3][...]
    w2 = refs[idx + 4][...]
    b2 = refs[idx + 5][...]
    out_ref = refs[idx + 6]
    out_ref[...] = _similarity_head(h, protT, p2, w1, b1, w2, b2)


def fused_forward(adj_bf16, x, gcn_params, protT, p2, mlp_params, activation,
                  vmem_limit_bytes):
    n = x.shape[0]
    inputs = [adj_bf16, x]
    for w, b in gcn_params:
        inputs += [w, b]
    inputs += [protT, p2]
    inputs += list(mlp_params)
    kern = functools.partial(_fused_forward_kernel,
                             num_layers=len(gcn_params), activation=activation)
    return pl.pallas_call(
        kern,
        out_shape=jax.ShapeDtypeStruct((n, 1), jnp.float32),
        compiler_params=pltpu.CompilerParams(vmem_limit_bytes=vmem_limit_bytes),
    )(*inputs)


# ----------------------------------------------------------------------------
# TILED path
# ----------------------------------------------------------------------------

def _xw_kernel(x_ref, w_ref, o_ref):
    o_ref[...] = jnp.dot(x_ref[...], w_ref[...],
                         preferred_element_type=jnp.float32).astype(o_ref.dtype)


def _pick_row_tile(n_pad):
    for t in (1024, 512, 256):
        if n_pad % t == 0:
            return t
    return n_pad


def compute_xw(x, w, *, vmem_limit_bytes):
    """XW for one layer, row-tiled with large row blocks; output bf16 for the MXU sweep."""
    n = x.shape[0]
    f_in, f_out = w.shape
    tm = _pick_row_tile(n)
    return pl.pallas_call(
        _xw_kernel,
        grid=(n // tm,),
        in_specs=[pl.BlockSpec((tm, f_in), lambda i: (i, 0)),
                  pl.BlockSpec((f_in, f_out), lambda i: (0, 0))],
        out_specs=pl.BlockSpec((tm, f_out), lambda i: (i, 0)),
        out_shape=jax.ShapeDtypeStruct((n, f_out), jnp.bfloat16),
        compiler_params=pltpu.CompilerParams(
            dimension_semantics=("parallel",),
            vmem_limit_bytes=vmem_limit_bytes),
    )(x, w)


def _adj_sweep_kernel(adj_ref, xw_ref, b_ref, o_ref, acc_ref, *, activation):
    """acc += adj_tile @ xw_rows ; finalize: o = act(acc + b)."""
    k = pl.program_id(1)
    tk = adj_ref.shape[1]

    @pl.when(k == 0)
    def _():
        acc_ref[...] = jnp.zeros_like(acc_ref)

    start = pl.multiple_of(k * tk, tk)
    acc_ref[...] += jnp.dot(adj_ref[...], xw_ref[pl.ds(start, tk), :],
                            preferred_element_type=jnp.float32)

    @pl.when(k == pl.num_programs(1) - 1)
    def _():
        o_ref[...] = _apply_activation(acc_ref[...] + b_ref[...], activation)


def _adj_sweep_head_kernel(adj_ref, xw_ref, b_ref, pT_ref, p2_ref,
                           w1_ref, b1_ref, w2_ref, b2_ref, o_ref, acc_ref,
                           *, activation):
    """Last GCN layer with the similarity + MLP + sigmoid head fused into finalize."""
    k = pl.program_id(1)
    tk = adj_ref.shape[1]

    @pl.when(k == 0)
    def _():
        acc_ref[...] = jnp.zeros_like(acc_ref)

    start = pl.multiple_of(k * tk, tk)
    acc_ref[...] += jnp.dot(adj_ref[...], xw_ref[pl.ds(start, tk), :],
                            preferred_element_type=jnp.float32)

    @pl.when(k == pl.num_programs(1) - 1)
    def _():
        h = _apply_activation(acc_ref[...] + b_ref[...], activation)
        o_ref[...] = _similarity_head(h, pT_ref[...], p2_ref[...],
                                      w1_ref[...], b1_ref[...],
                                      w2_ref[...], b2_ref[...])


def gcn_layer_tiled(adj_bf16, h, w, b, activation, *, tm, tk, vmem_limit_bytes,
                    head=None):
    """One GCN layer at scale.

    adj_bf16: (n_pad, n_pad) bf16 normalized adjacency (padded rows/cols are zero).
    h:        (n_pad, f_in) f32 input features.
    head:     None, or (protT, p2, w1, b1, w2, b2) to fuse similarity+MLP+sigmoid
              into the finalize branch (last layer).
    """
    n_pad = h.shape[0]
    f_in, f_out = w.shape
    assert n_pad % tm == 0 and n_pad % tk == 0

    # Stage 1: XW once per layer (cheap, row-tiled, bf16 output).
    xw = compute_xw(h, w, vmem_limit_bytes=vmem_limit_bytes)

    # Stage 2: memory-bound adjacency sweep.  adj tiles are (tm, tk) row panels,
    # xw is VMEM-resident (DMA'd once), f32 accumulator in scratch.
    base_in_specs = [
        pl.BlockSpec((tm, tk), lambda i, k: (i, k)),            # adj
        pl.BlockSpec((n_pad, f_out), lambda i, k: (0, 0)),      # xw (resident)
        pl.BlockSpec((1, f_out), lambda i, k: (0, 0)),          # bias
    ]

    if head is None:
        kern = functools.partial(_adj_sweep_kernel, activation=activation)
        in_specs = base_in_specs
        extra_inputs = ()
        out_shape = jax.ShapeDtypeStruct((n_pad, f_out), jnp.float32)
        out_spec = pl.BlockSpec((tm, f_out), lambda i, k: (i, 0))
    else:
        protT, p2, w1, b1, w2, b2 = head
        kern = functools.partial(_adj_sweep_head_kernel, activation=activation)
        in_specs = base_in_specs + [
            pl.BlockSpec(protT.shape, lambda i, k: (0, 0)),
            pl.BlockSpec(p2.shape, lambda i, k: (0, 0)),
            pl.BlockSpec(w1.shape, lambda i, k: (0, 0)),
            pl.BlockSpec(b1.shape, lambda i, k: (0, 0)),
            pl.BlockSpec(w2.shape, lambda i, k: (0, 0)),
            pl.BlockSpec(b2.shape, lambda i, k: (0, 0)),
        ]
        extra_inputs = (protT, p2, w1, b1, w2, b2)
        out_dim = w2.shape[1]
        out_shape = jax.ShapeDtypeStruct((n_pad, out_dim), jnp.float32)
        out_spec = pl.BlockSpec((tm, out_dim), lambda i, k: (i, 0))

    return pl.pallas_call(
        kern,
        grid=(n_pad // tm, n_pad // tk),
        in_specs=in_specs,
        out_specs=out_spec,
        out_shape=out_shape,
        scratch_shapes=[pltpu.VMEM((tm, f_out), jnp.float32)],
        compiler_params=pltpu.CompilerParams(
            dimension_semantics=("parallel", "arbitrary"),
            vmem_limit_bytes=vmem_limit_bytes),
    )(adj_bf16, xw, b, *extra_inputs)


# ----------------------------------------------------------------------------
# Graph / model glue
# ----------------------------------------------------------------------------

def _padded_num_nodes(n, tm, tk_max):
    n_pad = _round_up(max(n, tm), tm)
    if n_pad > tk_max:
        n_pad = _round_up(n_pad, tk_max)
    return n_pad


def build_normalized_adjacency_padded(edge_index, num_nodes, n_pad,
                                      dtype=jnp.bfloat16):
    """Dense symmetric-normalized adjacency with self loops, built directly at padded
    size and cast ONCE to the kernel dtype.  Padded rows/cols are exactly zero."""
    src, dst = edge_index[0], edge_index[1]
    a = jnp.zeros((n_pad, n_pad), jnp.float32)
    a = a.at[dst, src].set(1.0)
    self_loop = (jnp.arange(n_pad) < num_nodes).astype(jnp.float32)
    a = a + jnp.diag(self_loop)
    deg = jnp.sum(a, axis=1)
    dinv = jnp.where(deg > 0, jax.lax.rsqrt(deg), 0.0)
    a = a * dinv[:, None] * dinv[None, :]
    return a.astype(dtype)


def prepare_graph(edge_index, num_nodes, *, tm=256, tk_max=2048):
    """Build the padded bf16 adjacency once; reuse across layers and across calls."""
    n_pad = _padded_num_nodes(num_nodes, tm, tk_max)
    return build_normalized_adjacency_padded(edge_index, num_nodes, n_pad), n_pad


class SLADGNNPallas:
    """GNN_type='gcn' variant of SLADGNN, eval-mode forward pass."""

    def __init__(self, key, num_features, hidden_sizes, num_classes,
                 num_prototypes_per_class, mlp_input_dim, mlp_output_dim=1,
                 activation_fuc="relu"):
        self.activation = activation_fuc
        self.hidden_sizes = hidden_sizes

        # Generation-aware VMEM budgets (v5e/v6e: 128 MiB; v7x: 64 MiB per TensorCore,
        # where the tiled/megacore path is preferred earlier).
        cap = _vmem_capacity_bytes()
        if cap >= 96 * _MiB:
            self._fused_adj_bytes = 40 * _MiB
            self._fused_vmem_limit = 100 * _MiB
            self._tiled_vmem_limit = 64 * _MiB
        else:
            self._fused_adj_bytes = 16 * _MiB
            self._fused_vmem_limit = 44 * _MiB
            self._tiled_vmem_limit = 48 * _MiB

        keys = jax.random.split(key, 2 * len(hidden_sizes) + 6)
        ki = iter(range(len(keys)))

        # GCN layer parameters
        self.gcn_params = []
        dims = [num_features] + list(hidden_sizes)
        for i in range(len(hidden_sizes)):
            fan_in, fan_out = dims[i], dims[i + 1]
            scale = 1.0 / jnp.sqrt(fan_in)
            w = jax.random.uniform(keys[next(ki)], (fan_in, fan_out),
                                   jnp.float32, -scale, scale)
            b = jax.random.uniform(keys[next(ki)], (1, fan_out),
                                   jnp.float32, -scale, scale)
            self.gcn_params.append((w, b))

        # Prototype layer: (num_classes, num_prototypes_per_class, hidden_sizes[-1])
        self.prototype_layer = jax.random.normal(
            keys[next(ki)],
            (num_classes, num_prototypes_per_class, hidden_sizes[-1]), jnp.float32)

        # MLPReadout (n_layers=1): Linear(K, K//2) -> GELU -> Linear(K//2, 1)
        hid = mlp_input_dim // 2
        s1 = 1.0 / jnp.sqrt(mlp_input_dim)
        s2 = 1.0 / jnp.sqrt(hid)
        self.mlp_w1 = jax.random.uniform(keys[next(ki)], (mlp_input_dim, hid),
                                         jnp.float32, -s1, s1)
        self.mlp_b1 = jax.random.uniform(keys[next(ki)], (1, hid),
                                         jnp.float32, -s1, s1)
        self.mlp_w2 = jax.random.uniform(keys[next(ki)], (hid, mlp_output_dim),
                                         jnp.float32, -s2, s2)
        self.mlp_b2 = jax.random.uniform(keys[next(ki)], (1, mlp_output_dim),
                                         jnp.float32, -s2, s2)

    def _mlp_params(self):
        return (self.mlp_w1, self.mlp_b1, self.mlp_w2, self.mlp_b2)

    def _proto_parts(self):
        prot = self.prototype_layer.reshape(-1, self.prototype_layer.shape[-1])  # (K, H)
        protT = prot.T                                                            # (H, K)
        p2 = jnp.sum(prot * prot, axis=-1)[None, :]                               # (1, K)
        return protT, p2

    def forward(self, x, edge_index, y, force_tiled=False, tk_max=2048,
                adj_bf16=None):
        n = x.shape[0]
        tm = 256
        assert tk_max % tm == 0

        if adj_bf16 is None:
            adj_bf16, n_pad = prepare_graph(edge_index, n, tm=tm, tk_max=tk_max)
        else:
            n_pad = adj_bf16.shape[0]
        x_p = jnp.pad(x, ((0, n_pad - n), (0, 0)))

        protT, p2 = self._proto_parts()
        mlp = self._mlp_params()

        adj_bytes = n_pad * n_pad * 2  # bf16
        use_fused = (not force_tiled) and (adj_bytes <= self._fused_adj_bytes)

        if use_fused:
            out = fused_forward(adj_bf16, x_p, self.gcn_params, protT, p2, mlp,
                                self.activation, self._fused_vmem_limit)
        else:
            tk = min(n_pad, tk_max)
            h = x_p
            num_layers = len(self.gcn_params)
            for li, (w, b) in enumerate(self.gcn_params):
                head = (protT, p2) + mlp if li == num_layers - 1 else None
                h = gcn_layer_tiled(adj_bf16, h, w, b, self.activation,
                                    tm=tm, tk=tk,
                                    vmem_limit_bytes=self._tiled_vmem_limit,
                                    head=head)
            out = h

        # Padded rows carry act(bias) garbage; slice them off before anything else.
        return jnp.squeeze(out[:n]), y.astype(jnp.float32)


# ----------------------------------------------------------------------------
# Pure-JAX reference (mirrors the module math) for correctness checks
# ----------------------------------------------------------------------------

def reference_forward(adj, x, gcn_params, prototypes, mlp_params, activation):
    h = x
    for w, b in gcn_params:
        h = _apply_activation(adj @ (h @ w) + b, activation)
    diff = h[:, None, :] - prototypes[None, :, :]
    d = jnp.sum(diff * diff, axis=-1)
    sim = jnp.log((d + 1.0) / (d + 1e-4))
    w1, b1, w2, b2 = mlp_params
    hh = jax.nn.gelu(sim @ w1 + b1, approximate=True)
    return jax.nn.sigmoid(hh @ w2 + b2)


# ----------------------------------------------------------------------------
# Demo
# ----------------------------------------------------------------------------

def _ring_edges(num_nodes):
    src = jnp.arange(num_nodes, dtype=jnp.int32)
    dst = (src + 1) % num_nodes
    return jnp.stack([jnp.concatenate([src, dst]),
                      jnp.concatenate([dst, src])], axis=0)


def _check(scores, n, ref):
    assert scores.shape == (n,)
    assert bool(jnp.all(jnp.isfinite(scores)))
    assert bool(jnp.all((scores >= 0.0) & (scores <= 1.0)))
    assert bool(jnp.max(jnp.abs(scores - ref)) < 2e-2)


if __name__ == "__main__":
    key = jax.random.PRNGKey(0)
    k_x, k_y, k_param, k_x2, k_y2 = jax.random.split(key, 5)

    num_features = 16
    hidden_sizes = [32, 32]
    num_classes = 2
    num_prototypes_per_class = 4
    mlp_input_dim = num_classes * num_prototypes_per_class  # similarity width K

    model = SLADGNNPallas(
        k_param,
        num_features=num_features,
        hidden_sizes=hidden_sizes,
        num_classes=num_classes,
        num_prototypes_per_class=num_prototypes_per_class,
        mlp_input_dim=mlp_input_dim,
        mlp_output_dim=1,
        activation_fuc="relu",
    )
    prot = model.prototype_layer.reshape(-1, model.prototype_layer.shape[-1])

    # --- small graph: fused single-kernel path ------------------------------
    n_small = 8
    x = jax.random.normal(k_x, (n_small, num_features), jnp.float32)
    y = jax.random.bernoulli(k_y, 0.5, (n_small,)).astype(jnp.int32)
    edge_index = _ring_edges(n_small)

    scores, labels = model.forward(x, edge_index, y)
    scores = jax.block_until_ready(scores)
    labels = jax.block_until_ready(labels)
    assert labels.shape == (n_small,)

    adj_small = build_normalized_adjacency_padded(edge_index, n_small, n_small,
                                                  jnp.float32)
    ref_small = reference_forward(adj_small, x, model.gcn_params, prot,
                                  model._mlp_params(), model.activation).squeeze()
    _check(scores, n_small, ref_small)

    # --- larger graph: tiled bf16 row-panel sweep (single k step, nk=1) ------
    n_big = 600
    x_big = jax.random.normal(k_x2, (n_big, num_features), jnp.float32)
    y_big = jax.random.bernoulli(k_y2, 0.5, (n_big,)).astype(jnp.int32)
    edge_index_big = _ring_edges(n_big)

    adj_big_ref = build_normalized_adjacency_padded(edge_index_big, n_big, n_big,
                                                    jnp.float32)
    ref_big = reference_forward(adj_big_ref, x_big, model.gcn_params, prot,
                                model._mlp_params(), model.activation).squeeze()

    scores_big, labels_big = model.forward(x_big, edge_index_big, y_big,
                                           force_tiled=True)
    scores_big = jax.block_until_ready(scores_big)
    jax.block_until_ready(labels_big)
    _check(scores_big, n_big, ref_big)

    # --- same graph, small tk_max to exercise the k-axis / f32 accumulator ---
    scores_acc, _ = model.forward(x_big, edge_index_big, y_big,
                                  force_tiled=True, tk_max=256)
    scores_acc = jax.block_until_ready(scores_acc)
    _check(scores_acc, n_big, ref_big)

    print("KERNEL_OK")
</pallas_src>

<mosaic_0001>
module attributes {stable_mosaic.version = 11 : i64} {
  func.func @_fused_forward_kernel(%arg0: memref<256x256xbf16, #tpu.memory_space<vmem>>, %arg1: memref<256x16xf32, #tpu.memory_space<vmem>>, %arg2: memref<16x32xf32, #tpu.memory_space<vmem>>, %arg3: memref<1x32xf32, #tpu.memory_space<vmem>>, %arg4: memref<32x32xf32, #tpu.memory_space<vmem>>, %arg5: memref<1x32xf32, #tpu.memory_space<vmem>>, %arg6: memref<32x8xf32, #tpu.memory_space<vmem>>, %arg7: memref<1x8xf32, #tpu.memory_space<vmem>>, %arg8: memref<8x4xf32, #tpu.memory_space<vmem>>, %arg9: memref<1x4xf32, #tpu.memory_space<vmem>>, %arg10: memref<4x1xf32, #tpu.memory_space<vmem>>, %arg11: memref<1x1xf32, #tpu.memory_space<vmem>>, %arg12: memref<256x1xf32, #tpu.memory_space<vmem>>) attributes {dimension_semantics = [], scalar_prefetch = 0 : i64, scratch_operands = 0 : i64, tpu.core_type = #tpu.core_type<tc>} {
    %c0 = arith.constant 0 : index
    %c0_0 = arith.constant 0 : index
    %0 = vector.load %arg0[%c0, %c0_0] : memref<256x256xbf16, #tpu.memory_space<vmem>>, vector<256x256xbf16>
    %c0_1 = arith.constant 0 : index
    %c0_2 = arith.constant 0 : index
    %1 = vector.load %arg1[%c0_1, %c0_2] : memref<256x16xf32, #tpu.memory_space<vmem>>, vector<256x16xf32>
    %c0_3 = arith.constant 0 : index
    %c0_4 = arith.constant 0 : index
    %2 = vector.load %arg2[%c0_3, %c0_4] : memref<16x32xf32, #tpu.memory_space<vmem>>, vector<16x32xf32>
    %c0_5 = arith.constant 0 : index
    %c0_6 = arith.constant 0 : index
    %3 = vector.load %arg3[%c0_5, %c0_6] : memref<1x32xf32, #tpu.memory_space<vmem>>, vector<1x32xf32>
    %cst = arith.constant dense<0.000000e+00> : vector<256x32xf32>
    %4 = tpu.matmul %1, %2, %cst {dimension_numbers = #tpu.dot_dimension_numbers<[1], [0], [0], [1], [0, 0, 1, 1], [], []>} : vector<256x16xf32>, vector<16x32xf32>, vector<256x32xf32> -> vector<256x32xf32>
    %5 = arith.truncf %4 : vector<256x32xf32> to vector<256x32xbf16>
    %cst_7 = arith.constant dense<0.000000e+00> : vector<256x32xf32>
    %6 = tpu.matmul %0, %5, %cst_7 {dimension_numbers = #tpu.dot_dimension_numbers<[1], [0], [0], [1], [0, 0, 1, 1], [], []>} : vector<256x256xbf16>, vector<256x32xbf16>, vector<256x32xf32> -> vector<256x32xf32>
    %7 = vector.broadcast %3 : vector<1x32xf32> to vector<256x32xf32>
    %8 = arith.addf %6, %7 : vector<256x32xf32>
    %cst_8 = arith.constant 0.000000e+00 : f32
    %9 = vector.broadcast %cst_8 : f32 to vector<256x32xf32>
    %10 = arith.maximumf %8, %9 : vector<256x32xf32>
    %c0_9 = arith.constant 0 : index
    %c0_10 = arith.constant 0 : index
    %11 = vector.load %arg4[%c0_9, %c0_10] : memref<32x32xf32, #tpu.memory_space<vmem>>, vector<32x32xf32>
    %c0_11 = arith.constant 0 : index
    %c0_12 = arith.constant 0 : index
    %12 = vector.load %arg5[%c0_11, %c0_12] : memref<1x32xf32, #tpu.memory_space<vmem>>, vector<1x32xf32>
    %cst_13 = arith.constant dense<0.000000e+00> : vector<256x32xf32>
    %13 = tpu.matmul %10, %11, %cst_13 {dimension_numbers = #tpu.dot_dimension_numbers<[1], [0], [0], [1], [0, 0, 1, 1], [], []>} : vector<256x32xf32>, vector<32x32xf32>, vector<256x32xf32> -> vector<256x32xf32>
    %14 = arith.truncf %13 : vector<256x32xf32> to vector<256x32xbf16>
    %cst_14 = arith.constant dense<0.000000e+00> : vector<256x32xf32>
    %15 = tpu.matmul %0, %14, %cst_14 {dimension_numbers = #tpu.dot_dimension_numbers<[1], [0], [0], [1], [0, 0, 1, 1], [], []>} : vector<256x256xbf16>, vector<256x32xbf16>, vector<256x32xf32> -> vector<256x32xf32>
    %16 = vector.broadcast %12 : vector<1x32xf32> to vector<256x32xf32>
    %17 = arith.addf %15, %16 : vector<256x32xf32>
    %cst_15 = arith.constant 0.000000e+00 : f32
    %18 = vector.broadcast %cst_15 : f32 to vector<256x32xf32>
    %19 = arith.maximumf %17, %18 : vector<256x32xf32>
    %c0_16 = arith.constant 0 : index
    %c0_17 = arith.constant 0 : index
    %20 = vector.load %arg6[%c0_16, %c0_17] : memref<32x8xf32, #tpu.memory_space<vmem>>, vector<32x8xf32>
    %c0_18 = arith.constant 0 : index
    %c0_19 = arith.constant 0 : index
    %21 = vector.load %arg7[%c0_18, %c0_19] : memref<1x8xf32, #tpu.memory_space<vmem>>, vector<1x8xf32>
    %c0_20 = arith.constant 0 : index
    %c0_21 = arith.constant 0 : index
    %22 = vector.load %arg8[%c0_20, %c0_21] : memref<8x4xf32, #tpu.memory_space<vmem>>, vector<8x4xf32>
    %c0_22 = arith.constant 0 : index
    %c0_23 = arith.constant 0 : index
    %23 = vector.load %arg9[%c0_22, %c0_23] : memref<1x4xf32, #tpu.memory_space<vmem>>, vector<1x4xf32>
    %c0_24 = arith.constant 0 : index
    %c0_25 = arith.constant 0 : index
    %24 = vector.load %arg10[%c0_24, %c0_25] : memref<4x1xf32, #tpu.memory_space<vmem>>, vector<4x1xf32>
    %c0_26 = arith.constant 0 : index
    %c0_27 = arith.constant 0 : index
    %25 = vector.load %arg11[%c0_26, %c0_27] : memref<1x1xf32, #tpu.memory_space<vmem>>, vector<1x1xf32>
    %26 = arith.mulf %19, %19 : vector<256x32xf32>
    %cst_28 = arith.constant dense<0.000000e+00> : vector<256xf32>
    %27 = vector.multi_reduction <add>, %26, %cst_28 [1] : vector<256x32xf32> to vector<256xf32>
    %28 = vector.shape_cast %27 : vector<256xf32> to vector<256x1xf32>
    %cst_29 = arith.constant dense<0.000000e+00> : vector<256x8xf32>
    %29 = tpu.matmul %19, %20, %cst_29 {dimension_numbers = #tpu.dot_dimension_numbers<[1], [0], [0], [1], [0, 0, 1, 1], [], []>} : vector<256x32xf32>, vector<32x8xf32>, vector<256x8xf32> -> vector<256x8xf32>
    %30 = vector.broadcast %28 : vector<256x1xf32> to vector<256x8xf32>
    %31 = vector.broadcast %21 : vector<1x8xf32> to vector<256x8xf32>
    %32 = arith.addf %30, %31 : vector<256x8xf32>
    %cst_30 = arith.constant 2.000000e+00 : f32
    %33 = vector.broadcast %cst_30 : f32 to vector<256x8xf32>
    %34 = arith.mulf %33, %29 : vector<256x8xf32>
    %35 = arith.subf %32, %34 : vector<256x8xf32>
    %cst_31 = arith.constant 0.000000e+00 : f32
    %36 = vector.broadcast %cst_31 : f32 to vector<256x8xf32>
    %37 = arith.maximumf %35, %36 : vector<256x8xf32>
    %cst_32 = arith.constant 1.000000e+00 : f32
    %38 = vector.broadcast %cst_32 : f32 to vector<256x8xf32>
    %39 = arith.addf %37, %38 : vector<256x8xf32>
    %cst_33 = arith.constant 9.99999974E-5 : f32
    %40 = vector.broadcast %cst_33 : f32 to vector<256x8xf32>
    %41 = arith.addf %37, %40 : vector<256x8xf32>
    %42 = arith.divf %39, %41 : vector<256x8xf32>
    %43 = math.log %42 : vector<256x8xf32>
    %cst_34 = arith.constant dense<0.000000e+00> : vector<256x4xf32>
    %44 = tpu.matmul %43, %22, %cst_34 {dimension_numbers = #tpu.dot_dimension_numbers<[1], [0], [0], [1], [0, 0, 1, 1], [], []>} : vector<256x8xf32>, vector<8x4xf32>, vector<256x4xf32> -> vector<256x4xf32>
    %45 = vector.broadcast %23 : vector<1x4xf32> to vector<256x4xf32>
    %46 = arith.addf %44, %45 : vector<256x4xf32>
    %47 = arith.mulf %46, %46 : vector<256x4xf32>
    %48 = arith.mulf %46, %47 : vector<256x4xf32>
    %cst_35 = arith.constant 4.471500e-02 : f32
    %49 = vector.broadcast %cst_35 : f32 to vector<256x4xf32>
    %50 = arith.mulf %49, %48 : vector<256x4xf32>
    %51 = arith.addf %46, %50 : vector<256x4xf32>
    %cst_36 = arith.constant 0.797884583 : f32
    %52 = vector.broadcast %cst_36 : f32 to vector<256x4xf32>
    %53 = arith.mulf %52, %51 : vector<256x4xf32>
    %54 = math.tanh %53 : vector<256x4xf32>
    %cst_37 = arith.constant 1.000000e+00 : f32
    %55 = vector.broadcast %cst_37 : f32 to vector<256x4xf32>
    %56 = arith.addf %55, %54 : vector<256x4xf32>
    %cst_38 = arith.constant 5.000000e-01 : f32
    %57 = vector.broadcast %cst_38 : f32 to vector<256x4xf32>
    %58 = arith.mulf %57, %56 : vector<256x4xf32>
    %59 = arith.mulf %46, %58 : vector<256x4xf32>
    %cst_39 = arith.constant dense<0.000000e+00> : vector<256x1xf32>
    %60 = tpu.matmul %59, %24, %cst_39 {dimension_numbers = #tpu.dot_dimension_numbers<[1], [0], [0], [1], [0, 0, 1, 1], [], []>} : vector<256x4xf32>, vector<4x1xf32>, vector<256x1xf32> -> vector<256x1xf32>
    %61 = vector.broadcast %25 : vector<1x1xf32> to vector<256x1xf32>
    %62 = arith.addf %60, %61 : vector<256x1xf32>
    %63 = arith.negf %62 : vector<256x1xf32>
    %64 = math.exp %63 : vector<256x1xf32>
    %cst_40 = arith.constant 1.000000e+00 : f32
    %65 = vector.broadcast %cst_40 : f32 to vector<256x1xf32>
    %66 = arith.addf %65, %64 : vector<256x1xf32>
    %67 = arith.divf %65, %66 : vector<256x1xf32>
    %c0_41 = arith.constant 0 : index
    %c0_42 = arith.constant 0 : index
    %68 = vector.load %arg12[%c0_41, %c0_42] : memref<256x1xf32, #tpu.memory_space<vmem>>, vector<256x1xf32>
    tpu.vector_store %arg12[%c0_41, %c0_42], %67 {strides = array<i32>} : memref<256x1xf32, #tpu.memory_space<vmem>>, vector<256x1xf32>,
    return
  }
}

</mosaic_0001>

<bundles_post_ra>
// kernel: tpu_custom_call.1
= control target key start
LH: loop header
LB: loop body
LE: loop exit
PB: predicated region body
PF: predicated region fallthrough
CT: control target
= control target key end

     0   :  { %vm111_vm0 = vcmask 130048   ;;  %vm813_vm1 = vcmask 261120   ;;  %vm2853_vm2 = vcmask 1043456   ;;  %vm2140_vm3 = vcmask 64512   ;;  %s5720_s2 = inlined_call_operand.vmem [shape: f32[16,32], index: 2, kind: input, shape index: {}]   ;;  %s5721_s1 = inlined_call_operand.vmem [shape: f32[256,16], index: 1, kind: input, shape index: {}]   ;;  %s5722_s0 = inlined_call_operand.vmem [shape: bf16[256,256], index: 0, kind: input, shape index: {}]   ;;  %s5723_s4 = inlined_call_operand.vmem [shape: f32[32,32], index: 4, kind: input, shape index: {}]   ;;  %s5724_s3 = inlined_call_operand.vmem [shape: f32[1,32], index: 3, kind: input, shape index: {}]   ;;  %s5725_s6 = inlined_call_operand.vmem [shape: f32[32,8], index: 6, kind: input, shape index: {}]   ;;  %s5726_s5 = inlined_call_operand.vmem [shape: f32[1,32], index: 5, kind: input, shape index: {}]   ;;  %s5727_s8 = inlined_call_operand.vmem [shape: f32[8,4], index: 8, kind: input, shape index: {}]   ;;  %s5728_s7 = inlined_call_operand.vmem [shape: f32[1,8], index: 7, kind: input, shape index: {}]   ;;  %s5729_s10 = inlined_call_operand.vmem [shape: f32[4,1], index: 10, kind: input, shape index: {}]   ;;  %s5730_s9 = inlined_call_operand.vmem [shape: f32[1,4], index: 9, kind: input, shape index: {}]   ;;  %s5731_s11 = inlined_call_operand.<no memory space> [shape: f32[1,1], index: 11, kind: input, shape index: {}]   ;;  %s5732_s12 = inlined_call_operand.vmem [shape: f32[256,1], index: 12, kind: output, shape index: {}]  }
   0x1   :  { %v108_v0 = vld [vmem:[%s5720_s2] sm:$0xff]  ;;  %v109_v1 = vld [vmem:[%s5720_s2 + $0x8] sm:$0xff]  ;;  %v78_v7 = vld [vmem:[%s5721_s1 + $0x10] sm:$0xff]  ;;  %vm2756_vm4 = vcmask 31744   ;;  %vm3274_vm5 = vcmask 7168  }
   0x2   :  { %v76_v2 = vld [vmem:[%s5721_s1] sm:$0xff]  ;;  %v4201_v3 = vpack.c.bf16 %v109_v1, %v108_v0  ;;  %v77_v5 = vld [vmem:[%s5721_s1 + $0x8] sm:$0xff]  ;;  %v94_v8 = vld [vmem:[%s5721_s1 + $0x90] sm:$0xff] }
   0x3   :  { %3941 = vmatprep.mubr.msk.f32.mxu0 %vm111_vm0, %v76_v2  ;;  %v92_v4 = vld [vmem:[%s5721_s1 + $0x80] sm:$0xff]  ;;  %v93_v6 = vld [vmem:[%s5721_s1 + $0x88] sm:$0xff]  ;;  %v79_v9 = vld [vmem:[%s5721_s1 + $0x18] sm:$0xff] }
   0x4   :  { %3965 = vmatprep.mubr.msk.f32.mxu1 %vm111_vm0, %v92_v4  ;;  %4202 = vmatprep.subr.bf16.mxu0 %v4201_v3  ;;  %v95_v10 = vld [vmem:[%s5721_s1 + $0x98] sm:$0xff]  ;;  %v80_v11 = vld [vmem:[%s5721_s1 + $0x20] sm:$0xff]  ;;  %v81_v13 = vld [vmem:[%s5721_s1 + $0x28] sm:$0xff] }
   0x5   :  { %4221 = vmatprep.subr.bf16.mxu1 %v4201_v3  ;;  %4204 = vmatpush3.bf16.msra.mxu0 %v4201_v3  ;;  %v96_v12 = vld [vmem:[%s5721_s1 + $0xa0] sm:$0xff]  ;;  %v97_v14 = vld [vmem:[%s5721_s1 + $0xa8] sm:$0xff]  ;;  %v82_v15 = vld [vmem:[%s5721_s1 + $0x30] sm:$0xff] }
   0x6   :  { %4222 = vmatpush3.bf16.msra.mxu1 %v4201_v3  ;;  %v98_v16 = vld [vmem:[%s5721_s1 + $0xb0] sm:$0xff]  ;;  %v83_v17 = vld [vmem:[%s5721_s1 + $0x38] sm:$0xff]  ;;  %v84_v19 = vld [vmem:[%s5721_s1 + $0x40] sm:$0xff] }
   0x7   :  { %v99_v18 = vld [vmem:[%s5721_s1 + $0xb8] sm:$0xff]  ;;  %v100_v20 = vld [vmem:[%s5721_s1 + $0xc0] sm:$0xff]  ;;  %v85_v21 = vld [vmem:[%s5721_s1 + $0x48] sm:$0xff] }
   0x8   :  { %3942 = vmatmul.mubr.msk.f32.vlgmr.msra.gmra.mrb[0].mxu0 %vm111_vm0, %v77_v5  ;;  %v101_v22 = vld [vmem:[%s5721_s1 + $0xc8] sm:$0xff]  ;;  %v86_v23 = vld [vmem:[%s5721_s1 + $0x50] sm:$0xff]  ;;  %v87_v25 = vld [vmem:[%s5721_s1 + $0x58] sm:$0xff] }
   0x9   :  { %3966 = vmatmul.mubr.msk.f32.vlgmr.msra.gmra.mrb[0].mxu1 %vm111_vm0, %v93_v6  ;;  %3944 = vmatprep.mubr.msk.f32.mxu0 %vm111_vm0, %v78_v7  ;;  %v102_v24 = vld [vmem:[%s5721_s1 + $0xd0] sm:$0xff]  ;;  %v103_v26 = vld [vmem:[%s5721_s1 + $0xd8] sm:$0xff]  ;;  %v88_v27 = vld [vmem:[%s5721_s1 + $0x60] sm:$0xff] }
   0xa   :  { %3968 = vmatprep.mubr.msk.f32.mxu1 %vm111_vm0, %v94_v8  ;;  %v104_v28 = vld [vmem:[%s5721_s1 + $0xe0] sm:$0xff]  ;;  %v89_v29 = vld [vmem:[%s5721_s1 + $0x68] sm:$0xff]  ;;  %v90_v31 = vld [vmem:[%s5721_s1 + $0x70] sm:$0xff] }
   0xb   :  { %v105_v30 = vld [vmem:[%s5721_s1 + $0xe8] sm:$0xff]  ;;  %v106_v32 = vld [vmem:[%s5721_s1 + $0xf0] sm:$0xff]  ;;  %v91_v33 = vld [vmem:[%s5721_s1 + $0x78] sm:$0xff] }
   0xc   :  { %3945 = vmatmul.mubr.msk.f32.gmra.mrb[2].mxu0 %vm111_vm0, %v79_v9  ;;  %v107_v34 = vld [vmem:[%s5721_s1 + $0xf8] sm:$0xff]  ;;  %v4793_v35 = vld [vmem:[%s5722_s0 + $0x4] ss:$8 sps:$4 sm:$0xff]  }
   0xd   :  { %3969 = vmatmul.mubr.msk.f32.gmra.mrb[2].mxu1 %vm111_vm0, %v95_v10  ;;  %3947 = vmatprep.mubr.msk.f32.mxu0 %vm111_vm0, %v80_v11 }
   0xe   :  { %3971 = vmatprep.mubr.msk.f32.mxu1 %vm111_vm0, %v96_v12 }
  0x10   :  { %3948 = vmatmul.mubr.msk.f32.gmra.mrb[4].mxu0 %vm111_vm0, %v81_v13 }
  0x11   :  { %3972 = vmatmul.mubr.msk.f32.gmra.mrb[4].mxu1 %vm111_vm0, %v97_v14  ;;  %3950 = vmatprep.mubr.msk.f32.mxu0 %vm111_vm0, %v82_v15 }
  0x12   :  { %3974 = vmatprep.mubr.msk.f32.mxu1 %vm111_vm0, %v98_v16 }
  0x14   :  { %3951 = vmatmul.mubr.msk.f32.gmra.mrb[6].mxu0 %vm111_vm0, %v83_v17 }
  0x15   :  { %3975 = vmatmul.mubr.msk.f32.gmra.mrb[6].mxu1 %vm111_vm0, %v99_v18  ;;  %3953 = vmatprep.mubr.msk.f32.mxu0 %vm111_vm0, %v84_v19 }
  0x16   :  { %3977 = vmatprep.mubr.msk.f32.mxu1 %vm111_vm0, %v100_v20  ;;  %v4799_v20 = vld [vmem:[%s5722_s0] ss:$8 sps:$4 sm:$0xff]  }
  0x18   :  { %3954 = vmatmul.mubr.msk.f32.gmra.mrb[8].mxu0 %vm111_vm0, %v85_v21  ;;  %v4804_v21 = vld [vmem:[%s5722_s0 + $0x14] ss:$8 sps:$4 sm:$0xff]  }
  0x19   :  { %3978 = vmatmul.mubr.msk.f32.gmra.mrb[8].mxu1 %vm111_vm0, %v101_v22  ;;  %3956 = vmatprep.mubr.msk.f32.mxu0 %vm111_vm0, %v86_v23  ;;  %v4811_v22 = vld [vmem:[%s5722_s0 + $0x10] ss:$8 sps:$4 sm:$0xff]   ;;  %v4816_v23 = vld [vmem:[%s5722_s0 + $0x24] ss:$8 sps:$4 sm:$0xff]  }
  0x1a   :  { %3980 = vmatprep.mubr.msk.f32.mxu1 %vm111_vm0, %v102_v24  ;;  %v4823_v24 = vld [vmem:[%s5722_s0 + $0x20] ss:$8 sps:$4 sm:$0xff]  }
  0x1c   :  { %3957 = vmatmul.mubr.msk.f32.gmra.mrb[10].mxu0 %vm111_vm0, %v87_v25  ;;  %v4828_v25 = vld [vmem:[%s5722_s0 + $0x34] ss:$8 sps:$4 sm:$0xff]  }
  0x1d   :  { %3981 = vmatmul.mubr.msk.f32.gmra.mrb[10].mxu1 %vm111_vm0, %v103_v26  ;;  %3959 = vmatprep.mubr.msk.f32.mxu0 %vm111_vm0, %v88_v27  ;;  %v4835_v26 = vld [vmem:[%s5722_s0 + $0x30] ss:$8 sps:$4 sm:$0xff]   ;;  %v4840_v27 = vld [vmem:[%s5722_s0 + $0x44] ss:$8 sps:$4 sm:$0xff]  }
  0x1e   :  { %3983 = vmatprep.mubr.msk.f32.mxu1 %vm111_vm0, %v104_v28  ;;  %v4847_v28 = vld [vmem:[%s5722_s0 + $0x40] ss:$8 sps:$4 sm:$0xff]  }
  0x20   :  { %3960 = vmatmul.mubr.msk.f32.gmra.mrb[12].mxu0 %vm111_vm0, %v89_v29  ;;  %v4852_v29 = vld [vmem:[%s5722_s0 + $0x54] ss:$8 sps:$4 sm:$0xff]  }
  0x21   :  { %3984 = vmatmul.mubr.msk.f32.gmra.mrb[12].mxu1 %vm111_vm0, %v105_v30  ;;  %3962 = vmatprep.mubr.msk.f32.mxu0 %vm111_vm0, %v90_v31  ;;  %v4859_v30 = vld [vmem:[%s5722_s0 + $0x50] ss:$8 sps:$4 sm:$0xff]   ;;  %v4864_v31 = vld [vmem:[%s5722_s0 + $0x64] ss:$8 sps:$4 sm:$0xff]  }
  0x22   :  { %3986 = vmatprep.mubr.msk.f32.mxu1 %vm111_vm0, %v106_v32  ;;  %v4871_v32 = vld [vmem:[%s5722_s0 + $0x60] ss:$8 sps:$4 sm:$0xff]  }
  0x24   :  { %3963 = vmatmul.mubr.msk.f32.gmra.mrb[14].mxu0 %vm111_vm0, %v91_v33  ;;  %v4876_v33 = vld [vmem:[%s5722_s0 + $0x74] ss:$8 sps:$4 sm:$0xff]  }
  0x25   :  { %3987 = vmatmul.mubr.msk.f32.gmra.mrb[14].mxu1 %vm111_vm0, %v107_v34  ;;  %v4883_v34 = vld [vmem:[%s5722_s0 + $0x70] ss:$8 sps:$4 sm:$0xff]  }
  0x26   :  { %647 = vmatprep.mubr.bf16.mxu1 %v4793_v35 }
  0xdb   :  { %v3943_v36 = vpop.f32.mrb[0].mxu0 }
  0xdc   :  { %v3967_v37 = vpop.f32.mrb[0].mxu1  ;;  %v274_v38 = vpop.f32.mrb[1].mxu0 }
  0xdd   :  { %v354_v39 = vpop.f32.mrb[1].mxu1  ;;  %v433_v40 = vpack.c.bf16 %v3943_v36, %v274_v38  ;;  %v4888_v36 = vld [vmem:[%s5722_s0 + $0x84] ss:$8 sps:$4 sm:$0xff]   ;;  %v4900_v38 = vld [vmem:[%s5722_s0 + $0x94] ss:$8 sps:$4 sm:$0xff]  }
  0xde   :  { %v441_v41 = vpack.c.bf16 %v3967_v37, %v354_v39  ;;  %v4895_v37 = vld [vmem:[%s5722_s0 + $0x80] ss:$8 sps:$4 sm:$0xff]   ;;  %v4907_v39 = vld [vmem:[%s5722_s0 + $0x90] ss:$8 sps:$4 sm:$0xff]  }
  0xdf   :  { %v3946_v42 = vpop.f32.mrb[2].mxu0 }
  0xe0   :  { %v3970_v43 = vpop.f32.mrb[2].mxu1  ;;  %3575 = vmatprep.subr.bf16.mxu1 %v441_v41  ;;  %v284_v44 = vpop.f32.mrb[3].mxu0  ;;  %v4919_v41 = vld [vmem:[%s5722_s0 + $0xa0] ss:$8 sps:$4 sm:$0xff]  }
  0xe1   :  { %v364_v45 = vpop.f32.mrb[3].mxu1  ;;  %3576 = vmatpush3.bf16.msra.mxu1 %v433_v40  ;;  %v434_v46 = vpack.c.bf16 %v3946_v42, %v284_v44  ;;  %v4912_v40 = vld [vmem:[%s5722_s0 + $0xa4] ss:$8 sps:$4 sm:$0xff]   ;;  %v4924_v42 = vld [vmem:[%s5722_s0 + $0xb4] ss:$8 sps:$4 sm:$0xff]  }
  0xe2   :  { %v442_v47 = vpack.c.bf16 %v3970_v43, %v364_v45  ;;  %v808_v43 = vld [vmem:[%s5723_s4] sm:$0xff]  ;;  %v809_v44 = vld [vmem:[%s5723_s4 + $0x8] sm:$0xff] }
  0xe3   :  { %v3949_v48 = vpop.f32.mrb[4].mxu0  ;;  %v4205_v45 = vpack.c.bf16 %v809_v44, %v808_v43 }
  0xe4   :  { %v3973_v49 = vpop.f32.mrb[4].mxu1  ;;  %3577 = vmatprep.subr.bf16.mxu1 %v442_v47  ;;  %v294_v50 = vpop.f32.mrb[5].mxu0  ;;  %v4942_v47 = vld [vmem:[%s5722_s0 + $0xc4] ss:$8 sps:$4 sm:$0xff]  }
  0xe5   :  { %v374_v51 = vpop.f32.mrb[5].mxu1  ;;  %3578 = vmatpush3.bf16.msra.mxu1 %v434_v46  ;;  %v435_v52 = vpack.c.bf16 %v3949_v48, %v294_v50  ;;  %v4937_v46 = vld [vmem:[%s5722_s0 + $0xb0] ss:$8 sps:$4 sm:$0xff]   ;;  %4206 = vmatprep.subr.bf16.mxu0 %v4205_v45 }
  0xe6   :  { %v443_v53 = vpack.c.bf16 %v3973_v49, %v374_v51  ;;  %4208 = vmatpush3.bf16.msra.mxu0 %v4205_v45  ;;  %v810_v48 = vld [vmem:[%s5723_s4 + $0x10] sm:$0xff]  ;;  %v811_v49 = vld [vmem:[%s5723_s4 + $0x18] sm:$0xff]  ;;  %v4955_v51 = vld [vmem:[%s5722_s0 + $0xc0] ss:$8 sps:$4 sm:$0xff]  }
  0xe7   :  { %v3952_v54 = vpop.f32.mrb[6].mxu0  ;;  %v4209_v50 = vpack.c.bf16 %v811_v49, %v810_v48 }
  0xe8   :  { %v3976_v55 = vpop.f32.mrb[6].mxu1  ;;  %3579 = vmatprep.subr.bf16.mxu1 %v443_v53  ;;  %v304_v56 = vpop.f32.mrb[7].mxu0  ;;  %v4967_v53 = vld [vmem:[%s5722_s0 + $0xd0] ss:$8 sps:$4 sm:$0xff]  }
  0xe9   :  { %v384_v57 = vpop.f32.mrb[7].mxu1  ;;  %3580 = vmatpush3.bf16.msra.mxu1 %v435_v52  ;;  %v436_v58 = vpack.c.bf16 %v3952_v54, %v304_v56  ;;  %4210 = vmatprep.subr.bf16.mxu0 %v4209_v50  ;;  %v4960_v52 = vld [vmem:[%s5722_s0 + $0xd4] ss:$8 sps:$4 sm:$0xff]   ;;  %v4972_v54 = vld [vmem:[%s5722_s0 + $0xe4] ss:$8 sps:$4 sm:$0xff]  }
  0xea   :  { %v444_v59 = vpack.c.bf16 %v3976_v55, %v384_v57  ;;  %4212 = vmatpush3.bf16.msra.mxu0 %v4209_v50  ;;  %v4979_v55 = vld [vmem:[%s5722_s0 + $0xe0] ss:$8 sps:$4 sm:$0xff]   ;;  %v4984_v56 = vld [vmem:[%s5722_s0 + $0xf4] ss:$8 sps:$4 sm:$0xff]   ;;  %v4991_v57 = vld [vmem:[%s5722_s0 + $0xf0] ss:$8 sps:$4 sm:$0xff]  }
  0xeb   :  { %v3955_v60 = vpop.f32.mrb[8].mxu0 }
  0xec   :  { %v3979_v61 = vpop.f32.mrb[8].mxu1  ;;  %3581 = vmatprep.subr.bf16.mxu1 %v444_v59  ;;  %v314_v62 = vpop.f32.mrb[9].mxu0  ;;  %v4997_v59 = vld [vmem:[%s5724_s3] ss:$0 sm:$0xff] }
  0xed   :  { %v394_v63 = vpop.f32.mrb[9].mxu1  ;;  %3582 = vmatpush3.bf16.msra.mxu1 %v436_v58  ;;  %v437_v0 = vpack.c.bf16 %v3955_v60, %v314_v62 }
  0xee   :  { %v445_v1 = vpack.c.bf16 %v3979_v61, %v394_v63 }
  0xef   :  { %v3958_v2 = vpop.f32.mrb[10].mxu0 }
  0xf0   :  { %v3982_v3 = vpop.f32.mrb[10].mxu1  ;;  %3583 = vmatprep.subr.bf16.mxu1 %v445_v1  ;;  %v324_v4 = vpop.f32.mrb[11].mxu0 }
  0xf1   :  { %v404_v5 = vpop.f32.mrb[11].mxu1  ;;  %3584 = vmatpush3.bf16.msra.mxu1 %v437_v0  ;;  %v438_v6 = vpack.c.bf16 %v3958_v2, %v324_v4 }
  0xf2   :  { %v446_v7 = vpack.c.bf16 %v3982_v3, %v404_v5 }
  0xf3   :  { %v3961_v8 = vpop.f32.mrb[12].mxu0 }
  0xf4   :  { %v3985_v9 = vpop.f32.mrb[12].mxu1  ;;  %3585 = vmatprep.subr.bf16.mxu1 %v446_v7  ;;  %v334_v10 = vpop.f32.mrb[13].mxu0 }
  0xf5   :  { %v414_v11 = vpop.f32.mrb[13].mxu1  ;;  %3586 = vmatpush3.bf16.msra.mxu1 %v438_v6  ;;  %v439_v12 = vpack.c.bf16 %v3961_v8, %v334_v10 }
  0xf6   :  { %v447_v13 = vpack.c.bf16 %v3985_v9, %v414_v11 }
  0xf7   :  { %v3964_v14 = vpop.f32.mrb[14].mxu0 }
  0xf8   :  { %v3988_v15 = vpop.f32.mrb[14].mxu1  ;;  %3587 = vmatprep.subr.bf16.mxu1 %v447_v13  ;;  %v344_v16 = vpop.f32.mrb[15].mxu0 }
  0xf9   :  { %v424_v17 = vpop.f32.mrb[15].mxu1  ;;  %3588 = vmatpush3.bf16.msra.mxu1 %v439_v12  ;;  %v440_v18 = vpack.c.bf16 %v3964_v14, %v344_v16 }
  0xfa   :  { %v448_v19 = vpack.c.bf16 %v3988_v15, %v424_v17 }
  0xfc   :  { %3589 = vmatprep.subr.bf16.mxu1 %v448_v19 }
  0xfd   :  { %3590 = vmatpush3.bf16.msra.mxu1 %v440_v18 }
 0x100   :  { %648 = vmatmul.mubr.bf16.vlgmr.msra.gmra.mrb[16].mxu1 %v4799_v20 }
 0x101   :  { %655 = vmatprep.mubr.bf16.mxu1 %v4804_v21 }
 0x108   :  { %656 = vmatmul.mubr.bf16.gmra.mrb[20].mxu1 %v4811_v22 }
 0x109   :  { %663 = vmatprep.mubr.bf16.mxu1 %v4816_v23 }
 0x110   :  { %664 = vmatmul.mubr.bf16.gmra.mrb[24].mxu1 %v4823_v24 }
 0x111   :  { %671 = vmatprep.mubr.bf16.mxu1 %v4828_v25 }
 0x118   :  { %672 = vmatmul.mubr.bf16.gmra.mrb[28].mxu1 %v4835_v26 }
 0x119   :  { %679 = vmatprep.mubr.bf16.mxu1 %v4840_v27 }
 0x120   :  { %680 = vmatmul.mubr.bf16.gmra.mrb[32].mxu1 %v4847_v28 }
 0x121   :  { %687 = vmatprep.mubr.bf16.mxu1 %v4852_v29 }
 0x128   :  { %688 = vmatmul.mubr.bf16.gmra.mrb[36].mxu1 %v4859_v30 }
 0x129   :  { %695 = vmatprep.mubr.bf16.mxu1 %v4864_v31 }
 0x130   :  { %696 = vmatmul.mubr.bf16.gmra.mrb[40].mxu1 %v4871_v32 }
 0x131   :  { %703 = vmatprep.mubr.bf16.mxu1 %v4876_v33 }
 0x138   :  { %704 = vmatmul.mubr.bf16.gmra.mrb[44].mxu1 %v4883_v34 }
 0x139   :  { %711 = vmatprep.mubr.bf16.mxu1 %v4888_v36 }
 0x140   :  { %712 = vmatmul.mubr.bf16.gmra.mrb[48].mxu1 %v4895_v37 }
 0x141   :  { %719 = vmatprep.mubr.bf16.mxu1 %v4900_v38 }
 0x148   :  { %720 = vmatmul.mubr.bf16.gmra.mrb[52].mxu1 %v4907_v39 }
 0x149   :  { %727 = vmatprep.mubr.bf16.mxu1 %v4912_v40 }
 0x150   :  { %728 = vmatmul.mubr.bf16.gmra.mrb[56].mxu1 %v4919_v41 }
 0x151   :  { %735 = vmatprep.mubr.bf16.mxu1 %v4924_v42 }
 0x158   :  { %736 = vmatmul.mubr.bf16.gmra.mrb[60].mxu1 %v4937_v46 }
 0x159   :  { %743 = vmatprep.mubr.bf16.mxu1 %v4942_v47 }
 0x160   :  { %744 = vmatmul.mubr.bf16.gmra.mrb[64].mxu1 %v4955_v51 }
 0x161   :  { %751 = vmatprep.mubr.bf16.mxu1 %v4960_v52 }
 0x168   :  { %752 = vmatmul.mubr.bf16.gmra.mrb[68].mxu1 %v4967_v53 }
 0x169   :  { %759 = vmatprep.mubr.bf16.mxu1 %v4972_v54 }
 0x170   :  { %760 = vmatmul.mubr.bf16.gmra.mrb[72].mxu1 %v4979_v55 }
 0x171   :  { %767 = vmatprep.mubr.bf16.mxu1 %v4984_v56 }
 0x178   :  { %768 = vmatmul.mubr.bf16.gmra.mrb[76].mxu1 %v4991_v57 }
 0x1d3   :  { %v3591_v58 = vpop.f32.mrb[16].mxu1 }
 0x1d4   :  { %v3592_v60 = vpop.f32.mrb[17].mxu1 }
 0x1d5   :  { %v3593_v61 = vadd.f32 %v3592_v60, %v3591_v58  ;;  %v3594_v62 = vpop.f32.mrb[18].mxu1 }
 0x1d6   :  { %v3595_v63 = vpop.f32.mrb[19].mxu1 }
 0x1d7   :  { %v650_v0 = vadd.f32 %v3593_v61, %v4997_v59  ;;  %v3596_v1 = vadd.f32 %v3595_v63, %v3594_v62 }
 0x1d9   :  { %v776_v2 = vmax.f32 %v650_v0, 0.0  ;;  %v653_v3 = vadd.f32 %v3596_v1, %v4997_v59 }
 0x1db   :  { %v777_v4 = vmax.f32 %v653_v3, 0.0  ;;  %v3597_v5 = vpop.f32.mrb[20].mxu1  ;;  %3997 = vmatprep.mubr.msk.f32.mxu0 %vm813_vm1, %v776_v2 }
 0x1dc   :  { %v3598_v6 = vpop.f32.mrb[21].mxu1 }
 0x1dd   :  { %v3599_v7 = vadd.f32 %v3598_v6, %v3597_v5  ;;  %v3600_v8 = vpop.f32.mrb[22].mxu1  ;;  %3998 = vmatmul.mubr.msk.f32.vlgmr.msra.gmra.mrb[16].mxu0 %vm813_vm1, %v777_v4 }
 0x1de   :  { %v3601_v9 = vpop.f32.mrb[23].mxu1 }
 0x1df   :  { %v658_v10 = vadd.f32 %v3599_v7, %v4997_v59  ;;  %v3602_v11 = vadd.f32 %v3601_v9, %v3600_v8 }
 0x1e1   :  { %v778_v12 = vmax.f32 %v658_v10, 0.0  ;;  %v661_v13 = vadd.f32 %v3602_v11, %v4997_v59 }
 0x1e3   :  { %v779_v14 = vmax.f32 %v661_v13, 0.0  ;;  %v3603_v15 = vpop.f32.mrb[24].mxu1  ;;  %4000 = vmatprep.mubr.msk.f32.mxu0 %vm813_vm1, %v778_v12 }
 0x1e4   :  { %v3604_v16 = vpop.f32.mrb[25].mxu1 }
 0x1e5   :  { %v3605_v17 = vadd.f32 %v3604_v16, %v3603_v15  ;;  %v3606_v18 = vpop.f32.mrb[26].mxu1  ;;  %4001 = vmatmul.mubr.msk.f32.gmra.mrb[18].mxu0 %vm813_vm1, %v779_v14 }
 0x1e6   :  { %v3607_v19 = vpop.f32.mrb[27].mxu1 }
 0x1e7   :  { %v666_v43 = vadd.f32 %v3605_v17, %v4997_v59  ;;  %v3608_v44 = vadd.f32 %v3607_v19, %v3606_v18 }
 0x1e9   :  { %v780_v45 = vmax.f32 %v666_v43, 0.0  ;;  %v669_v48 = vadd.f32 %v3608_v44, %v4997_v59 }
 0x1eb   :  { %v781_v49 = vmax.f32 %v669_v48, 0.0  ;;  %v3609_v50 = vpop.f32.mrb[28].mxu1  ;;  %4003 = vmatprep.mubr.msk.f32.mxu0 %vm813_vm1, %v780_v45 }
 0x1ec   :  { %v3610_v58 = vpop.f32.mrb[29].mxu1 }
 0x1ed   :  { %v3611_v60 = vadd.f32 %v3610_v58, %v3609_v50  ;;  %v3612_v61 = vpop.f32.mrb[30].mxu1  ;;  %4004 = vmatmul.mubr.msk.f32.gmra.mrb[20].mxu0 %vm813_vm1, %v781_v49 }
 0x1ee   :  { %v3613_v62 = vpop.f32.mrb[31].mxu1 }
 0x1ef   :  { %v674_v63 = vadd.f32 %v3611_v60, %v4997_v59  ;;  %v3614_v0 = vadd.f32 %v3613_v62, %v3612_v61 }
 0x1f1   :  { %v782_v1 = vmax.f32 %v674_v63, 0.0  ;;  %v677_v2 = vadd.f32 %v3614_v0, %v4997_v59 }
 0x1f3   :  { %v783_v3 = vmax.f32 %v677_v2, 0.0  ;;  %v3615_v4 = vpop.f32.mrb[32].mxu1  ;;  %4006 = vmatprep.mubr.msk.f32.mxu0 %vm813_vm1, %v782_v1 }
 0x1f4   :  { %v3616_v5 = vpop.f32.mrb[33].mxu1 }
 0x1f5   :  { %v3617_v6 = vadd.f32 %v3616_v5, %v3615_v4  ;;  %v3618_v7 = vpop.f32.mrb[34].mxu1  ;;  %4007 = vmatmul.mubr.msk.f32.gmra.mrb[22].mxu0 %vm813_vm1, %v783_v3 }
 0x1f6   :  { %v3619_v8 = vpop.f32.mrb[35].mxu1 }
 0x1f7   :  { %v682_v9 = vadd.f32 %v3617_v6, %v4997_v59  ;;  %v3620_v10 = vadd.f32 %v3619_v8, %v3618_v7 }
 0x1f9   :  { %v784_v11 = vmax.f32 %v682_v9, 0.0  ;;  %v685_v12 = vadd.f32 %v3620_v10, %v4997_v59 }
 0x1fb   :  { %v785_v13 = vmax.f32 %v685_v12, 0.0  ;;  %v3621_v14 = vpop.f32.mrb[36].mxu1  ;;  %4009 = vmatprep.mubr.msk.f32.mxu0 %vm813_vm1, %v784_v11 }
 0x1fc   :  { %v3622_v15 = vpop.f32.mrb[37].mxu1 }
 0x1fd   :  { %v3623_v16 = vadd.f32 %v3622_v15, %v3621_v14  ;;  %v3624_v17 = vpop.f32.mrb[38].mxu1  ;;  %4010 = vmatmul.mubr.msk.f32.gmra.mrb[24].mxu0 %vm813_vm1, %v785_v13 }
 0x1fe   :  { %v3625_v18 = vpop.f32.mrb[39].mxu1 }
 0x1ff   :  { %v690_v19 = vadd.f32 %v3623_v16, %v4997_v59  ;;  %v3626_v43 = vadd.f32 %v3625_v18, %v3624_v17 }
 0x201   :  { %v786_v44 = vmax.f32 %v690_v19, 0.0  ;;  %v693_v45 = vadd.f32 %v3626_v43, %v4997_v59 }
 0x203   :  { %v787_v48 = vmax.f32 %v693_v45, 0.0  ;;  %v3627_v49 = vpop.f32.mrb[40].mxu1  ;;  %4012 = vmatprep.mubr.msk.f32.mxu0 %vm813_vm1, %v786_v44 }
 0x204   :  { %v3628_v50 = vpop.f32.mrb[41].mxu1 }
 0x205   :  { %v3629_v58 = vadd.f32 %v3628_v50, %v3627_v49  ;;  %v3630_v60 = vpop.f32.mrb[42].mxu1  ;;  %4013 = vmatmul.mubr.msk.f32.gmra.mrb[26].mxu0 %vm813_vm1, %v787_v48 }
 0x206   :  { %v3631_v61 = vpop.f32.mrb[43].mxu1 }
 0x207   :  { %v698_v62 = vadd.f32 %v3629_v58, %v4997_v59  ;;  %v3632_v63 = vadd.f32 %v3631_v61, %v3630_v60 }
 0x209   :  { %v788_v0 = vmax.f32 %v698_v62, 0.0  ;;  %v701_v1 = vadd.f32 %v3632_v63, %v4997_v59 }
 0x20b   :  { %v789_v2 = vmax.f32 %v701_v1, 0.0  ;;  %v3633_v3 = vpop.f32.mrb[44].mxu1  ;;  %4015 = vmatprep.mubr.msk.f32.mxu0 %vm813_vm1, %v788_v0 }
 0x20c   :  { %v3634_v4 = vpop.f32.mrb[45].mxu1 }
 0x20d   :  { %v3635_v5 = vadd.f32 %v3634_v4, %v3633_v3  ;;  %v3636_v6 = vpop.f32.mrb[46].mxu1  ;;  %4016 = vmatmul.mubr.msk.f32.gmra.mrb[28].mxu0 %vm813_vm1, %v789_v2 }
 0x20e   :  { %v3637_v7 = vpop.f32.mrb[47].mxu1 }
 0x20f   :  { %v706_v8 = vadd.f32 %v3635_v5, %v4997_v59  ;;  %v3638_v9 = vadd.f32 %v3637_v7, %v3636_v6 }
 0x211   :  { %v790_v10 = vmax.f32 %v706_v8, 0.0  ;;  %v709_v11 = vadd.f32 %v3638_v9, %v4997_v59 }
 0x213   :  { %v791_v12 = vmax.f32 %v709_v11, 0.0  ;;  %v3639_v13 = vpop.f32.mrb[48].mxu1  ;;  %4018 = vmatprep.mubr.msk.f32.mxu0 %vm813_vm1, %v790_v10 }
 0x214   :  { %v3640_v14 = vpop.f32.mrb[49].mxu1 }
 0x215   :  { %v3641_v15 = vadd.f32 %v3640_v14, %v3639_v13  ;;  %v3642_v16 = vpop.f32.mrb[50].mxu1  ;;  %4019 = vmatmul.mubr.msk.f32.gmra.mrb[30].mxu0 %vm813_vm1, %v791_v12 }
 0x216   :  { %v3643_v17 = vpop.f32.mrb[51].mxu1 }
 0x217   :  { %v714_v18 = vadd.f32 %v3641_v15, %v4997_v59  ;;  %v3644_v19 = vadd.f32 %v3643_v17, %v3642_v16 }
 0x219   :  { %v792_v43 = vmax.f32 %v714_v18, 0.0  ;;  %v717_v44 = vadd.f32 %v3644_v19, %v4997_v59 }
 0x21b   :  { %v793_v45 = vmax.f32 %v717_v44, 0.0  ;;  %v3645_v48 = vpop.f32.mrb[52].mxu1  ;;  %4021 = vmatprep.mubr.msk.f32.mxu0 %vm813_vm1, %v792_v43 }
 0x21c   :  { %v3646_v49 = vpop.f32.mrb[53].mxu1 }
 0x21d   :  { %v3647_v50 = vadd.f32 %v3646_v49, %v3645_v48  ;;  %v3648_v58 = vpop.f32.mrb[54].mxu1  ;;  %4022 = vmatmul.mubr.msk.f32.gmra.mrb[32].mxu0 %vm813_vm1, %v793_v45 }
 0x21e   :  { %v3649_v60 = vpop.f32.mrb[55].mxu1 }
 0x21f   :  { %v722_v61 = vadd.f32 %v3647_v50, %v4997_v59  ;;  %v3650_v62 = vadd.f32 %v3649_v60, %v3648_v58 }
 0x221   :  { %v794_v63 = vmax.f32 %v722_v61, 0.0  ;;  %v725_v0 = vadd.f32 %v3650_v62, %v4997_v59 }
 0x223   :  { %v795_v1 = vmax.f32 %v725_v0, 0.0  ;;  %v3651_v2 = vpop.f32.mrb[56].mxu1  ;;  %4024 = vmatprep.mubr.msk.f32.mxu0 %vm813_vm1, %v794_v63 }
 0x224   :  { %v3652_v3 = vpop.f32.mrb[57].mxu1 }
 0x225   :  { %v3653_v4 = vadd.f32 %v3652_v3, %v3651_v2  ;;  %v3654_v5 = vpop.f32.mrb[58].mxu1  ;;  %4025 = vmatmul.mubr.msk.f32.gmra.mrb[34].mxu0 %vm813_vm1, %v795_v1 }
 0x226   :  { %v3655_v6 = vpop.f32.mrb[59].mxu1 }
 0x227   :  { %v730_v7 = vadd.f32 %v3653_v4, %v4997_v59  ;;  %v3656_v8 = vadd.f32 %v3655_v6, %v3654_v5 }
 0x229   :  { %v796_v9 = vmax.f32 %v730_v7, 0.0  ;;  %v733_v10 = vadd.f32 %v3656_v8, %v4997_v59 }
 0x22b   :  { %v797_v11 = vmax.f32 %v733_v10, 0.0  ;;  %v3657_v12 = vpop.f32.mrb[60].mxu1  ;;  %4027 = vmatprep.mubr.msk.f32.mxu0 %vm813_vm1, %v796_v9 }
 0x22c   :  { %v3658_v13 = vpop.f32.mrb[61].mxu1 }
 0x22d   :  { %v3659_v14 = vadd.f32 %v3658_v13, %v3657_v12  ;;  %v3660_v15 = vpop.f32.mrb[62].mxu1  ;;  %4028 = vmatmul.mubr.msk.f32.gmra.mrb[36].mxu0 %vm813_vm1, %v797_v11 }
 0x22e   :  { %v3661_v16 = vpop.f32.mrb[63].mxu1 }
 0x22f   :  { %v738_v17 = vadd.f32 %v3659_v14, %v4997_v59  ;;  %v3662_v18 = vadd.f32 %v3661_v16, %v3660_v15 }
 0x231   :  { %v798_v19 = vmax.f32 %v738_v17, 0.0  ;;  %v741_v43 = vadd.f32 %v3662_v18, %v4997_v59 }
 0x233   :  { %v799_v44 = vmax.f32 %v741_v43, 0.0  ;;  %v3663_v45 = vpop.f32.mrb[64].mxu1  ;;  %4030 = vmatprep.mubr.msk.f32.mxu0 %vm813_vm1, %v798_v19 }
 0x234   :  { %v3664_v48 = vpop.f32.mrb[65].mxu1 }
 0x235   :  { %v3665_v49 = vadd.f32 %v3664_v48, %v3663_v45  ;;  %v3666_v50 = vpop.f32.mrb[66].mxu1  ;;  %4031 = vmatmul.mubr.msk.f32.gmra.mrb[38].mxu0 %vm813_vm1, %v799_v44 }
 0x236   :  { %v3667_v58 = vpop.f32.mrb[67].mxu1 }
 0x237   :  { %v746_v60 = vadd.f32 %v3665_v49, %v4997_v59  ;;  %v3668_v61 = vadd.f32 %v3667_v58, %v3666_v50 }
 0x239   :  { %v800_v62 = vmax.f32 %v746_v60, 0.0  ;;  %v749_v63 = vadd.f32 %v3668_v61, %v4997_v59 }
 0x23b   :  { %v801_v0 = vmax.f32 %v749_v63, 0.0  ;;  %v3669_v1 = vpop.f32.mrb[68].mxu1  ;;  %4033 = vmatprep.mubr.msk.f32.mxu0 %vm813_vm1, %v800_v62 }
 0x23c   :  { %v3670_v2 = vpop.f32.mrb[69].mxu1 }
 0x23d   :  { %v3671_v3 = vadd.f32 %v3670_v2, %v3669_v1  ;;  %v3672_v4 = vpop.f32.mrb[70].mxu1  ;;  %4034 = vmatmul.mubr.msk.f32.gmra.mrb[40].mxu0 %vm813_vm1, %v801_v0 }
 0x23e   :  { %v3673_v5 = vpop.f32.mrb[71].mxu1 }
 0x23f   :  { %v754_v6 = vadd.f32 %v3671_v3, %v4997_v59  ;;  %v3674_v7 = vadd.f32 %v3673_v5, %v3672_v4 }
 0x241   :  { %v802_v8 = vmax.f32 %v754_v6, 0.0  ;;  %v757_v9 = vadd.f32 %v3674_v7, %v4997_v59 }
 0x243   :  { %v803_v10 = vmax.f32 %v757_v9, 0.0  ;;  %v3675_v11 = vpop.f32.mrb[72].mxu1  ;;  %4036 = vmatprep.mubr.msk.f32.mxu0 %vm813_vm1, %v802_v8 }
 0x244   :  { %v3676_v12 = vpop.f32.mrb[73].mxu1 }
 0x245   :  { %v3677_v13 = vadd.f32 %v3676_v12, %v3675_v11  ;;  %v3678_v14 = vpop.f32.mrb[74].mxu1  ;;  %4037 = vmatmul.mubr.msk.f32.gmra.mrb[42].mxu0 %vm813_vm1, %v803_v10 }
 0x246   :  { %v3679_v15 = vpop.f32.mrb[75].mxu1 }
 0x247   :  { %v762_v16 = vadd.f32 %v3677_v13, %v4997_v59  ;;  %v3680_v17 = vadd.f32 %v3679_v15, %v3678_v14 }
 0x249   :  { %v804_v18 = vmax.f32 %v762_v16, 0.0  ;;  %v765_v19 = vadd.f32 %v3680_v17, %v4997_v59 }
 0x24b   :  { %v805_v43 = vmax.f32 %v765_v19, 0.0  ;;  %v3681_v44 = vpop.f32.mrb[76].mxu1  ;;  %4039 = vmatprep.mubr.msk.f32.mxu0 %vm813_vm1, %v804_v18 }
 0x24c   :  { %v3682_v45 = vpop.f32.mrb[77].mxu1 }
 0x24d   :  { %v3683_v48 = vadd.f32 %v3682_v45, %v3681_v44  ;;  %v3684_v49 = vpop.f32.mrb[78].mxu1  ;;  %4040 = vmatmul.mubr.msk.f32.gmra.mrb[44].mxu0 %vm813_vm1, %v805_v43 }
 0x24e   :  { %v3685_v50 = vpop.f32.mrb[79].mxu1 }
 0x24f   :  { %v770_v58 = vadd.f32 %v3683_v48, %v4997_v59  ;;  %v3686_v60 = vadd.f32 %v3685_v50, %v3684_v49 }
 0x251   :  { %v806_v61 = vmax.f32 %v770_v58, 0.0  ;;  %v773_v62 = vadd.f32 %v3686_v60, %v4997_v59 }
 0x253   :  { %v807_v63 = vmax.f32 %v773_v62, 0.0  ;;  %4042 = vmatprep.mubr.msk.f32.mxu0 %vm813_vm1, %v806_v61 }
 0x255   :  { %4043 = vmatmul.mubr.msk.f32.gmra.mrb[46].mxu0 %vm813_vm1, %v807_v63 }
 0x256   :  { %1189 = vmatprep.mubr.bf16.mxu0 %v4793_v35 }
 0x2b0   :  { %v3999_v0 = vpop.f32.mrb[16].mxu0 }
 0x2b1   :  { %v976_v1 = vpop.f32.mrb[17].mxu0 }
 0x2b2   :  { %v1135_v2 = vpack.c.bf16 %v3999_v0, %v976_v1 }
 0x2b8   :  { %v4002_v3 = vpop.f32.mrb[18].mxu0 }
 0x2b9   :  { %v986_v4 = vpop.f32.mrb[19].mxu0 }
 0x2ba   :  { %v1136_v5 = vpack.c.bf16 %v4002_v3, %v986_v4 }
 0x2c0   :  { %v4005_v6 = vpop.f32.mrb[20].mxu0 }
 0x2c1   :  { %v996_v7 = vpop.f32.mrb[21].mxu0 }
 0x2c2   :  { %v1137_v8 = vpack.c.bf16 %v4005_v6, %v996_v7 }
 0x2c8   :  { %v4008_v9 = vpop.f32.mrb[22].mxu0 }
 0x2c9   :  { %v1006_v10 = vpop.f32.mrb[23].mxu0 }
 0x2ca   :  { %v1138_v11 = vpack.c.bf16 %v4008_v9, %v1006_v10 }
 0x2d0   :  { %v4011_v59 = vpop.f32.mrb[24].mxu0 }
 0x2d1   :  { %v1016_v12 = vpop.f32.mrb[25].mxu0 }
 0x2d2   :  { %v1139_v13 = vpack.c.bf16 %v4011_v59, %v1016_v12 }
 0x2d8   :  { %v4014_v14 = vpop.f32.mrb[26].mxu0 }
 0x2d9   :  { %v1026_v15 = vpop.f32.mrb[27].mxu0 }
 0x2da   :  { %v1140_v16 = vpack.c.bf16 %v4014_v14, %v1026_v15 }
 0x2e0   :  { %v4017_v17 = vpop.f32.mrb[28].mxu0 }
 0x2e1   :  { %v1036_v35 = vpop.f32.mrb[29].mxu0 }
 0x2e2   :  { %v1141_v18 = vpack.c.bf16 %v4017_v17, %v1036_v35 }
 0x2e8   :  { %v4020_v19 = vpop.f32.mrb[30].mxu0 }
 0x2e9   :  { %v1046_v43 = vpop.f32.mrb[31].mxu0 }
 0x2ea   :  { %v1142_v44 = vpack.c.bf16 %v4020_v19, %v1046_v43 }
 0x2f0   :  { %v4023_v45 = vpop.f32.mrb[32].mxu0 }
 0x2f1   :  { %v1056_v48 = vpop.f32.mrb[33].mxu0 }
 0x2f2   :  { %v1143_v49 = vpack.c.bf16 %v4023_v45, %v1056_v48 }
 0x2f4   :  { %3723 = vmatprep.subr.bf16.mxu0 %v1143_v49 }
 0x2f5   :  { %3724 = vmatpush3.bf16.msra.mxu0 %v1135_v2 }
 0x2f8   :  { %v4026_v50 = vpop.f32.mrb[34].mxu0 }
 0x2f9   :  { %v1066_v58 = vpop.f32.mrb[35].mxu0 }
 0x2fa   :  { %v1144_v60 = vpack.c.bf16 %v4026_v50, %v1066_v58 }
 0x2fc   :  { %3725 = vmatprep.subr.bf16.mxu0 %v1144_v60 }
 0x2fd   :  { %3726 = vmatpush3.bf16.msra.mxu0 %v1136_v5 }
 0x300   :  { %v4029_v61 = vpop.f32.mrb[36].mxu0 }
 0x301   :  { %v1076_v62 = vpop.f32.mrb[37].mxu0 }
 0x302   :  { %v1145_v63 = vpack.c.bf16 %v4029_v61, %v1076_v62 }
 0x304   :  { %3727 = vmatprep.subr.bf16.mxu0 %v1145_v63 }
 0x305   :  { %3728 = vmatpush3.bf16.msra.mxu0 %v1137_v8 }
 0x308   :  { %v4032_v0 = vpop.f32.mrb[38].mxu0 }
 0x309   :  { %v1086_v1 = vpop.f32.mrb[39].mxu0 }
 0x30a   :  { %v1146_v3 = vpack.c.bf16 %v4032_v0, %v1086_v1 }
 0x30c   :  { %3729 = vmatprep.subr.bf16.mxu0 %v1146_v3 }
 0x30d   :  { %3730 = vmatpush3.bf16.msra.mxu0 %v1138_v11  ;;  %v1350_v11 = vld [vmem:[%s5725_s6] sm:$0xff] }
 0x310   :  { %v4035_v4 = vpop.f32.mrb[40].mxu0 }
 0x311   :  { %v1096_v6 = vpop.f32.mrb[41].mxu0 }
 0x312   :  { %v1147_v7 = vpack.c.bf16 %v4035_v4, %v1096_v6 }
 0x314   :  { %3731 = vmatprep.subr.bf16.mxu0 %v1147_v7 }
 0x315   :  { %3732 = vmatpush3.bf16.msra.mxu0 %v1139_v13  ;;  %v1351_v13 = vld [vmem:[%s5725_s6 + $0x8] sm:$0xff] }
 0x316   :  { %v4213_v17 = vpack.c.bf16 %v1351_v13, %v1350_v11 }
 0x318   :  { %v4038_v2 = vpop.f32.mrb[42].mxu0  ;;  %4214 = vmatprep.subr.bf16.mxu1 %v4213_v17 }
 0x319   :  { %v1106_v9 = vpop.f32.mrb[43].mxu0  ;;  %4216 = vmatpush3.bf16.msra.mxu1 %v4213_v17 }
 0x31a   :  { %v1148_v10 = vpack.c.bf16 %v4038_v2, %v1106_v9 }
 0x31c   :  { %3733 = vmatprep.subr.bf16.mxu0 %v1148_v10 }
 0x31d   :  { %3734 = vmatpush3.bf16.msra.mxu0 %v1140_v16 }
 0x320   :  { %v4041_v5 = vpop.f32.mrb[44].mxu0 }
 0x321   :  { %v1116_v59 = vpop.f32.mrb[45].mxu0 }
 0x322   :  { %v1149_v12 = vpack.c.bf16 %v4041_v5, %v1116_v59 }
 0x324   :  { %3735 = vmatprep.subr.bf16.mxu0 %v1149_v12 }
 0x325   :  { %3736 = vmatpush3.bf16.msra.mxu0 %v1141_v18 }
 0x328   :  { %v4044_v8 = vpop.f32.mrb[46].mxu0 }
 0x329   :  { %v1126_v14 = vpop.f32.mrb[47].mxu0 }
 0x32a   :  { %v1150_v15 = vpack.c.bf16 %v4044_v8, %v1126_v14 }
 0x32c   :  { %3737 = vmatprep.subr.bf16.mxu0 %v1150_v15 }
 0x32d   :  { %3738 = vmatpush3.bf16.msra.mxu0 %v1142_v44 }
 0x330   :  { %1190 = vmatmul.mubr.bf16.vlgmr.msra.gmra.mrb[48].mxu0 %v4799_v20  ;;  %v1352_v20 = vld [vmem:[%s5725_s6 + $0x10] sm:$0xff] }
 0x331   :  { %1197 = vmatprep.mubr.bf16.mxu0 %v4804_v21  ;;  %v1353_v21 = vld [vmem:[%s5725_s6 + $0x18] sm:$0xff] }
 0x338   :  { %1198 = vmatmul.mubr.bf16.gmra.mrb[52].mxu0 %v4811_v22  ;;  %v4217_v22 = vpack.c.bf16 %v1353_v21, %v1352_v20 }
 0x339   :  { %1205 = vmatprep.mubr.bf16.mxu0 %v4816_v23 }
 0x33a   :  { %4218 = vmatprep.subr.bf16.mxu1 %v4217_v22 }
 0x33b   :  { %4220 = vmatpush3.bf16.msra.mxu1 %v4217_v22 }
 0x340   :  { %1206 = vmatmul.mubr.bf16.gmra.mrb[56].mxu0 %v4823_v24  ;;  %v5110_v24 = vld [vmem:[%s5726_s5] ss:$0 sm:$0xff] }
 0x341   :  { %1213 = vmatprep.mubr.bf16.mxu0 %v4828_v25 }
 0x348   :  { %1214 = vmatmul.mubr.bf16.gmra.mrb[60].mxu0 %v4835_v26 }
 0x349   :  { %1221 = vmatprep.mubr.bf16.mxu0 %v4840_v27 }
 0x350   :  { %1222 = vmatmul.mubr.bf16.gmra.mrb[64].mxu0 %v4847_v28 }
 0x351   :  { %1229 = vmatprep.mubr.bf16.mxu0 %v4852_v29 }
 0x358   :  { %1230 = vmatmul.mubr.bf16.gmra.mrb[68].mxu0 %v4859_v30 }
 0x359   :  { %1237 = vmatprep.mubr.bf16.mxu0 %v4864_v31 }
 0x360   :  { %1238 = vmatmul.mubr.bf16.gmra.mrb[72].mxu0 %v4871_v32 }
 0x361   :  { %1245 = vmatprep.mubr.bf16.mxu0 %v4876_v33 }
 0x368   :  { %1246 = vmatmul.mubr.bf16.gmra.mrb[76].mxu0 %v4883_v34 }
 0x369   :  { %1253 = vmatprep.mubr.bf16.mxu0 %v4888_v36 }
 0x370   :  { %1254 = vmatmul.mubr.bf16.gmra.mrb[80].mxu0 %v4895_v37 }
 0x371   :  { %1261 = vmatprep.mubr.bf16.mxu0 %v4900_v38 }
 0x378   :  { %1262 = vmatmul.mubr.bf16.gmra.mrb[84].mxu0 %v4907_v39 }
 0x379   :  { %1269 = vmatprep.mubr.bf16.mxu0 %v4912_v40 }
 0x380   :  { %1270 = vmatmul.mubr.bf16.gmra.mrb[88].mxu0 %v4919_v41 }
 0x381   :  { %1277 = vmatprep.mubr.bf16.mxu0 %v4924_v42 }
 0x388   :  { %1278 = vmatmul.mubr.bf16.gmra.mrb[92].mxu0 %v4937_v46 }
 0x389   :  { %1285 = vmatprep.mubr.bf16.mxu0 %v4942_v47 }
 0x390   :  { %1286 = vmatmul.mubr.bf16.gmra.mrb[96].mxu0 %v4955_v51 }
 0x391   :  { %1293 = vmatprep.mubr.bf16.mxu0 %v4960_v52 }
 0x398   :  { %1294 = vmatmul.mubr.bf16.gmra.mrb[100].mxu0 %v4967_v53 }
 0x399   :  { %1301 = vmatprep.mubr.bf16.mxu0 %v4972_v54 }
 0x3a0   :  { %1302 = vmatmul.mubr.bf16.gmra.mrb[104].mxu0 %v4979_v55 }
 0x3a1   :  { %1309 = vmatprep.mubr.bf16.mxu0 %v4984_v56 }
 0x3a8   :  { %1310 = vmatmul.mubr.bf16.gmra.mrb[108].mxu0 %v4991_v57 }
 0x403   :  { %v3739_v23 = vpop.f32.mrb[48].mxu0 }
 0x404   :  { %v3740_v25 = vpop.f32.mrb[49].mxu0 }
 0x405   :  { %v3741_v26 = vadd.f32 %v3740_v25, %v3739_v23  ;;  %v3742_v27 = vpop.f32.mrb[50].mxu0 }
 0x406   :  { %v3743_v28 = vpop.f32.mrb[51].mxu0 }
 0x407   :  { %v1192_v29 = vadd.f32 %v3741_v26, %v5110_v24  ;;  %v3744_v30 = vadd.f32 %v3743_v28, %v3742_v27 }
 0x409   :  { %v1318_v31 = vmax.f32 %v1192_v29, 0.0  ;;  %v1195_v32 = vadd.f32 %v3744_v30, %v5110_v24 }
 0x40b   :  { %v1319_v33 = vmax.f32 %v1195_v32, 0.0  ;;  %v3745_v34 = vpop.f32.mrb[52].mxu0  ;;  %4053 = vmatprep.mubr.msk.f32.mxu1 %vm813_vm1, %v1318_v31  ;;  %v1359_v36 = vmul.f32 %v1318_v31, %v1318_v31 }
 0x40c   :  { %v3746_v37 = vpop.f32.mrb[53].mxu0 }
 0x40d   :  { %v3747_v38 = vadd.f32 %v3746_v37, %v3745_v34  ;;  %v3748_v39 = vpop.f32.mrb[54].mxu0  ;;  %4054 = vmatmul.mubr.msk.f32.vlgmr.msra.gmra.mrb[80].mxu1 %vm813_vm1, %v1319_v33  ;;  %v1391_v40 = vsel %vm813_vm1, %v1359_v36, 0.0  ;;  %v1360_v41 = vmul.f32 %v1319_v33, %v1319_v33 }
 0x40e   :  { %v3749_v42 = vpop.f32.mrb[55].mxu0  ;;  %1392 = vadd.xlane.f32.xlu0 %v1391_v40 }
 0x40f   :  { %v1200_v46 = vadd.f32 %v3747_v38, %v5110_v24  ;;  %v3750_v47 = vadd.f32 %v3749_v42, %v3748_v39  ;;  %v1394_v53 = vsel %vm813_vm1, %v1360_v41, 0.0 }
 0x411   :  { %v1320_v51 = vmax.f32 %v1200_v46, 0.0  ;;  %v1203_v52 = vadd.f32 %v3750_v47, %v5110_v24 }
 0x412   :  { %1395 = vadd.xlane.f32.xlu0 %v1394_v53 }
 0x413   :  { %v1321_v54 = vmax.f32 %v1203_v52, 0.0  ;;  %v3751_v55 = vpop.f32.mrb[56].mxu0  ;;  %4056 = vmatprep.mubr.msk.f32.mxu1 %vm813_vm1, %v1320_v51  ;;  %v1361_v56 = vmul.f32 %v1320_v51, %v1320_v51 }
 0x414   :  { %v3752_v57 = vpop.f32.mrb[57].mxu0 }
 0x415   :  { %v3753_v16 = vadd.f32 %v3752_v57, %v3751_v55  ;;  %v3754_v35 = vpop.f32.mrb[58].mxu0  ;;  %4057 = vmatmul.mubr.msk.f32.gmra.mrb[82].mxu1 %vm813_vm1, %v1321_v54  ;;  %v1397_v18 = vsel %vm813_vm1, %v1361_v56, 0.0  ;;  %v1362_v19 = vmul.f32 %v1321_v54, %v1321_v54 }
 0x416   :  { %v3755_v43 = vpop.f32.mrb[59].mxu0  ;;  %1398 = vadd.xlane.f32.xlu1 %v1397_v18 }
 0x417   :  { %v1208_v44 = vadd.f32 %v3753_v16, %v5110_v24  ;;  %v3756_v45 = vadd.f32 %v3755_v43, %v3754_v35  ;;  %v1400_v50 = vsel %vm813_vm1, %v1362_v19, 0.0 }
 0x419   :  { %v1322_v48 = vmax.f32 %v1208_v44, 0.0  ;;  %v1211_v49 = vadd.f32 %v3756_v45, %v5110_v24 }
 0x41a   :  { %1401 = vadd.xlane.f32.xlu1 %v1400_v50 }
 0x41b   :  { %v1323_v58 = vmax.f32 %v1211_v49, 0.0  ;;  %v3757_v60 = vpop.f32.mrb[60].mxu0  ;;  %4059 = vmatprep.mubr.msk.f32.mxu1 %vm813_vm1, %v1322_v48  ;;  %v1363_v61 = vmul.f32 %v1322_v48, %v1322_v48 }
 0x41c   :  { %v3758_v62 = vpop.f32.mrb[61].mxu0 }
 0x41d   :  { %v3759_v63 = vadd.f32 %v3758_v62, %v3757_v60  ;;  %v3760_v0 = vpop.f32.mrb[62].mxu0  ;;  %4060 = vmatmul.mubr.msk.f32.gmra.mrb[84].mxu1 %vm813_vm1, %v1323_v58  ;;  %v1364_v1 = vmul.f32 %v1323_v58, %v1323_v58  ;;  %v1403_v3 = vsel %vm813_vm1, %v1363_v61, 0.0 }
 0x41e   :  { %v3761_v4 = vpop.f32.mrb[63].mxu0  ;;  %1404 = vadd.xlane.f32.xlu0 %v1403_v3 }
 0x41f   :  { %v1216_v6 = vadd.f32 %v3759_v63, %v5110_v24  ;;  %v3762_v7 = vadd.f32 %v3761_v4, %v3760_v0  ;;  %v1406_v2 = vsel %vm813_vm1, %v1364_v1, 0.0 }
 0x420   :  { %1407 = vadd.xlane.f32.xlu1 %v1406_v2 }
 0x421   :  { %v1324_v9 = vmax.f32 %v1216_v6, 0.0  ;;  %v1219_v10 = vadd.f32 %v3762_v7, %v5110_v24 }
 0x423   :  { %v1325_v5 = vmax.f32 %v1219_v10, 0.0  ;;  %v3763_v59 = vpop.f32.mrb[64].mxu0  ;;  %4062 = vmatprep.mubr.msk.f32.mxu1 %vm813_vm1, %v1324_v9  ;;  %v1365_v12 = vmul.f32 %v1324_v9, %v1324_v9 }
 0x424   :  { %v3764_v8 = vpop.f32.mrb[65].mxu0 }
 0x425   :  { %v3765_v14 = vadd.f32 %v3764_v8, %v3763_v59  ;;  %v3766_v11 = vpop.f32.mrb[66].mxu0  ;;  %4063 = vmatmul.mubr.msk.f32.gmra.mrb[86].mxu1 %vm813_vm1, %v1325_v5  ;;  %v1366_v13 = vmul.f32 %v1325_v5, %v1325_v5  ;;  %v1409_v15 = vsel %vm813_vm1, %v1365_v12, 0.0 }
 0x426   :  { %v3767_v17 = vpop.f32.mrb[67].mxu0  ;;  %1410 = vadd.xlane.f32.xlu0 %v1409_v15 }
 0x427   :  { %v1224_v20 = vadd.f32 %v3765_v14, %v5110_v24  ;;  %v3768_v21 = vadd.f32 %v3767_v17, %v3766_v11  ;;  %v1412_v22 = vsel %vm813_vm1, %v1366_v13, 0.0 }
 0x428   :  { %1413 = vadd.xlane.f32.xlu1 %v1412_v22 }
 0x429   :  { %v1326_v23 = vmax.f32 %v1224_v20, 0.0  ;;  %v1227_v25 = vadd.f32 %v3768_v21, %v5110_v24 }
 0x42b   :  { %v1327_v26 = vmax.f32 %v1227_v25, 0.0  ;;  %v3769_v27 = vpop.f32.mrb[68].mxu0  ;;  %4065 = vmatprep.mubr.msk.f32.mxu1 %vm813_vm1, %v1326_v23  ;;  %v1367_v28 = vmul.f32 %v1326_v23, %v1326_v23 }
 0x42c   :  { %v3770_v29 = vpop.f32.mrb[69].mxu0 }
 0x42d   :  { %v3771_v30 = vadd.f32 %v3770_v29, %v3769_v27  ;;  %v3772_v31 = vpop.f32.mrb[70].mxu0  ;;  %4066 = vmatmul.mubr.msk.f32.gmra.mrb[88].mxu1 %vm813_vm1, %v1327_v26  ;;  %v1368_v32 = vmul.f32 %v1327_v26, %v1327_v26  ;;  %v1415_v33 = vsel %vm813_vm1, %v1367_v28, 0.0 }
 0x42e   :  { %v3773_v34 = vpop.f32.mrb[71].mxu0  ;;  %1416 = vadd.xlane.f32.xlu0 %v1415_v33 }
 0x42f   :  { %v1232_v36 = vadd.f32 %v3771_v30, %v5110_v24  ;;  %v3774_v37 = vadd.f32 %v3773_v34, %v3772_v31  ;;  %v1418_v38 = vsel %vm813_vm1, %v1368_v32, 0.0 }
 0x430   :  { %1419 = vadd.xlane.f32.xlu1 %v1418_v38 }
 0x431   :  { %v1328_v39 = vmax.f32 %v1232_v36, 0.0  ;;  %v1235_v40 = vadd.f32 %v3774_v37, %v5110_v24 }
 0x433   :  { %v1329_v41 = vmax.f32 %v1235_v40, 0.0  ;;  %v3775_v42 = vpop.f32.mrb[72].mxu0  ;;  %4068 = vmatprep.mubr.msk.f32.mxu1 %vm813_vm1, %v1328_v39  ;;  %v1369_v46 = vmul.f32 %v1328_v39, %v1328_v39 }
 0x434   :  { %v3776_v47 = vpop.f32.mrb[73].mxu0 }
 0x435   :  { %v3777_v51 = vadd.f32 %v3776_v47, %v3775_v42  ;;  %v3778_v52 = vpop.f32.mrb[74].mxu0  ;;  %4069 = vmatmul.mubr.msk.f32.gmra.mrb[90].mxu1 %vm813_vm1, %v1329_v41  ;;  %v1370_v53 = vmul.f32 %v1329_v41, %v1329_v41  ;;  %v1421_v54 = vsel %vm813_vm1, %v1369_v46, 0.0 }
 0x436   :  { %v3779_v55 = vpop.f32.mrb[75].mxu0  ;;  %1422 = vadd.xlane.f32.xlu0 %v1421_v54 }
 0x437   :  { %v1240_v56 = vadd.f32 %v3777_v51, %v5110_v24  ;;  %v3780_v57 = vadd.f32 %v3779_v55, %v3778_v52  ;;  %v1424_v16 = vsel %vm813_vm1, %v1370_v53, 0.0 }
 0x438   :  { %1425 = vadd.xlane.f32.xlu1 %v1424_v16 }
 0x439   :  { %v1330_v35 = vmax.f32 %v1240_v56, 0.0  ;;  %v1243_v18 = vadd.f32 %v3780_v57, %v5110_v24 }
 0x43b   :  { %v1331_v19 = vmax.f32 %v1243_v18, 0.0  ;;  %v3781_v43 = vpop.f32.mrb[76].mxu0  ;;  %4071 = vmatprep.mubr.msk.f32.mxu1 %vm813_vm1, %v1330_v35  ;;  %v1371_v44 = vmul.f32 %v1330_v35, %v1330_v35 }
 0x43c   :  { %v3782_v45 = vpop.f32.mrb[77].mxu0 }
 0x43d   :  { %v3783_v48 = vadd.f32 %v3782_v45, %v3781_v43  ;;  %v3784_v49 = vpop.f32.mrb[78].mxu0  ;;  %4072 = vmatmul.mubr.msk.f32.gmra.mrb[92].mxu1 %vm813_vm1, %v1331_v19  ;;  %v1372_v50 = vmul.f32 %v1331_v19, %v1331_v19  ;;  %v1427_v58 = vsel %vm813_vm1, %v1371_v44, 0.0 }
 0x43e   :  { %v3785_v60 = vpop.f32.mrb[79].mxu0  ;;  %1428 = vadd.xlane.f32.xlu0 %v1427_v58 }
 0x43f   :  { %v1248_v61 = vadd.f32 %v3783_v48, %v5110_v24  ;;  %v3786_v62 = vadd.f32 %v3785_v60, %v3784_v49  ;;  %v1430_v63 = vsel %vm813_vm1, %v1372_v50, 0.0 }
 0x440   :  { %1431 = vadd.xlane.f32.xlu1 %v1430_v63 }
 0x441   :  { %v1332_v0 = vmax.f32 %v1248_v61, 0.0  ;;  %v1251_v1 = vadd.f32 %v3786_v62, %v5110_v24 }
 0x443   :  { %v1333_v3 = vmax.f32 %v1251_v1, 0.0  ;;  %v3787_v4 = vpop.f32.mrb[80].mxu0  ;;  %4074 = vmatprep.mubr.msk.f32.mxu1 %vm813_vm1, %v1332_v0  ;;  %v1373_v6 = vmul.f32 %v1332_v0, %v1332_v0 }
 0x444   :  { %v3788_v7 = vpop.f32.mrb[81].mxu0 }
 0x445   :  { %v3789_v2 = vadd.f32 %v3788_v7, %v3787_v4  ;;  %v3790_v9 = vpop.f32.mrb[82].mxu0  ;;  %4075 = vmatmul.mubr.msk.f32.gmra.mrb[94].mxu1 %vm813_vm1, %v1333_v3  ;;  %v1374_v10 = vmul.f32 %v1333_v3, %v1333_v3  ;;  %v1433_v5 = vsel %vm813_vm1, %v1373_v6, 0.0 }
 0x446   :  { %v3791_v59 = vpop.f32.mrb[83].mxu0  ;;  %1434 = vadd.xlane.f32.xlu0 %v1433_v5 }
 0x447   :  { %v1256_v12 = vadd.f32 %v3789_v2, %v5110_v24  ;;  %v3792_v8 = vadd.f32 %v3791_v59, %v3790_v9  ;;  %v1436_v14 = vsel %vm813_vm1, %v1374_v10, 0.0 }
 0x448   :  { %1437 = vadd.xlane.f32.xlu1 %v1436_v14 }
 0x449   :  { %v1334_v11 = vmax.f32 %v1256_v12, 0.0  ;;  %v1259_v13 = vadd.f32 %v3792_v8, %v5110_v24 }
 0x44b   :  { %v1335_v15 = vmax.f32 %v1259_v13, 0.0  ;;  %v3793_v17 = vpop.f32.mrb[84].mxu0  ;;  %4077 = vmatprep.mubr.msk.f32.mxu1 %vm813_vm1, %v1334_v11  ;;  %v1375_v20 = vmul.f32 %v1334_v11, %v1334_v11 }
 0x44c   :  { %v3794_v21 = vpop.f32.mrb[85].mxu0 }
 0x44d   :  { %v3795_v22 = vadd.f32 %v3794_v21, %v3793_v17  ;;  %v3796_v23 = vpop.f32.mrb[86].mxu0  ;;  %4078 = vmatmul.mubr.msk.f32.gmra.mrb[96].mxu1 %vm813_vm1, %v1335_v15  ;;  %v1376_v25 = vmul.f32 %v1335_v15, %v1335_v15  ;;  %v1439_v26 = vsel %vm813_vm1, %v1375_v20, 0.0 }
 0x44e   :  { %v3797_v27 = vpop.f32.mrb[87].mxu0  ;;  %1440 = vadd.xlane.f32.xlu0 %v1439_v26 }
 0x44f   :  { %v1264_v28 = vadd.f32 %v3795_v22, %v5110_v24  ;;  %v3798_v29 = vadd.f32 %v3797_v27, %v3796_v23  ;;  %v1442_v30 = vsel %vm813_vm1, %v1376_v25, 0.0 }
 0x450   :  { %1443 = vadd.xlane.f32.xlu1 %v1442_v30 }
 0x451   :  { %v1336_v31 = vmax.f32 %v1264_v28, 0.0  ;;  %v1267_v32 = vadd.f32 %v3798_v29, %v5110_v24 }
 0x453   :  { %v1337_v33 = vmax.f32 %v1267_v32, 0.0  ;;  %v3799_v34 = vpop.f32.mrb[88].mxu0  ;;  %4080 = vmatprep.mubr.msk.f32.mxu1 %vm813_vm1, %v1336_v31  ;;  %v1377_v36 = vmul.f32 %v1336_v31, %v1336_v31 }
 0x454   :  { %v3800_v37 = vpop.f32.mrb[89].mxu0 }
 0x455   :  { %v3801_v38 = vadd.f32 %v3800_v37, %v3799_v34  ;;  %v3802_v39 = vpop.f32.mrb[90].mxu0  ;;  %4081 = vmatmul.mubr.msk.f32.gmra.mrb[98].mxu1 %vm813_vm1, %v1337_v33  ;;  %v1378_v40 = vmul.f32 %v1337_v33, %v1337_v33  ;;  %v1445_v41 = vsel %vm813_vm1, %v1377_v36, 0.0 }
 0x456   :  { %v3803_v42 = vpop.f32.mrb[91].mxu0  ;;  %1446 = vadd.xlane.f32.xlu0 %v1445_v41 }
 0x457   :  { %v1272_v46 = vadd.f32 %v3801_v38, %v5110_v24  ;;  %v3804_v47 = vadd.f32 %v3803_v42, %v3802_v39  ;;  %v1448_v51 = vsel %vm813_vm1, %v1378_v40, 0.0 }
 0x458   :  { %1449 = vadd.xlane.f32.xlu1 %v1448_v51 }
 0x459   :  { %v1338_v52 = vmax.f32 %v1272_v46, 0.0  ;;  %v1275_v53 = vadd.f32 %v3804_v47, %v5110_v24 }
 0x45b   :  { %v1339_v54 = vmax.f32 %v1275_v53, 0.0  ;;  %v3805_v55 = vpop.f32.mrb[92].mxu0  ;;  %4083 = vmatprep.mubr.msk.f32.mxu1 %vm813_vm1, %v1338_v52  ;;  %v1379_v56 = vmul.f32 %v1338_v52, %v1338_v52 }
 0x45c   :  { %v3806_v57 = vpop.f32.mrb[93].mxu0 }
 0x45d   :  { %v3807_v16 = vadd.f32 %v3806_v57, %v3805_v55  ;;  %v3808_v35 = vpop.f32.mrb[94].mxu0  ;;  %4084 = vmatmul.mubr.msk.f32.gmra.mrb[100].mxu1 %vm813_vm1, %v1339_v54  ;;  %v1380_v18 = vmul.f32 %v1339_v54, %v1339_v54  ;;  %v1451_v19 = vsel %vm813_vm1, %v1379_v56, 0.0 }
 0x45e   :  { %v3809_v43 = vpop.f32.mrb[95].mxu0  ;;  %1452 = vadd.xlane.f32.xlu0 %v1451_v19  ;;  %v1355_v19 = vld [vmem:[%s5727_s8] sm:$0xff] }
 0x45f   :  { %v1280_v44 = vadd.f32 %v3807_v16, %v5110_v24  ;;  %v3810_v45 = vadd.f32 %v3809_v43, %v3808_v35  ;;  %v1454_v48 = vsel %vm813_vm1, %v1380_v18, 0.0  ;;  %4101 = vmatprep.subr.mxu1 %v1355_v19 }
 0x460   :  { %1455 = vadd.xlane.f32.xlu1 %v1454_v48  ;;  %4102 = vmatpush3.msra.mxu1 %v1355_v19 }
 0x461   :  { %v1340_v49 = vmax.f32 %v1280_v44, 0.0  ;;  %v1283_v50 = vadd.f32 %v3810_v45, %v5110_v24 }
 0x463   :  { %v1341_v58 = vmax.f32 %v1283_v50, 0.0  ;;  %v3811_v60 = vpop.f32.mrb[96].mxu0  ;;  %4086 = vmatprep.mubr.msk.f32.mxu1 %vm813_vm1, %v1340_v49  ;;  %v1381_v61 = vmul.f32 %v1340_v49, %v1340_v49 }
 0x464   :  { %v3812_v62 = vpop.f32.mrb[97].mxu0 }
 0x465   :  { %v3813_v63 = vadd.f32 %v3812_v62, %v3811_v60  ;;  %v3814_v0 = vpop.f32.mrb[98].mxu0  ;;  %4087 = vmatmul.mubr.msk.f32.gmra.mrb[102].mxu1 %vm813_vm1, %v1341_v58  ;;  %v1382_v1 = vmul.f32 %v1341_v58, %v1341_v58  ;;  %v1457_v3 = vsel %vm813_vm1, %v1381_v61, 0.0  ;;  %v5214_v58 = vld [vmem:[%s5728_s7] ss:$0 sm:$0xff] }
 0x466   :  { %v3815_v4 = vpop.f32.mrb[99].mxu0  ;;  %1458 = vadd.xlane.f32.xlu0 %v1457_v3 }
 0x467   :  { %v1288_v6 = vadd.f32 %v3813_v63, %v5110_v24  ;;  %v3816_v7 = vadd.f32 %v3815_v4, %v3814_v0  ;;  %v1460_v2 = vsel %vm813_vm1, %v1382_v1, 0.0 }
 0x468   :  { %1461 = vadd.xlane.f32.xlu1 %v1460_v2 }
 0x469   :  { %v1342_v9 = vmax.f32 %v1288_v6, 0.0  ;;  %v1291_v10 = vadd.f32 %v3816_v7, %v5110_v24 }
 0x46b   :  { %v1343_v5 = vmax.f32 %v1291_v10, 0.0  ;;  %v3817_v59 = vpop.f32.mrb[100].mxu0  ;;  %4089 = vmatprep.mubr.msk.f32.mxu1 %vm813_vm1, %v1342_v9  ;;  %v1383_v12 = vmul.f32 %v1342_v9, %v1342_v9 }
 0x46c   :  { %v3818_v8 = vpop.f32.mrb[101].mxu0 }
 0x46d   :  { %v3819_v14 = vadd.f32 %v3818_v8, %v3817_v59  ;;  %v3820_v11 = vpop.f32.mrb[102].mxu0  ;;  %4090 = vmatmul.mubr.msk.f32.gmra.mrb[104].mxu1 %vm813_vm1, %v1343_v5  ;;  %v1384_v13 = vmul.f32 %v1343_v5, %v1343_v5  ;;  %v1463_v15 = vsel %vm813_vm1, %v1383_v12, 0.0 }
 0x46e   :  { %v3821_v17 = vpop.f32.mrb[103].mxu0  ;;  %1464 = vadd.xlane.f32.xlu0 %v1463_v15 }
 0x46f   :  { %v1296_v20 = vadd.f32 %v3819_v14, %v5110_v24  ;;  %v3822_v21 = vadd.f32 %v3821_v17, %v3820_v11  ;;  %v1466_v22 = vsel %vm813_vm1, %v1384_v13, 0.0 }
 0x470   :  { %1467 = vadd.xlane.f32.xlu1 %v1466_v22 }
 0x471   :  { %v1344_v23 = vmax.f32 %v1296_v20, 0.0  ;;  %v1299_v25 = vadd.f32 %v3822_v21, %v5110_v24 }
 0x473   :  { %v1345_v26 = vmax.f32 %v1299_v25, 0.0  ;;  %v3823_v27 = vpop.f32.mrb[104].mxu0  ;;  %4092 = vmatprep.mubr.msk.f32.mxu1 %vm813_vm1, %v1344_v23  ;;  %v1385_v28 = vmul.f32 %v1344_v23, %v1344_v23 }
 0x474   :  { %v3824_v29 = vpop.f32.mrb[105].mxu0 }
 0x475   :  { %v3825_v30 = vadd.f32 %v3824_v29, %v3823_v27  ;;  %v3826_v31 = vpop.f32.mrb[106].mxu0  ;;  %4093 = vmatmul.mubr.msk.f32.gmra.mrb[106].mxu1 %vm813_vm1, %v1345_v26  ;;  %v1386_v32 = vmul.f32 %v1345_v26, %v1345_v26  ;;  %v1469_v33 = vsel %vm813_vm1, %v1385_v28, 0.0 }
 0x476   :  { %v3827_v34 = vpop.f32.mrb[107].mxu0  ;;  %1470 = vadd.xlane.f32.xlu0 %v1469_v33 }
 0x477   :  { %v1304_v36 = vadd.f32 %v3825_v30, %v5110_v24  ;;  %v3828_v37 = vadd.f32 %v3827_v34, %v3826_v31  ;;  %v1472_v38 = vsel %vm813_vm1, %v1386_v32, 0.0 }
 0x478   :  { %1473 = vadd.xlane.f32.xlu1 %v1472_v38 }
 0x479   :  { %v1346_v39 = vmax.f32 %v1304_v36, 0.0  ;;  %v1307_v40 = vadd.f32 %v3828_v37, %v5110_v24 }
 0x47b   :  { %v1347_v41 = vmax.f32 %v1307_v40, 0.0  ;;  %v3829_v42 = vpop.f32.mrb[108].mxu0  ;;  %4095 = vmatprep.mubr.msk.f32.mxu1 %vm813_vm1, %v1346_v39  ;;  %v1387_v46 = vmul.f32 %v1346_v39, %v1346_v39 }
 0x47c   :  { %v3830_v47 = vpop.f32.mrb[109].mxu0 }
 0x47d   :  { %v3831_v51 = vadd.f32 %v3830_v47, %v3829_v42  ;;  %v3832_v52 = vpop.f32.mrb[110].mxu0  ;;  %4096 = vmatmul.mubr.msk.f32.gmra.mrb[108].mxu1 %vm813_vm1, %v1347_v41  ;;  %v1388_v53 = vmul.f32 %v1347_v41, %v1347_v41  ;;  %v1475_v54 = vsel %vm813_vm1, %v1387_v46, 0.0 }
 0x47e   :  { %v3833_v55 = vpop.f32.mrb[111].mxu0  ;;  %1476 = vadd.xlane.f32.xlu0 %v1475_v54 }
 0x47f   :  { %v1312_v56 = vadd.f32 %v3831_v51, %v5110_v24  ;;  %v3834_v57 = vadd.f32 %v3833_v55, %v3832_v52  ;;  %v1478_v16 = vsel %vm813_vm1, %v1388_v53, 0.0 }
 0x480   :  { %1479 = vadd.xlane.f32.xlu1 %v1478_v16 }
 0x481   :  { %v1348_v35 = vmax.f32 %v1312_v56, 0.0  ;;  %v1315_v18 = vadd.f32 %v3834_v57, %v5110_v24 }
 0x483   :  { %v1349_v43 = vmax.f32 %v1315_v18, 0.0  ;;  %4098 = vmatprep.mubr.msk.f32.mxu1 %vm813_vm1, %v1348_v35  ;;  %v1389_v44 = vmul.f32 %v1348_v35, %v1348_v35 }
 0x485   :  { %4099 = vmatmul.mubr.msk.f32.gmra.mrb[110].mxu1 %vm813_vm1, %v1349_v43  ;;  %v1390_v45 = vmul.f32 %v1349_v43, %v1349_v43  ;;  %v1481_v48 = vsel %vm813_vm1, %v1389_v44, 0.0 }
 0x486   :  { %1482 = vadd.xlane.f32.xlu0 %v1481_v48 }
 0x487   :  { %v1484_v49 = vsel %vm813_vm1, %v1390_v45, 0.0 }
 0x488   :  { %1485 = vadd.xlane.f32.xlu1 %v1484_v49 }
 0x49b   :  { %v1393_v24 = vpop.xlane.xlu0 %1392 }
 0x49c   :  { %v1814_v1 = vadd.f32 %v5214_v58, %v1393_v24 }
 0x49f   :  { %v1396_v50 = vpop.xlane.xlu0 %1395 }
 0x4a0   :  { %v1815_v62 = vadd.f32 %v5214_v58, %v1396_v50 }
 0x4a3   :  { %v1399_v60 = vpop.xlane.xlu1 %1398 }
 0x4a4   :  { %v1816_v11 = vadd.f32 %v5214_v58, %v1399_v60 }
 0x4a7   :  { %v1402_v2 = vpop.xlane.xlu1 %1401 }
 0x4a8   :  { %v1817_v12 = vadd.f32 %v5214_v58, %v1402_v2 }
 0x4ab   :  { %v1405_v23 = vpop.xlane.xlu0 %1404 }
 0x4ac   :  { %v1818_v31 = vadd.f32 %v5214_v58, %v1405_v23 }
 0x4ad   :  { %v1408_v21 = vpop.xlane.xlu1 %1407 }
 0x4ae   :  { %v1819_v28 = vadd.f32 %v5214_v58, %v1408_v21 }
 0x4b3   :  { %v1411_v51 = vpop.xlane.xlu0 %1410 }
 0x4b4   :  { %v1820_v16 = vadd.f32 %v5214_v58, %v1411_v51 }
 0x4b5   :  { %v1414_v46 = vpop.xlane.xlu1 %1413 }
 0x4b6   :  { %v1821_v55 = vadd.f32 %v5214_v58, %v1414_v46 }
 0x4bd   :  { %v1420_v60 = vpop.xlane.xlu1 %1419 }
 0x4c5   :  { %v1426_v23 = vpop.xlane.xlu1 %1425 }
 0x4e0   :  { %v4055_v61 = vpop.f32.mrb[80].mxu1 }
 0x4e1   :  { %v1847_v63 = vmul.f32 2.0, %v4055_v61  ;;  %v1649_v0 = vpop.f32.mrb[81].mxu1  ;;  %v1417_v61 = vpop.xlane.xlu0 %1416 }
 0x4e2   :  { %v1846_v3 = vmul.f32 2.0, %v1649_v0  ;;  %v1822_v2 = vadd.f32 %v5214_v58, %v1417_v61 }
 0x4e3   :  { %v1879_v4 = vsub.f32 %v1815_v62, %v1847_v63  ;;  %v1357_v63 = vld [vmem:[%s5729_s10] sm:$0xf] }
 0x4e4   :  { %v1878_v6 = vsub.f32 %v1814_v1, %v1846_v3  ;;  %4151 = vmatprep.subr.msk.mxu0 %vm2853_vm2, %v1357_v63 }
 0x4e5   :  { %v1911_v7 = vmax.f32 %v1879_v4, 0.0  ;;  %4152 = vmatpush3.msk.msra.mxu0 %vm2853_vm2, %v1357_v63 }
 0x4e6   :  { %v1910_v9 = vmax.f32 %v1878_v6, 0.0 }
 0x4e7   :  { %v1975_v10 = vadd.f32 0.0001, %v1911_v7  ;;  %v1943_v32 = vadd.f32 1.0, %v1911_v7  ;;  %v1823_v7 = vadd.f32 %v5214_v58, %v1420_v60 }
 0x4e8   :  { %v1974_v5 = vadd.f32 0.0001, %v1910_v9  ;;  %v4058_v59 = vpop.f32.mrb[82].mxu1  ;;  %v1942_v36 = vadd.f32 1.0, %v1910_v9 }
 0x4e9   :  { %4271 = vrcp.f32 %v1975_v10  ;;  %v1849_v8 = vmul.f32 2.0, %v4058_v59  ;;  %v1659_v14 = vpop.f32.mrb[83].mxu1 }
 0x4ea   :  { %4273 = vrcp.f32 %v1974_v5  ;;  %v1848_v13 = vmul.f32 2.0, %v1659_v14 }
 0x4eb   :  { %v1881_v15 = vsub.f32 %v1817_v12, %v1849_v8 }
 0x4ec   :  { %v1880_v17 = vsub.f32 %v1816_v11, %v1848_v13 }
 0x4ed   :  { %v1913_v20 = vmax.f32 %v1881_v15, 0.0 }
 0x4ee   :  { %v1912_v22 = vmax.f32 %v1880_v17, 0.0 }
 0x4ef   :  { %v1977_v25 = vadd.f32 0.0001, %v1913_v20  ;;  %v1945_v35 = vadd.f32 1.0, %v1913_v20 }
 0x4f0   :  { %v1976_v26 = vadd.f32 0.0001, %v1912_v22  ;;  %v4061_v27 = vpop.f32.mrb[84].mxu1  ;;  %v1944_v43 = vadd.f32 1.0, %v1912_v22 }
 0x4f1   :  { %4275 = vrcp.f32 %v1977_v25  ;;  %v1851_v29 = vmul.f32 2.0, %v4061_v27  ;;  %v1669_v30 = vpop.f32.mrb[85].mxu1  ;;  %v1423_v25 = vpop.xlane.xlu0 %1422 }
 0x4f2   :  { %4277 = vrcp.f32 %v1976_v26  ;;  %v1850_v33 = vmul.f32 2.0, %v1669_v30 }
 0x4f3   :  { %v4272_v34 = vpop.eup %4271  ;;  %v1883_v37 = vsub.f32 %v1819_v28, %v1851_v29 }
 0x4f4   :  { %v4274_v38 = vpop.eup %4273  ;;  %v2009_v39 = vmul.f32 %v4272_v34, %v1943_v32  ;;  %v1882_v40 = vsub.f32 %v1818_v31, %v1850_v33  ;;  %v1825_v32 = vadd.f32 %v5214_v58, %v1426_v23  ;;  %v1824_v33 = vadd.f32 %v5214_v58, %v1423_v25 }
 0x4f5   :  { %v2007_v41 = vmul.f32 %v4274_v38, %v1942_v36  ;;  %v1915_v42 = vmax.f32 %v1883_v37, 0.0 }
 0x4f6   :  { %4279 = vlog2.f32 %v2009_v39  ;;  %v1914_v47 = vmax.f32 %v1882_v40, 0.0 }
 0x4f7   :  { %4281 = vlog2.f32 %v2007_v41  ;;  %v1979_v52 = vadd.f32 0.0001, %v1915_v42  ;;  %v1947_v5 = vadd.f32 1.0, %v1915_v42 }
 0x4f8   :  { %v1978_v53 = vadd.f32 0.0001, %v1914_v47  ;;  %v4064_v54 = vpop.f32.mrb[86].mxu1  ;;  %v1946_v11 = vadd.f32 1.0, %v1914_v47 }
 0x4f9   :  { %4283 = vrcp.f32 %v1979_v52  ;;  %v1853_v56 = vmul.f32 2.0, %v4064_v54  ;;  %v1679_v57 = vpop.f32.mrb[87].mxu1 }
 0x4fa   :  { %4285 = vrcp.f32 %v1978_v53  ;;  %v1852_v18 = vmul.f32 2.0, %v1679_v57 }
 0x4fb   :  { %v4276_v19 = vpop.eup %4275  ;;  %v1885_v44 = vsub.f32 %v1821_v55, %v1853_v56  ;;  %v1432_v55 = vpop.xlane.xlu1 %1431 }
 0x4fc   :  { %v4278_v45 = vpop.eup %4277  ;;  %v2013_v48 = vmul.f32 %v4276_v19, %v1945_v35  ;;  %v1884_v49 = vsub.f32 %v1820_v16, %v1852_v18  ;;  %v1429_v56 = vpop.xlane.xlu0 %1428 }
 0x4fd   :  { %v2011_v24 = vmul.f32 %v4278_v45, %v1944_v43  ;;  %v1917_v50 = vmax.f32 %v1885_v44, 0.0  ;;  %v1827_v44 = vadd.f32 %v5214_v58, %v1432_v55  ;;  %v1826_v45 = vadd.f32 %v5214_v58, %v1429_v56 }
 0x4fe   :  { %4287 = vlog2.f32 %v2013_v48  ;;  %v1916_v62 = vmax.f32 %v1884_v49, 0.0 }
 0x4ff   :  { %4289 = vlog2.f32 %v2011_v24  ;;  %v1981_v0 = vadd.f32 0.0001, %v1917_v50  ;;  %v1949_v37 = vadd.f32 1.0, %v1917_v50 }
 0x500   :  { %v4280_v1 = vpop.eup %4279  ;;  %v1980_v3 = vadd.f32 0.0001, %v1916_v62  ;;  %v4067_v4 = vpop.f32.mrb[88].mxu1  ;;  %v1948_v41 = vadd.f32 1.0, %v1916_v62 }
 0x501   :  { %v4282_v6 = vpop.eup %4281  ;;  %4291 = vrcp.f32 %v1981_v0  ;;  %v1855_v9 = vmul.f32 2.0, %v4067_v4  ;;  %v1689_v10 = vpop.f32.mrb[89].mxu1  ;;  %v2073_v14 = vmul.f32 0.6931472, %v4280_v1 }
 0x502   :  { %4293 = vrcp.f32 %v1980_v3  ;;  %v1854_v59 = vmul.f32 2.0, %v1689_v10  ;;  %v2071_v12 = vmul.f32 0.6931472, %v4282_v6 }
 0x503   :  { %v4284_v8 = vpop.eup %4283  ;;  %v1887_v13 = vsub.f32 %v1823_v7, %v1855_v9  ;;  %v1435_v9 = vpop.xlane.xlu0 %1434 }
 0x504   :  { %v4286_v15 = vpop.eup %4285  ;;  %v2017_v17 = vmul.f32 %v4284_v8, %v1947_v5  ;;  %v1886_v20 = vsub.f32 %v1822_v2, %v1854_v59  ;;  %4103 = vmatprep.mubr.msk.f32.mxu1 %vm2140_vm3, %v2071_v12  ;;  %v1438_v2 = vpop.xlane.xlu1 %1437 }
 0x505   :  { %v2015_v21 = vmul.f32 %v4286_v15, %v1946_v11  ;;  %v1919_v22 = vmax.f32 %v1887_v13, 0.0  ;;  %4104 = vmatmul.mubr.msk.f32.vlgmr.msra.gmra.mrb[112].mxu1 %vm2140_vm3, %v2073_v14  ;;  %v1829_v11 = vadd.f32 %v5214_v58, %v1438_v2  ;;  %v1828_v13 = vadd.f32 %v5214_v58, %v1435_v9 }
 0x506   :  { %4295 = vlog2.f32 %v2017_v17  ;;  %v1918_v26 = vmax.f32 %v1886_v20, 0.0 }
 0x507   :  { %4297 = vlog2.f32 %v2015_v21  ;;  %v1983_v27 = vadd.f32 0.0001, %v1919_v22  ;;  %v1951_v24 = vadd.f32 1.0, %v1919_v22 }
 0x508   :  { %v4288_v28 = vpop.eup %4287  ;;  %v1982_v29 = vadd.f32 0.0001, %v1918_v26  ;;  %v4070_v30 = vpop.f32.mrb[90].mxu1  ;;  %v1950_v62 = vadd.f32 1.0, %v1918_v26 }
 0x509   :  { %v4290_v31 = vpop.eup %4289  ;;  %4299 = vrcp.f32 %v1983_v27  ;;  %v1857_v34 = vmul.f32 2.0, %v4070_v30  ;;  %v1699_v36 = vpop.f32.mrb[91].mxu1  ;;  %v2077_v46 = vmul.f32 0.6931472, %v4288_v28 }
 0x50a   :  { %4301 = vrcp.f32 %v1982_v29  ;;  %v1856_v38 = vmul.f32 2.0, %v1699_v36  ;;  %v2075_v39 = vmul.f32 0.6931472, %v4290_v31 }
 0x50b   :  { %v4292_v40 = vpop.eup %4291  ;;  %v1889_v42 = vsub.f32 %v1825_v32, %v1857_v34  ;;  %v1441_v34 = vpop.xlane.xlu0 %1440 }
 0x50c   :  { %v4294_v47 = vpop.eup %4293  ;;  %v2021_v51 = vmul.f32 %v4292_v40, %v1949_v37  ;;  %v1888_v52 = vsub.f32 %v1824_v33, %v1856_v38  ;;  %4106 = vmatprep.mubr.msk.f32.mxu1 %vm2140_vm3, %v2075_v39  ;;  %v1444_v33 = vpop.xlane.xlu1 %1443 }
 0x50d   :  { %v2019_v53 = vmul.f32 %v4294_v47, %v1948_v41  ;;  %v1921_v54 = vmax.f32 %v1889_v42, 0.0  ;;  %4107 = vmatmul.mubr.msk.f32.gmra.mrb[114].mxu1 %vm2140_vm3, %v2077_v46  ;;  %v1831_v42 = vadd.f32 %v5214_v58, %v1444_v33  ;;  %v1830_v46 = vadd.f32 %v5214_v58, %v1441_v34 }
 0x50e   :  { %4303 = vlog2.f32 %v2021_v51  ;;  %v1920_v57 = vmax.f32 %v1888_v52, 0.0 }
 0x50f   :  { %4305 = vlog2.f32 %v2019_v53  ;;  %v1985_v16 = vadd.f32 0.0001, %v1921_v54  ;;  %v1953_v20 = vadd.f32 1.0, %v1921_v54 }
 0x510   :  { %v4296_v35 = vpop.eup %4295  ;;  %v1984_v18 = vadd.f32 0.0001, %v1920_v57  ;;  %v4073_v19 = vpop.f32.mrb[92].mxu1  ;;  %v1952_v25 = vadd.f32 1.0, %v1920_v57 }
 0x511   :  { %v4298_v43 = vpop.eup %4297  ;;  %4307 = vrcp.f32 %v1985_v16  ;;  %v1859_v48 = vmul.f32 2.0, %v4073_v19  ;;  %v1709_v49 = vpop.f32.mrb[93].mxu1  ;;  %v2081_v0 = vmul.f32 0.6931472, %v4296_v35 }
 0x512   :  { %4309 = vrcp.f32 %v1984_v18  ;;  %v1858_v50 = vmul.f32 2.0, %v1709_v49  ;;  %v2079_v60 = vmul.f32 0.6931472, %v4298_v43 }
 0x513   :  { %v4300_v61 = vpop.eup %4299  ;;  %v1891_v63 = vsub.f32 %v1827_v44, %v1859_v48  ;;  %v1447_v48 = vpop.xlane.xlu0 %1446 }
 0x514   :  { %v4302_v1 = vpop.eup %4301  ;;  %v2025_v3 = vmul.f32 %v4300_v61, %v1951_v24  ;;  %v1890_v4 = vsub.f32 %v1826_v45, %v1858_v50  ;;  %4109 = vmatprep.mubr.msk.f32.mxu1 %vm2140_vm3, %v2079_v60  ;;  %v1450_v45 = vpop.xlane.xlu1 %1449 }
 0x515   :  { %v2023_v6 = vmul.f32 %v4302_v1, %v1950_v62  ;;  %v1923_v7 = vmax.f32 %v1891_v63, 0.0  ;;  %4110 = vmatmul.mubr.msk.f32.gmra.mrb[116].mxu1 %vm2140_vm3, %v2081_v0  ;;  %v1833_v63 = vadd.f32 %v5214_v58, %v1450_v45  ;;  %v1832_v0 = vadd.f32 %v5214_v58, %v1447_v48 }
 0x516   :  { %4311 = vlog2.f32 %v2025_v3  ;;  %v1922_v10 = vmax.f32 %v1890_v4, 0.0 }
 0x517   :  { %4313 = vlog2.f32 %v2023_v6  ;;  %v1987_v5 = vadd.f32 0.0001, %v1923_v7  ;;  %v1955_v52 = vadd.f32 1.0, %v1923_v7 }
 0x518   :  { %v4304_v59 = vpop.eup %4303  ;;  %v1986_v12 = vadd.f32 0.0001, %v1922_v10  ;;  %v4076_v8 = vpop.f32.mrb[94].mxu1  ;;  %v1954_v56 = vadd.f32 1.0, %v1922_v10 }
 0x519   :  { %v4306_v14 = vpop.eup %4305  ;;  %4315 = vrcp.f32 %v1987_v5  ;;  %v1861_v15 = vmul.f32 2.0, %v4076_v8  ;;  %v1719_v17 = vpop.f32.mrb[95].mxu1  ;;  %v2085_v27 = vmul.f32 0.6931472, %v4304_v59 }
 0x51a   :  { %4317 = vrcp.f32 %v1986_v12  ;;  %v1860_v21 = vmul.f32 2.0, %v1719_v17  ;;  %v2083_v22 = vmul.f32 0.6931472, %v4306_v14 }
 0x51b   :  { %v4308_v23 = vpop.eup %4307  ;;  %v1893_v26 = vsub.f32 %v1829_v11, %v1861_v15  ;;  %v1453_v15 = vpop.xlane.xlu0 %1452 }
 0x51c   :  { %v4310_v28 = vpop.eup %4309  ;;  %v2029_v29 = vmul.f32 %v4308_v23, %v1953_v20  ;;  %v1892_v30 = vsub.f32 %v1828_v13, %v1860_v21  ;;  %4112 = vmatprep.mubr.msk.f32.mxu1 %vm2140_vm3, %v2083_v22  ;;  %v1456_v13 = vpop.xlane.xlu1 %1455 }
 0x51d   :  { %v2027_v31 = vmul.f32 %v4310_v28, %v1952_v25  ;;  %v1925_v32 = vmax.f32 %v1893_v26, 0.0  ;;  %4113 = vmatmul.mubr.msk.f32.gmra.mrb[118].mxu1 %vm2140_vm3, %v2085_v27  ;;  %v1835_v26 = vadd.f32 %v5214_v58, %v1456_v13  ;;  %v1834_v27 = vadd.f32 %v5214_v58, %v1453_v15 }
 0x51e   :  { %4319 = vlog2.f32 %v2029_v29  ;;  %v1924_v36 = vmax.f32 %v1892_v30, 0.0 }
 0x51f   :  { %4321 = vlog2.f32 %v2027_v31  ;;  %v1989_v37 = vadd.f32 0.0001, %v1925_v32  ;;  %v1957_v4 = vadd.f32 1.0, %v1925_v32 }
 0x520   :  { %v4312_v38 = vpop.eup %4311  ;;  %v1988_v39 = vadd.f32 0.0001, %v1924_v36  ;;  %v4079_v40 = vpop.f32.mrb[96].mxu1  ;;  %v1956_v9 = vadd.f32 1.0, %v1924_v36 }
 0x521   :  { %v4314_v41 = vpop.eup %4313  ;;  %4323 = vrcp.f32 %v1989_v37  ;;  %v1863_v47 = vmul.f32 2.0, %v4079_v40  ;;  %v1729_v51 = vpop.f32.mrb[97].mxu1  ;;  %v2089_v16 = vmul.f32 0.6931472, %v4312_v38 }
 0x522   :  { %4325 = vrcp.f32 %v1988_v39  ;;  %v1862_v53 = vmul.f32 2.0, %v1729_v51  ;;  %v2087_v54 = vmul.f32 0.6931472, %v4314_v41 }
 0x523   :  { %v4316_v55 = vpop.eup %4315  ;;  %v1895_v57 = vsub.f32 %v1831_v42, %v1863_v47  ;;  %v1459_v47 = vpop.xlane.xlu0 %1458 }
 0x524   :  { %v4318_v35 = vpop.eup %4317  ;;  %v2033_v18 = vmul.f32 %v4316_v55, %v1955_v52  ;;  %v1894_v19 = vsub.f32 %v1830_v46, %v1862_v53  ;;  %4115 = vmatprep.mubr.msk.f32.mxu1 %vm2140_vm3, %v2087_v54  ;;  %v1462_v46 = vpop.xlane.xlu1 %1461 }
 0x525   :  { %v2031_v43 = vmul.f32 %v4318_v35, %v1954_v56  ;;  %v1927_v44 = vmax.f32 %v1895_v57, 0.0  ;;  %4116 = vmatmul.mubr.msk.f32.gmra.mrb[120].mxu1 %vm2140_vm3, %v2089_v16  ;;  %v1837_v57 = vadd.f32 %v5214_v58, %v1462_v46  ;;  %v1836_v16 = vadd.f32 %v5214_v58, %v1459_v47 }
 0x526   :  { %4327 = vlog2.f32 %v2033_v18  ;;  %v1926_v49 = vmax.f32 %v1894_v19, 0.0 }
 0x527   :  { %4329 = vlog2.f32 %v2031_v43  ;;  %v1991_v24 = vadd.f32 0.0001, %v1927_v44  ;;  %v1959_v30 = vadd.f32 1.0, %v1927_v44 }
 0x528   :  { %v4320_v50 = vpop.eup %4319  ;;  %v1990_v60 = vadd.f32 0.0001, %v1926_v49  ;;  %v4082_v61 = vpop.f32.mrb[98].mxu1  ;;  %v1958_v34 = vadd.f32 1.0, %v1926_v49 }
 0x529   :  { %v4322_v62 = vpop.eup %4321  ;;  %4331 = vrcp.f32 %v1991_v24  ;;  %v1865_v1 = vmul.f32 2.0, %v4082_v61  ;;  %v1739_v3 = vpop.f32.mrb[99].mxu1  ;;  %v2093_v5 = vmul.f32 0.6931472, %v4320_v50 }
 0x52a   :  { %4333 = vrcp.f32 %v1990_v60  ;;  %v1864_v6 = vmul.f32 2.0, %v1739_v3  ;;  %v2091_v7 = vmul.f32 0.6931472, %v4322_v62 }
 0x52b   :  { %v4324_v2 = vpop.eup %4323  ;;  %v1897_v10 = vsub.f32 %v1833_v63, %v1865_v1  ;;  %v1465_v1 = vpop.xlane.xlu0 %1464 }
 0x52c   :  { %v4326_v59 = vpop.eup %4325  ;;  %v2037_v12 = vmul.f32 %v4324_v2, %v1957_v4  ;;  %v1896_v8 = vsub.f32 %v1832_v0, %v1864_v6  ;;  %4118 = vmatprep.mubr.msk.f32.mxu1 %vm2140_vm3, %v2091_v7  ;;  %v1468_v0 = vpop.xlane.xlu1 %1467 }
 0x52d   :  { %v2035_v14 = vmul.f32 %v4326_v59, %v1956_v9  ;;  %v1929_v11 = vmax.f32 %v1897_v10, 0.0  ;;  %4119 = vmatmul.mubr.msk.f32.gmra.mrb[122].mxu1 %vm2140_vm3, %v2093_v5  ;;  %v1839_v10 = vadd.f32 %v5214_v58, %v1468_v0  ;;  %v1838_v5 = vadd.f32 %v5214_v58, %v1465_v1 }
 0x52e   :  { %4335 = vlog2.f32 %v2037_v12  ;;  %v1928_v17 = vmax.f32 %v1896_v8, 0.0 }
 0x52f   :  { %4337 = vlog2.f32 %v2035_v14  ;;  %v1993_v20 = vadd.f32 0.0001, %v1929_v11  ;;  %v1961_v19 = vadd.f32 1.0, %v1929_v11 }
 0x530   :  { %v4328_v21 = vpop.eup %4327  ;;  %v1992_v22 = vadd.f32 0.0001, %v1928_v17  ;;  %v4085_v23 = vpop.f32.mrb[100].mxu1  ;;  %v1960_v48 = vadd.f32 1.0, %v1928_v17 }
 0x531   :  { %v4330_v25 = vpop.eup %4329  ;;  %4339 = vrcp.f32 %v1993_v20  ;;  %v1867_v28 = vmul.f32 2.0, %v4085_v23  ;;  %v1749_v29 = vpop.f32.mrb[101].mxu1  ;;  %v2097_v37 = vmul.f32 0.6931472, %v4328_v21 }
 0x532   :  { %4341 = vrcp.f32 %v1992_v22  ;;  %v1866_v31 = vmul.f32 2.0, %v1749_v29  ;;  %v2095_v32 = vmul.f32 0.6931472, %v4330_v25 }
 0x533   :  { %v4332_v33 = vpop.eup %4331  ;;  %v1899_v36 = vsub.f32 %v1835_v26, %v1867_v28  ;;  %v1471_v28 = vpop.xlane.xlu0 %1470 }
 0x534   :  { %v4334_v38 = vpop.eup %4333  ;;  %v2041_v39 = vmul.f32 %v4332_v33, %v1959_v30  ;;  %v1898_v40 = vsub.f32 %v1834_v27, %v1866_v31  ;;  %4121 = vmatprep.mubr.msk.f32.mxu1 %vm2140_vm3, %v2095_v32  ;;  %v1474_v27 = vpop.xlane.xlu1 %1473 }
 0x535   :  { %v2039_v41 = vmul.f32 %v4334_v38, %v1958_v34  ;;  %v1931_v42 = vmax.f32 %v1899_v36, 0.0  ;;  %4122 = vmatmul.mubr.msk.f32.gmra.mrb[124].mxu1 %vm2140_vm3, %v2097_v37  ;;  %v1841_v36 = vadd.f32 %v5214_v58, %v1474_v27  ;;  %v1840_v37 = vadd.f32 %v5214_v58, %v1471_v28 }
 0x536   :  { %4343 = vlog2.f32 %v2041_v39  ;;  %v1930_v51 = vmax.f32 %v1898_v40, 0.0 }
 0x537   :  { %4345 = vlog2.f32 %v2039_v41  ;;  %v1995_v52 = vadd.f32 0.0001, %v1931_v42  ;;  %v1963_v8 = vadd.f32 1.0, %v1931_v42 }
 0x538   :  { %v4336_v53 = vpop.eup %4335  ;;  %v1994_v54 = vadd.f32 0.0001, %v1930_v51  ;;  %v4088_v55 = vpop.f32.mrb[102].mxu1  ;;  %v1962_v15 = vadd.f32 1.0, %v1930_v51 }
 0x539   :  { %v4338_v56 = vpop.eup %4337  ;;  %4347 = vrcp.f32 %v1995_v52  ;;  %v1869_v35 = vmul.f32 2.0, %v4088_v55  ;;  %v1759_v18 = vpop.f32.mrb[103].mxu1  ;;  %v2101_v24 = vmul.f32 0.6931472, %v4336_v53 }
 0x53a   :  { %4349 = vrcp.f32 %v1994_v54  ;;  %v1868_v43 = vmul.f32 2.0, %v1759_v18  ;;  %v2099_v44 = vmul.f32 0.6931472, %v4338_v56 }
 0x53b   :  { %v4340_v45 = vpop.eup %4339  ;;  %v1901_v49 = vsub.f32 %v1837_v57, %v1869_v35  ;;  %v1477_v35 = vpop.xlane.xlu0 %1476 }
 0x53c   :  { %v4342_v50 = vpop.eup %4341  ;;  %v2045_v60 = vmul.f32 %v4340_v45, %v1961_v19  ;;  %v1900_v61 = vsub.f32 %v1836_v16, %v1868_v43  ;;  %4124 = vmatprep.mubr.msk.f32.mxu1 %vm2140_vm3, %v2099_v44  ;;  %v1480_v16 = vpop.xlane.xlu1 %1479 }
 0x53d   :  { %v2043_v62 = vmul.f32 %v4342_v50, %v1960_v48  ;;  %v1933_v63 = vmax.f32 %v1901_v49, 0.0  ;;  %4125 = vmatmul.mubr.msk.f32.gmra.mrb[126].mxu1 %vm2140_vm3, %v2101_v24  ;;  %v1843_v49 = vadd.f32 %v5214_v58, %v1480_v16  ;;  %v1842_v24 = vadd.f32 %v5214_v58, %v1477_v35 }
 0x53e   :  { %4351 = vlog2.f32 %v2045_v60  ;;  %v1932_v3 = vmax.f32 %v1900_v61, 0.0 }
 0x53f   :  { %4353 = vlog2.f32 %v2043_v62  ;;  %v1997_v4 = vadd.f32 0.0001, %v1933_v63  ;;  %v1965_v40 = vadd.f32 1.0, %v1933_v63 }
 0x540   :  { %v4344_v6 = vpop.eup %4343  ;;  %v1996_v7 = vadd.f32 0.0001, %v1932_v3  ;;  %v4091_v2 = vpop.f32.mrb[104].mxu1  ;;  %v1964_v47 = vadd.f32 1.0, %v1932_v3 }
 0x541   :  { %v4346_v9 = vpop.eup %4345  ;;  %4355 = vrcp.f32 %v1997_v4  ;;  %v1871_v59 = vmul.f32 2.0, %v4091_v2  ;;  %v1769_v12 = vpop.f32.mrb[105].mxu1  ;;  %v2105_v20 = vmul.f32 0.6931472, %v4344_v6 }
 0x542   :  { %4357 = vrcp.f32 %v1996_v7  ;;  %v1870_v14 = vmul.f32 2.0, %v1769_v12  ;;  %v2103_v11 = vmul.f32 0.6931472, %v4346_v9 }
 0x543   :  { %v4348_v13 = vpop.eup %4347  ;;  %v1903_v17 = vsub.f32 %v1839_v10, %v1871_v59  ;;  %v1483_v59 = vpop.xlane.xlu0 %1482 }
 0x544   :  { %v4350_v21 = vpop.eup %4349  ;;  %v2049_v22 = vmul.f32 %v4348_v13, %v1963_v8  ;;  %v1902_v23 = vsub.f32 %v1838_v5, %v1870_v14  ;;  %4127 = vmatprep.mubr.msk.f32.mxu1 %vm2140_vm3, %v2103_v11  ;;  %v1486_v5 = vpop.xlane.xlu1 %1485 }
 0x545   :  { %v2047_v25 = vmul.f32 %v4350_v21, %v1962_v15  ;;  %v1935_v26 = vmax.f32 %v1903_v17, 0.0  ;;  %4128 = vmatmul.mubr.msk.f32.gmra.mrb[128].mxu1 %vm2140_vm3, %v2105_v20  ;;  %v1845_v17 = vadd.f32 %v5214_v58, %v1486_v5  ;;  %v1844_v20 = vadd.f32 %v5214_v58, %v1483_v59 }
 0x546   :  { %4359 = vlog2.f32 %v2049_v22  ;;  %v1934_v29 = vmax.f32 %v1902_v23, 0.0 }
 0x547   :  { %4361 = vlog2.f32 %v2047_v25  ;;  %v1999_v30 = vadd.f32 0.0001, %v1935_v26  ;;  %v1967_v61 = vadd.f32 1.0, %v1935_v26 }
 0x548   :  { %v4352_v31 = vpop.eup %4351  ;;  %v1998_v32 = vadd.f32 0.0001, %v1934_v29  ;;  %v4094_v33 = vpop.f32.mrb[106].mxu1  ;;  %v1966_v1 = vadd.f32 1.0, %v1934_v29 }
 0x549   :  { %v4354_v34 = vpop.eup %4353  ;;  %4363 = vrcp.f32 %v1999_v30  ;;  %v1873_v38 = vmul.f32 2.0, %v4094_v33  ;;  %v1779_v39 = vpop.f32.mrb[107].mxu1  ;;  %v2109_v52 = vmul.f32 0.6931472, %v4352_v31 }
 0x54a   :  { %4365 = vrcp.f32 %v1998_v32  ;;  %v1872_v41 = vmul.f32 2.0, %v1779_v39  ;;  %v2107_v42 = vmul.f32 0.6931472, %v4354_v34 }
 0x54b   :  { %v4356_v46 = vpop.eup %4355  ;;  %v1905_v51 = vsub.f32 %v1841_v36, %v1873_v38 }
 0x54c   :  { %v4358_v53 = vpop.eup %4357  ;;  %v2053_v54 = vmul.f32 %v4356_v46, %v1965_v40  ;;  %v1904_v55 = vsub.f32 %v1840_v37, %v1872_v41  ;;  %4130 = vmatprep.mubr.msk.f32.mxu1 %vm2140_vm3, %v2107_v42 }
 0x54d   :  { %v2051_v56 = vmul.f32 %v4358_v53, %v1964_v47  ;;  %v1937_v57 = vmax.f32 %v1905_v51, 0.0  ;;  %4131 = vmatmul.mubr.msk.f32.gmra.mrb[130].mxu1 %vm2140_vm3, %v2109_v52 }
 0x54e   :  { %4367 = vlog2.f32 %v2053_v54  ;;  %v1936_v18 = vmax.f32 %v1904_v55, 0.0 }
 0x54f   :  { %4369 = vlog2.f32 %v2051_v56  ;;  %v2001_v19 = vadd.f32 0.0001, %v1937_v57  ;;  %v1969_v23 = vadd.f32 1.0, %v1937_v57 }
 0x550   :  { %v4360_v43 = vpop.eup %4359  ;;  %v2000_v44 = vadd.f32 0.0001, %v1936_v18  ;;  %v4097_v45 = vpop.f32.mrb[108].mxu1  ;;  %v1968_v28 = vadd.f32 1.0, %v1936_v18 }
 0x551   :  { %v4362_v48 = vpop.eup %4361  ;;  %4371 = vrcp.f32 %v2001_v19  ;;  %v1875_v50 = vmul.f32 2.0, %v4097_v45  ;;  %v1789_v60 = vpop.f32.mrb[109].mxu1  ;;  %v2113_v4 = vmul.f32 0.6931472, %v4360_v43 }
 0x552   :  { %4373 = vrcp.f32 %v2000_v44  ;;  %v1874_v62 = vmul.f32 2.0, %v1789_v60  ;;  %v2111_v63 = vmul.f32 0.6931472, %v4362_v48 }
 0x553   :  { %v4364_v0 = vpop.eup %4363  ;;  %v1907_v3 = vsub.f32 %v1843_v49, %v1875_v50 }
 0x554   :  { %v4366_v6 = vpop.eup %4365  ;;  %v2057_v7 = vmul.f32 %v4364_v0, %v1967_v61  ;;  %v1906_v2 = vsub.f32 %v1842_v24, %v1874_v62  ;;  %4133 = vmatprep.mubr.msk.f32.mxu1 %vm2140_vm3, %v2111_v63  ;;  %v5286_v0 = vld [vmem:[%s5730_s9] ss:$0 sm:$0xff] }
 0x555   :  { %v2055_v9 = vmul.f32 %v4366_v6, %v1966_v1  ;;  %v1939_v10 = vmax.f32 %v1907_v3, 0.0  ;;  %4134 = vmatmul.mubr.msk.f32.gmra.mrb[132].mxu1 %vm2140_vm3, %v2113_v4 }
 0x556   :  { %4375 = vlog2.f32 %v2057_v7  ;;  %v1938_v12 = vmax.f32 %v1906_v2, 0.0 }
 0x557   :  { %4377 = vlog2.f32 %v2055_v9  ;;  %v2003_v8 = vadd.f32 0.0001, %v1939_v10  ;;  %v1971_v41 = vadd.f32 1.0, %v1939_v10 }
 0x558   :  { %v4368_v14 = vpop.eup %4367  ;;  %v2002_v11 = vadd.f32 0.0001, %v1938_v12  ;;  %v4100_v13 = vpop.f32.mrb[110].mxu1  ;;  %v1970_v47 = vadd.f32 1.0, %v1938_v12 }
 0x559   :  { %v4370_v15 = vpop.eup %4369  ;;  %4379 = vrcp.f32 %v2003_v8  ;;  %v1877_v21 = vmul.f32 2.0, %v4100_v13  ;;  %v1799_v22 = vpop.f32.mrb[111].mxu1  ;;  %v2117_v30 = vmul.f32 0.6931472, %v4368_v14 }
 0x55a   :  { %4381 = vrcp.f32 %v2002_v11  ;;  %v1876_v25 = vmul.f32 2.0, %v1799_v22  ;;  %v2115_v26 = vmul.f32 0.6931472, %v4370_v15 }
 0x55b   :  { %v4372_v27 = vpop.eup %4371  ;;  %v1909_v29 = vsub.f32 %v1845_v17, %v1877_v21 }
 0x55c   :  { %v4374_v31 = vpop.eup %4373  ;;  %v2061_v32 = vmul.f32 %v4372_v27, %v1969_v23  ;;  %v1908_v33 = vsub.f32 %v1844_v20, %v1876_v25  ;;  %4136 = vmatprep.mubr.msk.f32.mxu1 %vm2140_vm3, %v2115_v26 }
 0x55d   :  { %v2059_v34 = vmul.f32 %v4374_v31, %v1968_v28  ;;  %v1941_v36 = vmax.f32 %v1909_v29, 0.0  ;;  %4137 = vmatmul.mubr.msk.f32.gmra.mrb[134].mxu1 %vm2140_vm3, %v2117_v30 }
 0x55e   :  { %4383 = vlog2.f32 %v2061_v32  ;;  %v1940_v58 = vmax.f32 %v1908_v33, 0.0 }
 0x55f   :  { %4385 = vlog2.f32 %v2059_v34  ;;  %v2005_v37 = vadd.f32 0.0001, %v1941_v36  ;;  %v1973_v57 = vadd.f32 1.0, %v1941_v36 }
 0x560   :  { %v4376_v38 = vpop.eup %4375  ;;  %v2004_v39 = vadd.f32 0.0001, %v1940_v58  ;;  %v1972_v18 = vadd.f32 1.0, %v1940_v58 }
 0x561   :  { %v4378_v40 = vpop.eup %4377  ;;  %4387 = vrcp.f32 %v2005_v37  ;;  %v2121_v51 = vmul.f32 0.6931472, %v4376_v38 }
 0x562   :  { %4389 = vrcp.f32 %v2004_v39  ;;  %v2119_v42 = vmul.f32 0.6931472, %v4378_v40 }
 0x563   :  { %v4380_v46 = vpop.eup %4379 }
 0x564   :  { %v4382_v52 = vpop.eup %4381  ;;  %v2065_v53 = vmul.f32 %v4380_v46, %v1971_v41  ;;  %4139 = vmatprep.mubr.msk.f32.mxu1 %vm2140_vm3, %v2119_v42 }
 0x565   :  { %v2063_v54 = vmul.f32 %v4382_v52, %v1970_v47  ;;  %4140 = vmatmul.mubr.msk.f32.gmra.mrb[136].mxu1 %vm2140_vm3, %v2121_v51 }
 0x566   :  { %4391 = vlog2.f32 %v2065_v53 }
 0x567   :  { %4393 = vlog2.f32 %v2063_v54 }
 0x568   :  { %v4384_v55 = vpop.eup %4383 }
 0x569   :  { %v4386_v56 = vpop.eup %4385  ;;  %v2125_v19 = vmul.f32 0.6931472, %v4384_v55 }
 0x56a   :  { %v2123_v16 = vmul.f32 0.6931472, %v4386_v56  ;;  %v17_v56 = vstv %s5731_s11 }
 0x56b   :  { %v4388_v35 = vpop.eup %4387  ;;  %18 = vst [vmem:[#allocation2] sm:$0x1] %v17_v56 }
 0x56c   :  { %v4390_v43 = vpop.eup %4389  ;;  %v2069_v44 = vmul.f32 %v4388_v35, %v1973_v57  ;;  %4142 = vmatprep.mubr.msk.f32.mxu1 %vm2140_vm3, %v2123_v16 }
 0x56d   :  { %v2067_v45 = vmul.f32 %v4390_v43, %v1972_v18  ;;  %4143 = vmatmul.mubr.msk.f32.gmra.mrb[138].mxu1 %vm2140_vm3, %v2125_v19 }
 0x56e   :  { %4395 = vlog2.f32 %v2069_v44 }
 0x56f   :  { %4397 = vlog2.f32 %v2067_v45 }
 0x570   :  { %v4392_v48 = vpop.eup %4391 }
 0x571   :  { %v4394_v49 = vpop.eup %4393  ;;  %v2129_v50 = vmul.f32 0.6931472, %v4392_v48 }
 0x572   :  { %v2127_v24 = vmul.f32 0.6931472, %v4394_v49 }
 0x574   :  { %4145 = vmatprep.mubr.msk.f32.mxu1 %vm2140_vm3, %v2127_v24 }
 0x575   :  { %4146 = vmatmul.mubr.msk.f32.gmra.mrb[140].mxu1 %vm2140_vm3, %v2129_v50 }
 0x578   :  { %v4396_v60 = vpop.eup %4395 }
 0x579   :  { %v4398_v61 = vpop.eup %4397  ;;  %v2133_v63 = vmul.f32 0.6931472, %v4396_v60 }
 0x57a   :  { %v2131_v62 = vmul.f32 0.6931472, %v4398_v61 }
 0x57c   :  { %4148 = vmatprep.mubr.msk.f32.mxu1 %vm2140_vm3, %v2131_v62 }
 0x57d   :  { %4149 = vmatmul.mubr.msk.f32.gmra.mrb[142].mxu1 %vm2140_vm3, %v2133_v63 }
 0x5d8   :  { %v4105_v1 = vpop.f32.mrb[112].mxu1 }
 0x5d9   :  { %v5289_v3 = vadd.f32 %v4105_v1, %v5286_v0  ;;  %v2303_v4 = vpop.f32.mrb[113].mxu1 }
 0x5da   :  { %v2304_v6 = vadd.f32 %v5286_v0, %v2303_v4 }
 0x5db   :  { %v2463_v7 = vmul.f32 %v5289_v3, %v5289_v3 }
 0x5dc   :  { %v2462_v2 = vmul.f32 %v2304_v6, %v2304_v6 }
 0x5dd   :  { %v2495_v9 = vmul.f32 %v2463_v7, %v5289_v3 }
 0x5de   :  { %v2494_v10 = vmul.f32 %v2462_v2, %v2304_v6 }
 0x5df   :  { %v2527_v5 = vmul.f32 0.044715, %v2495_v9 }
 0x5e0   :  { %v2526_v59 = vmul.f32 0.044715, %v2494_v10  ;;  %v4108_v12 = vpop.f32.mrb[114].mxu1 }
 0x5e1   :  { %v2559_v8 = vadd.f32 %v2527_v5, %v5289_v3  ;;  %v5297_v14 = vadd.f32 %v4108_v12, %v5286_v0  ;;  %v2313_v11 = vpop.f32.mrb[115].mxu1 }
 0x5e2   :  { %v2558_v13 = vadd.f32 %v2526_v59, %v2304_v6  ;;  %v5300_v15 = vadd.f32 %v5286_v0, %v2313_v11 }
 0x5e3   :  { %v2591_v17 = vmul.f32 0.7978846, %v2559_v8  ;;  %v2465_v20 = vmul.f32 %v5297_v14, %v5297_v14 }
 0x5e4   :  { %v2590_v21 = vmul.f32 0.7978846, %v2558_v13  ;;  %v2464_v22 = vmul.f32 %v5300_v15, %v5300_v15 }
 0x5e5   :  { %4399 = vtanh.f32 %v2591_v17  ;;  %v2497_v23 = vmul.f32 %v2465_v20, %v5297_v14 }
 0x5e6   :  { %4401 = vtanh.f32 %v2590_v21  ;;  %v2496_v25 = vmul.f32 %v2464_v22, %v5300_v15 }
 0x5e7   :  { %v2529_v26 = vmul.f32 0.044715, %v2497_v23 }
 0x5e8   :  { %v2528_v27 = vmul.f32 0.044715, %v2496_v25  ;;  %v4111_v28 = vpop.f32.mrb[116].mxu1 }
 0x5e9   :  { %v2561_v29 = vadd.f32 %v2529_v26, %v5297_v14  ;;  %v5310_v30 = vadd.f32 %v4111_v28, %v5286_v0  ;;  %v2323_v31 = vpop.f32.mrb[117].mxu1 }
 0x5ea   :  { %v2560_v32 = vadd.f32 %v2528_v27, %v5300_v15  ;;  %v5314_v33 = vadd.f32 %v5286_v0, %v2323_v31 }
 0x5eb   :  { %v2593_v34 = vmul.f32 0.7978846, %v2561_v29  ;;  %v2467_v36 = vmul.f32 %v5310_v30, %v5310_v30 }
 0x5ec   :  { %v2592_v58 = vmul.f32 0.7978846, %v2560_v32  ;;  %v2466_v37 = vmul.f32 %v5314_v33, %v5314_v33 }
 0x5ed   :  { %4403 = vtanh.f32 %v2593_v34  ;;  %v2499_v38 = vmul.f32 %v2467_v36, %v5310_v30 }
 0x5ee   :  { %4405 = vtanh.f32 %v2592_v58  ;;  %v2498_v39 = vmul.f32 %v2466_v37, %v5314_v33 }
 0x5ef   :  { %v4400_v40 = vpop.eup %4399  ;;  %v2531_v41 = vmul.f32 0.044715, %v2499_v38 }
 0x5f0   :  { %v4402_v42 = vpop.eup %4401  ;;  %v2655_v46 = vadd.f32 1.0, %v4400_v40  ;;  %v2530_v47 = vmul.f32 0.044715, %v2498_v39  ;;  %v4114_v51 = vpop.f32.mrb[118].mxu1 }
 0x5f1   :  { %v2563_v52 = vadd.f32 %v2531_v41, %v5310_v30  ;;  %v5324_v53 = vadd.f32 %v4114_v51, %v5286_v0  ;;  %v2333_v54 = vpop.f32.mrb[119].mxu1  ;;  %v2654_v55 = vadd.f32 1.0, %v4402_v42 }
 0x5f2   :  { %v2687_v57 = vmul.f32 0.5, %v2655_v46  ;;  %v2562_v16 = vadd.f32 %v2530_v47, %v5314_v33  ;;  %v5331_v35 = vadd.f32 %v5286_v0, %v2333_v54 }
 0x5f3   :  { %v2595_v18 = vmul.f32 0.7978846, %v2563_v52  ;;  %v2469_v19 = vmul.f32 %v5324_v53, %v5324_v53  ;;  %v2686_v43 = vmul.f32 0.5, %v2654_v55 }
 0x5f4   :  { %v2594_v44 = vmul.f32 0.7978846, %v2562_v16  ;;  %v2468_v45 = vmul.f32 %v5331_v35, %v5331_v35  ;;  %v2719_v24 = vmul.f32 %v2687_v57, %v5289_v3 }
 0x5f5   :  { %4407 = vtanh.f32 %v2595_v18  ;;  %v2501_v48 = vmul.f32 %v2469_v19, %v5324_v53  ;;  %v2718_v49 = vmul.f32 %v2686_v43, %v2304_v6 }
 0x5f6   :  { %4409 = vtanh.f32 %v2594_v44  ;;  %v2500_v50 = vmul.f32 %v2468_v45, %v5331_v35 }
 0x5f7   :  { %v4404_v60 = vpop.eup %4403  ;;  %v2533_v61 = vmul.f32 0.044715, %v2501_v48  ;;  %4153 = vmatprep.mubr.msk.f32.mxu0 %vm2756_vm4, %v2718_v49 }
 0x5f8   :  { %v4406_v62 = vpop.eup %4405  ;;  %v2532_v63 = vmul.f32 0.044715, %v2500_v50  ;;  %v4117_v1 = vpop.f32.mrb[120].mxu1  ;;  %4154 = vmatmul.mubr.msk.f32.vlgmr.msra.gmra.mrb[112].mxu0 %vm2756_vm4, %v2719_v24  ;;  %v2657_v4 = vadd.f32 1.0, %v4404_v60 }
 0x5f9   :  { %v2565_v7 = vadd.f32 %v2533_v61, %v5324_v53  ;;  %v5344_v2 = vadd.f32 %v4117_v1, %v5286_v0  ;;  %v2343_v6 = vpop.f32.mrb[121].mxu1  ;;  %v2656_v3 = vadd.f32 1.0, %v4406_v62 }
 0x5fa   :  { %v2564_v9 = vadd.f32 %v2532_v63, %v5331_v35  ;;  %v5348_v10 = vadd.f32 %v5286_v0, %v2343_v6  ;;  %v2689_v5 = vmul.f32 0.5, %v2657_v4 }
 0x5fb   :  { %v2597_v59 = vmul.f32 0.7978846, %v2565_v7  ;;  %v2471_v12 = vmul.f32 %v5344_v2, %v5344_v2  ;;  %v2688_v8 = vmul.f32 0.5, %v2656_v3 }
 0x5fc   :  { %v2596_v11 = vmul.f32 0.7978846, %v2564_v9  ;;  %v2470_v13 = vmul.f32 %v5348_v10, %v5348_v10  ;;  %v2721_v22 = vmul.f32 %v2689_v5, %v5297_v14 }
 0x5fd   :  { %4411 = vtanh.f32 %v2597_v59  ;;  %v2503_v17 = vmul.f32 %v2471_v12, %v5344_v2  ;;  %v2720_v20 = vmul.f32 %v2688_v8, %v5300_v15 }
 0x5fe   :  { %4413 = vtanh.f32 %v2596_v11  ;;  %v2502_v21 = vmul.f32 %v2470_v13, %v5348_v10 }
 0x5ff   :  { %v4408_v23 = vpop.eup %4407  ;;  %v2535_v25 = vmul.f32 0.044715, %v2503_v17  ;;  %4156 = vmatprep.mubr.msk.f32.mxu0 %vm2756_vm4, %v2720_v20 }
 0x600   :  { %v4410_v26 = vpop.eup %4409  ;;  %v2534_v27 = vmul.f32 0.044715, %v2502_v21  ;;  %v4120_v28 = vpop.f32.mrb[122].mxu1  ;;  %4157 = vmatmul.mubr.msk.f32.gmra.mrb[114].mxu0 %vm2756_vm4, %v2721_v22  ;;  %v2659_v29 = vadd.f32 1.0, %v4408_v23 }
 0x601   :  { %v2567_v31 = vadd.f32 %v2535_v25, %v5344_v2  ;;  %v5362_v32 = vadd.f32 %v4120_v28, %v5286_v0  ;;  %v2353_v15 = vpop.f32.mrb[123].mxu1  ;;  %v2658_v34 = vadd.f32 1.0, %v4410_v26 }
 0x602   :  { %v2566_v36 = vadd.f32 %v2534_v27, %v5348_v10  ;;  %v5366_v14 = vadd.f32 %v5286_v0, %v2353_v15  ;;  %v2691_v58 = vmul.f32 0.5, %v2659_v29 }
 0x603   :  { %v2599_v37 = vmul.f32 0.7978846, %v2567_v31  ;;  %v2473_v38 = vmul.f32 %v5362_v32, %v5362_v32  ;;  %v2690_v39 = vmul.f32 0.5, %v2658_v34 }
 0x604   :  { %v2598_v40 = vmul.f32 0.7978846, %v2566_v36  ;;  %v2472_v41 = vmul.f32 %v5366_v14, %v5366_v14  ;;  %v2723_v51 = vmul.f32 %v2691_v58, %v5310_v30 }
 0x605   :  { %4415 = vtanh.f32 %v2599_v37  ;;  %v2505_v42 = vmul.f32 %v2473_v38, %v5362_v32  ;;  %v2722_v46 = vmul.f32 %v2690_v39, %v5314_v33 }
 0x606   :  { %4417 = vtanh.f32 %v2598_v40  ;;  %v2504_v47 = vmul.f32 %v2472_v41, %v5366_v14 }
 0x607   :  { %v4412_v52 = vpop.eup %4411  ;;  %v2537_v54 = vmul.f32 0.044715, %v2505_v42  ;;  %4159 = vmatprep.mubr.msk.f32.mxu0 %vm2756_vm4, %v2722_v46 }
 0x608   :  { %v4414_v55 = vpop.eup %4413  ;;  %v2536_v56 = vmul.f32 0.044715, %v2504_v47  ;;  %v4123_v57 = vpop.f32.mrb[124].mxu1  ;;  %4160 = vmatmul.mubr.msk.f32.gmra.mrb[116].mxu0 %vm2756_vm4, %v2723_v51  ;;  %v2661_v16 = vadd.f32 1.0, %v4412_v52 }
 0x609   :  { %v2569_v18 = vadd.f32 %v2537_v54, %v5362_v32  ;;  %v5380_v19 = vadd.f32 %v4123_v57, %v5286_v0  ;;  %v2363_v33 = vpop.f32.mrb[125].mxu1  ;;  %v2660_v43 = vadd.f32 1.0, %v4414_v55 }
 0x60a   :  { %v2568_v44 = vadd.f32 %v2536_v56, %v5366_v14  ;;  %v5384_v30 = vadd.f32 %v5286_v0, %v2363_v33  ;;  %v2693_v45 = vmul.f32 0.5, %v2661_v16 }
 0x60b   :  { %v2601_v48 = vmul.f32 0.7978846, %v2569_v18  ;;  %v2475_v49 = vmul.f32 %v5380_v19, %v5380_v19  ;;  %v2692_v24 = vmul.f32 0.5, %v2660_v43 }
 0x60c   :  { %v2600_v50 = vmul.f32 0.7978846, %v2568_v44  ;;  %v2474_v60 = vmul.f32 %v5384_v30, %v5384_v30  ;;  %v2725_v1 = vmul.f32 %v2693_v45, %v5324_v53 }
 0x60d   :  { %4419 = vtanh.f32 %v2601_v48  ;;  %v2507_v61 = vmul.f32 %v2475_v49, %v5380_v19  ;;  %v2724_v62 = vmul.f32 %v2692_v24, %v5331_v35 }
 0x60e   :  { %4421 = vtanh.f32 %v2600_v50  ;;  %v2506_v63 = vmul.f32 %v2474_v60, %v5384_v30 }
 0x60f   :  { %v4416_v4 = vpop.eup %4415  ;;  %v2539_v7 = vmul.f32 0.044715, %v2507_v61  ;;  %4162 = vmatprep.mubr.msk.f32.mxu0 %vm2756_vm4, %v2724_v62 }
 0x610   :  { %v4418_v6 = vpop.eup %4417  ;;  %v2538_v3 = vmul.f32 0.044715, %v2506_v63  ;;  %v4126_v9 = vpop.f32.mrb[126].mxu1  ;;  %4163 = vmatmul.mubr.msk.f32.gmra.mrb[118].mxu0 %vm2756_vm4, %v2725_v1  ;;  %v2663_v5 = vadd.f32 1.0, %v4416_v4 }
 0x611   :  { %v2571_v59 = vadd.f32 %v2539_v7, %v5380_v19  ;;  %v5398_v12 = vadd.f32 %v4126_v9, %v5286_v0  ;;  %v2373_v35 = vpop.f32.mrb[127].mxu1  ;;  %v2662_v8 = vadd.f32 1.0, %v4418_v6 }
 0x612   :  { %v2570_v11 = vadd.f32 %v2538_v3, %v5384_v30  ;;  %v5402_v53 = vadd.f32 %v5286_v0, %v2373_v35  ;;  %v2695_v13 = vmul.f32 0.5, %v2663_v5 }
 0x613   :  { %v2603_v17 = vmul.f32 0.7978846, %v2571_v59  ;;  %v2477_v20 = vmul.f32 %v5398_v12, %v5398_v12  ;;  %v2694_v21 = vmul.f32 0.5, %v2662_v8 }
 0x614   :  { %v2602_v22 = vmul.f32 0.7978846, %v2570_v11  ;;  %v2476_v23 = vmul.f32 %v5402_v53, %v5402_v53  ;;  %v2727_v28 = vmul.f32 %v2695_v13, %v5344_v2 }
 0x615   :  { %4423 = vtanh.f32 %v2603_v17  ;;  %v2509_v25 = vmul.f32 %v2477_v20, %v5398_v12  ;;  %v2726_v26 = vmul.f32 %v2694_v21, %v5348_v10 }
 0x616   :  { %4425 = vtanh.f32 %v2602_v22  ;;  %v2508_v27 = vmul.f32 %v2476_v23, %v5402_v53 }
 0x617   :  { %v4420_v29 = vpop.eup %4419  ;;  %v2541_v31 = vmul.f32 0.044715, %v2509_v25  ;;  %4165 = vmatprep.mubr.msk.f32.mxu0 %vm2756_vm4, %v2726_v26 }
 0x618   :  { %v4422_v15 = vpop.eup %4421  ;;  %v2540_v34 = vmul.f32 0.044715, %v2508_v27  ;;  %v4129_v36 = vpop.f32.mrb[128].mxu1  ;;  %4166 = vmatmul.mubr.msk.f32.gmra.mrb[120].mxu0 %vm2756_vm4, %v2727_v28  ;;  %v2665_v58 = vadd.f32 1.0, %v4420_v29 }
 0x619   :  { %v2573_v37 = vadd.f32 %v2541_v31, %v5398_v12  ;;  %v5416_v38 = vadd.f32 %v4129_v36, %v5286_v0  ;;  %v2383_v10 = vpop.f32.mrb[129].mxu1  ;;  %v2664_v39 = vadd.f32 1.0, %v4422_v15 }
 0x61a   :  { %v2572_v40 = vadd.f32 %v2540_v34, %v5402_v53  ;;  %v5420_v2 = vadd.f32 %v5286_v0, %v2383_v10  ;;  %v2697_v41 = vmul.f32 0.5, %v2665_v58 }
 0x61b   :  { %v2605_v42 = vmul.f32 0.7978846, %v2573_v37  ;;  %v2479_v46 = vmul.f32 %v5416_v38, %v5416_v38  ;;  %v2696_v47 = vmul.f32 0.5, %v2664_v39 }
 0x61c   :  { %v2604_v51 = vmul.f32 0.7978846, %v2572_v40  ;;  %v2478_v52 = vmul.f32 %v5420_v2, %v5420_v2  ;;  %v2729_v57 = vmul.f32 %v2697_v41, %v5362_v32 }
 0x61d   :  { %4427 = vtanh.f32 %v2605_v42  ;;  %v2511_v54 = vmul.f32 %v2479_v46, %v5416_v38  ;;  %v2728_v55 = vmul.f32 %v2696_v47, %v5366_v14 }
 0x61e   :  { %4429 = vtanh.f32 %v2604_v51  ;;  %v2510_v56 = vmul.f32 %v2478_v52, %v5420_v2 }
 0x61f   :  { %v4424_v16 = vpop.eup %4423  ;;  %v2543_v18 = vmul.f32 0.044715, %v2511_v54  ;;  %4168 = vmatprep.mubr.msk.f32.mxu0 %vm2756_vm4, %v2728_v55 }
 0x620   :  { %v4426_v33 = vpop.eup %4425  ;;  %v2542_v43 = vmul.f32 0.044715, %v2510_v56  ;;  %v4132_v44 = vpop.f32.mrb[130].mxu1  ;;  %4169 = vmatmul.mubr.msk.f32.gmra.mrb[122].mxu0 %vm2756_vm4, %v2729_v57  ;;  %v2667_v45 = vadd.f32 1.0, %v4424_v16 }
 0x621   :  { %v2575_v48 = vadd.f32 %v2543_v18, %v5416_v38  ;;  %v5434_v49 = vadd.f32 %v4132_v44, %v5286_v0  ;;  %v2393_v14 = vpop.f32.mrb[131].mxu1  ;;  %v2666_v24 = vadd.f32 1.0, %v4426_v33 }
 0x622   :  { %v2574_v50 = vadd.f32 %v2542_v43, %v5420_v2  ;;  %v5438_v32 = vadd.f32 %v5286_v0, %v2393_v14  ;;  %v2699_v60 = vmul.f32 0.5, %v2667_v45 }
 0x623   :  { %v2607_v61 = vmul.f32 0.7978846, %v2575_v48  ;;  %v2481_v62 = vmul.f32 %v5434_v49, %v5434_v49  ;;  %v2698_v63 = vmul.f32 0.5, %v2666_v24 }
 0x624   :  { %v2606_v1 = vmul.f32 0.7978846, %v2574_v50  ;;  %v2480_v4 = vmul.f32 %v5438_v32, %v5438_v32  ;;  %v2731_v9 = vmul.f32 %v2699_v60, %v5380_v19 }
 0x625   :  { %4431 = vtanh.f32 %v2607_v61  ;;  %v2513_v7 = vmul.f32 %v2481_v62, %v5434_v49  ;;  %v2730_v6 = vmul.f32 %v2698_v63, %v5384_v30 }
 0x626   :  { %4433 = vtanh.f32 %v2606_v1  ;;  %v2512_v3 = vmul.f32 %v2480_v4, %v5438_v32 }
 0x627   :  { %v4428_v5 = vpop.eup %4427  ;;  %v2545_v59 = vmul.f32 0.044715, %v2513_v7  ;;  %4171 = vmatprep.mubr.msk.f32.mxu0 %vm2756_vm4, %v2730_v6 }
 0x628   :  { %v4430_v35 = vpop.eup %4429  ;;  %v2544_v8 = vmul.f32 0.044715, %v2512_v3  ;;  %v4135_v11 = vpop.f32.mrb[132].mxu1  ;;  %4172 = vmatmul.mubr.msk.f32.gmra.mrb[124].mxu0 %vm2756_vm4, %v2731_v9  ;;  %v2669_v13 = vadd.f32 1.0, %v4428_v5 }
 0x629   :  { %v2577_v17 = vadd.f32 %v2545_v59, %v5434_v49  ;;  %v5452_v20 = vadd.f32 %v4135_v11, %v5286_v0  ;;  %v2403_v30 = vpop.f32.mrb[133].mxu1  ;;  %v2668_v21 = vadd.f32 1.0, %v4430_v35 }
 0x62a   :  { %v2576_v22 = vadd.f32 %v2544_v8, %v5438_v32  ;;  %v5456_v19 = vadd.f32 %v5286_v0, %v2403_v30  ;;  %v2701_v23 = vmul.f32 0.5, %v2669_v13 }
 0x62b   :  { %v2609_v25 = vmul.f32 0.7978846, %v2577_v17  ;;  %v2483_v26 = vmul.f32 %v5452_v20, %v5452_v20  ;;  %v2700_v27 = vmul.f32 0.5, %v2668_v21 }
 0x62c   :  { %v2608_v28 = vmul.f32 0.7978846, %v2576_v22  ;;  %v2482_v29 = vmul.f32 %v5456_v19, %v5456_v19  ;;  %v2733_v36 = vmul.f32 %v2701_v23, %v5398_v12 }
 0x62d   :  { %4435 = vtanh.f32 %v2609_v25  ;;  %v2515_v31 = vmul.f32 %v2483_v26, %v5452_v20  ;;  %v2732_v15 = vmul.f32 %v2700_v27, %v5402_v53 }
 0x62e   :  { %4437 = vtanh.f32 %v2608_v28  ;;  %v2514_v34 = vmul.f32 %v2482_v29, %v5456_v19 }
 0x62f   :  { %v4432_v58 = vpop.eup %4431  ;;  %v2547_v37 = vmul.f32 0.044715, %v2515_v31  ;;  %4174 = vmatprep.mubr.msk.f32.mxu0 %vm2756_vm4, %v2732_v15 }
 0x630   :  { %v4434_v10 = vpop.eup %4433  ;;  %v2546_v39 = vmul.f32 0.044715, %v2514_v34  ;;  %v4138_v40 = vpop.f32.mrb[134].mxu1  ;;  %4175 = vmatmul.mubr.msk.f32.gmra.mrb[126].mxu0 %vm2756_vm4, %v2733_v36  ;;  %v2671_v41 = vadd.f32 1.0, %v4432_v58 }
 0x631   :  { %v2579_v42 = vadd.f32 %v2547_v37, %v5452_v20  ;;  %v5470_v46 = vadd.f32 %v4138_v40, %v5286_v0  ;;  %v2413_v53 = vpop.f32.mrb[135].mxu1  ;;  %v2670_v47 = vadd.f32 1.0, %v4434_v10 }
 0x632   :  { %v2578_v51 = vadd.f32 %v2546_v39, %v5456_v19  ;;  %v5474_v12 = vadd.f32 %v5286_v0, %v2413_v53  ;;  %v2703_v52 = vmul.f32 0.5, %v2671_v41 }
 0x633   :  { %v2611_v54 = vmul.f32 0.7978846, %v2579_v42  ;;  %v2485_v55 = vmul.f32 %v5470_v46, %v5470_v46  ;;  %v2702_v56 = vmul.f32 0.5, %v2670_v47 }
 0x634   :  { %v2610_v57 = vmul.f32 0.7978846, %v2578_v51  ;;  %v2484_v16 = vmul.f32 %v5474_v12, %v5474_v12  ;;  %v2735_v44 = vmul.f32 %v2703_v52, %v5416_v38 }
 0x635   :  { %4439 = vtanh.f32 %v2611_v54  ;;  %v2517_v18 = vmul.f32 %v2485_v55, %v5470_v46  ;;  %v2734_v33 = vmul.f32 %v2702_v56, %v5420_v2 }
 0x636   :  { %4441 = vtanh.f32 %v2610_v57  ;;  %v2516_v43 = vmul.f32 %v2484_v16, %v5474_v12 }
 0x637   :  { %v4436_v45 = vpop.eup %4435  ;;  %v2549_v48 = vmul.f32 0.044715, %v2517_v18  ;;  %4177 = vmatprep.mubr.msk.f32.mxu0 %vm2756_vm4, %v2734_v33 }
 0x638   :  { %v4438_v14 = vpop.eup %4437  ;;  %v2548_v24 = vmul.f32 0.044715, %v2516_v43  ;;  %v4141_v50 = vpop.f32.mrb[136].mxu1  ;;  %4178 = vmatmul.mubr.msk.f32.gmra.mrb[128].mxu0 %vm2756_vm4, %v2735_v44  ;;  %v2673_v60 = vadd.f32 1.0, %v4436_v45 }
 0x639   :  { %v2581_v61 = vadd.f32 %v2549_v48, %v5470_v46  ;;  %v5488_v62 = vadd.f32 %v4141_v50, %v5286_v0  ;;  %v2423_v2 = vpop.f32.mrb[137].mxu1  ;;  %v2672_v63 = vadd.f32 1.0, %v4438_v14 }
 0x63a   :  { %v2580_v1 = vadd.f32 %v2548_v24, %v5474_v12  ;;  %v5492_v38 = vadd.f32 %v5286_v0, %v2423_v2  ;;  %v2705_v4 = vmul.f32 0.5, %v2673_v60 }
 0x63b   :  { %v2613_v7 = vmul.f32 0.7978846, %v2581_v61  ;;  %v2487_v6 = vmul.f32 %v5488_v62, %v5488_v62  ;;  %v2704_v3 = vmul.f32 0.5, %v2672_v63 }
 0x63c   :  { %v2612_v9 = vmul.f32 0.7978846, %v2580_v1  ;;  %v2486_v5 = vmul.f32 %v5492_v38, %v5492_v38  ;;  %v2737_v11 = vmul.f32 %v2705_v4, %v5434_v49 }
 0x63d   :  { %4443 = vtanh.f32 %v2613_v7  ;;  %v2519_v59 = vmul.f32 %v2487_v6, %v5488_v62  ;;  %v2736_v35 = vmul.f32 %v2704_v3, %v5438_v32 }
 0x63e   :  { %4445 = vtanh.f32 %v2612_v9  ;;  %v2518_v8 = vmul.f32 %v2486_v5, %v5492_v38 }
 0x63f   :  { %v4440_v13 = vpop.eup %4439  ;;  %v2551_v17 = vmul.f32 0.044715, %v2519_v59  ;;  %4180 = vmatprep.mubr.msk.f32.mxu0 %vm2756_vm4, %v2736_v35 }
 0x640   :  { %v4442_v30 = vpop.eup %4441  ;;  %v2550_v21 = vmul.f32 0.044715, %v2518_v8  ;;  %v4144_v22 = vpop.f32.mrb[138].mxu1  ;;  %4181 = vmatmul.mubr.msk.f32.gmra.mrb[130].mxu0 %vm2756_vm4, %v2737_v11  ;;  %v2675_v23 = vadd.f32 1.0, %v4440_v13 }
 0x641   :  { %v2583_v25 = vadd.f32 %v2551_v17, %v5488_v62  ;;  %v5506_v26 = vadd.f32 %v4144_v22, %v5286_v0  ;;  %v2433_v32 = vpop.f32.mrb[139].mxu1  ;;  %v2674_v27 = vadd.f32 1.0, %v4442_v30 }
 0x642   :  { %v2582_v28 = vadd.f32 %v2550_v21, %v5492_v38  ;;  %v5510_v49 = vadd.f32 %v5286_v0, %v2433_v32  ;;  %v2707_v29 = vmul.f32 0.5, %v2675_v23 }
 0x643   :  { %v2615_v31 = vmul.f32 0.7978846, %v2583_v25  ;;  %v2489_v15 = vmul.f32 %v5506_v26, %v5506_v26  ;;  %v2706_v34 = vmul.f32 0.5, %v2674_v27 }
 0x644   :  { %v2614_v36 = vmul.f32 0.7978846, %v2582_v28  ;;  %v2488_v58 = vmul.f32 %v5510_v49, %v5510_v49  ;;  %v2739_v40 = vmul.f32 %v2707_v29, %v5452_v20 }
 0x645   :  { %4447 = vtanh.f32 %v2615_v31  ;;  %v2521_v37 = vmul.f32 %v2489_v15, %v5506_v26  ;;  %v2738_v10 = vmul.f32 %v2706_v34, %v5456_v19 }
 0x646   :  { %4449 = vtanh.f32 %v2614_v36  ;;  %v2520_v39 = vmul.f32 %v2488_v58, %v5510_v49 }
 0x647   :  { %v4444_v41 = vpop.eup %4443  ;;  %v2553_v42 = vmul.f32 0.044715, %v2521_v37  ;;  %4183 = vmatprep.mubr.msk.f32.mxu0 %vm2756_vm4, %v2738_v10 }
 0x648   :  { %v4446_v53 = vpop.eup %4445  ;;  %v2552_v47 = vmul.f32 0.044715, %v2520_v39  ;;  %v4147_v51 = vpop.f32.mrb[140].mxu1  ;;  %4184 = vmatmul.mubr.msk.f32.gmra.mrb[132].mxu0 %vm2756_vm4, %v2739_v40  ;;  %v2677_v52 = vadd.f32 1.0, %v4444_v41 }
 0x649   :  { %v2585_v54 = vadd.f32 %v2553_v42, %v5506_v26  ;;  %v5524_v55 = vadd.f32 %v4147_v51, %v5286_v0  ;;  %v2443_v19 = vpop.f32.mrb[141].mxu1  ;;  %v2676_v56 = vadd.f32 1.0, %v4446_v53 }
 0x64a   :  { %v2584_v57 = vadd.f32 %v2552_v47, %v5510_v49  ;;  %v5528_v20 = vadd.f32 %v5286_v0, %v2443_v19  ;;  %v2709_v16 = vmul.f32 0.5, %v2677_v52 }
 0x64b   :  { %v2617_v18 = vmul.f32 0.7978846, %v2585_v54  ;;  %v2491_v33 = vmul.f32 %v5524_v55, %v5524_v55  ;;  %v2708_v43 = vmul.f32 0.5, %v2676_v56 }
 0x64c   :  { %v2616_v44 = vmul.f32 0.7978846, %v2584_v57  ;;  %v2490_v45 = vmul.f32 %v5528_v20, %v5528_v20  ;;  %v2741_v50 = vmul.f32 %v2709_v16, %v5470_v46  ;;  %v5558_v16 = vld [vmem:[#allocation2] ss:$0 sm:$0xff] }
 0x64d   :  { %4451 = vtanh.f32 %v2617_v18  ;;  %v2523_v48 = vmul.f32 %v2491_v33, %v5524_v55  ;;  %v2740_v14 = vmul.f32 %v2708_v43, %v5474_v12 }
 0x64e   :  { %4453 = vtanh.f32 %v2616_v44  ;;  %v2522_v24 = vmul.f32 %v2490_v45, %v5528_v20 }
 0x64f   :  { %v4448_v60 = vpop.eup %4447  ;;  %v2555_v61 = vmul.f32 0.044715, %v2523_v48  ;;  %4186 = vmatprep.mubr.msk.f32.mxu0 %vm2756_vm4, %v2740_v14 }
 0x650   :  { %v4450_v2 = vpop.eup %4449  ;;  %v2554_v63 = vmul.f32 0.044715, %v2522_v24  ;;  %v4150_v1 = vpop.f32.mrb[142].mxu1  ;;  %4187 = vmatmul.mubr.msk.f32.gmra.mrb[134].mxu0 %vm2756_vm4, %v2741_v50  ;;  %v2679_v4 = vadd.f32 1.0, %v4448_v60 }
 0x651   :  { %v2587_v7 = vadd.f32 %v2555_v61, %v5524_v55  ;;  %v2459_v6 = vadd.f32 %v4150_v1, %v5286_v0  ;;  %v2453_v12 = vpop.f32.mrb[143].mxu1  ;;  %v2678_v3 = vadd.f32 1.0, %v4450_v2 }
 0x652   :  { %v2586_v9 = vadd.f32 %v2554_v63, %v5528_v20  ;;  %v2454_v46 = vadd.f32 %v5286_v0, %v2453_v12  ;;  %v2711_v5 = vmul.f32 0.5, %v2679_v4 }
 0x653   :  { %v2619_v59 = vmul.f32 0.7978846, %v2587_v7  ;;  %v2493_v35 = vmul.f32 %v2459_v6, %v2459_v6  ;;  %v2710_v8 = vmul.f32 0.5, %v2678_v3 }
 0x654   :  { %v2618_v11 = vmul.f32 0.7978846, %v2586_v9  ;;  %v2492_v13 = vmul.f32 %v2454_v46, %v2454_v46  ;;  %v2743_v22 = vmul.f32 %v2711_v5, %v5488_v62 }
 0x655   :  { %4455 = vtanh.f32 %v2619_v59  ;;  %v2525_v17 = vmul.f32 %v2493_v35, %v2459_v6  ;;  %v2742_v30 = vmul.f32 %v2710_v8, %v5492_v38 }
 0x656   :  { %4457 = vtanh.f32 %v2618_v11  ;;  %v2524_v21 = vmul.f32 %v2492_v13, %v2454_v46 }
 0x657   :  { %v4452_v23 = vpop.eup %4451  ;;  %v2557_v25 = vmul.f32 0.044715, %v2525_v17  ;;  %4189 = vmatprep.mubr.msk.f32.mxu0 %vm2756_vm4, %v2742_v30 }
 0x658   :  { %v4454_v32 = vpop.eup %4453  ;;  %v2556_v0 = vmul.f32 0.044715, %v2524_v21  ;;  %4190 = vmatmul.mubr.msk.f32.gmra.mrb[136].mxu0 %vm2756_vm4, %v2743_v22  ;;  %v2681_v27 = vadd.f32 1.0, %v4452_v23 }
 0x659   :  { %v2589_v28 = vadd.f32 %v2557_v25, %v2459_v6  ;;  %v2680_v29 = vadd.f32 1.0, %v4454_v32 }
 0x65a   :  { %v2588_v31 = vadd.f32 %v2556_v0, %v2454_v46  ;;  %v2713_v15 = vmul.f32 0.5, %v2681_v27 }
 0x65b   :  { %v2621_v34 = vmul.f32 0.7978846, %v2589_v28  ;;  %v2712_v36 = vmul.f32 0.5, %v2680_v29 }
 0x65c   :  { %v2620_v38 = vmul.f32 0.7978846, %v2588_v31  ;;  %v2745_v62 = vmul.f32 %v2713_v15, %v5506_v26 }
 0x65d   :  { %4459 = vtanh.f32 %v2621_v34  ;;  %v2744_v58 = vmul.f32 %v2712_v36, %v5510_v49 }
 0x65e   :  { %4461 = vtanh.f32 %v2620_v38 }
 0x65f   :  { %v4456_v37 = vpop.eup %4455  ;;  %4192 = vmatprep.mubr.msk.f32.mxu0 %vm2756_vm4, %v2744_v58 }
 0x660   :  { %v4458_v10 = vpop.eup %4457  ;;  %4193 = vmatmul.mubr.msk.f32.gmra.mrb[138].mxu0 %vm2756_vm4, %v2745_v62  ;;  %v2683_v39 = vadd.f32 1.0, %v4456_v37 }
 0x661   :  { %v2682_v40 = vadd.f32 1.0, %v4458_v10 }
 0x662   :  { %v2715_v41 = vmul.f32 0.5, %v2683_v39 }
 0x663   :  { %v2714_v42 = vmul.f32 0.5, %v2682_v40 }
 0x664   :  { %v2747_v47 = vmul.f32 %v2715_v41, %v5524_v55 }
 0x665   :  { %v2746_v53 = vmul.f32 %v2714_v42, %v5528_v20 }
 0x667   :  { %v4460_v51 = vpop.eup %4459  ;;  %4195 = vmatprep.mubr.msk.f32.mxu0 %vm2756_vm4, %v2746_v53 }
 0x668   :  { %v4462_v49 = vpop.eup %4461  ;;  %4196 = vmatmul.mubr.msk.f32.gmra.mrb[140].mxu0 %vm2756_vm4, %v2747_v47  ;;  %v2685_v26 = vadd.f32 1.0, %v4460_v51 }
 0x669   :  { %v2684_v52 = vadd.f32 1.0, %v4462_v49 }
 0x66a   :  { %v2717_v54 = vmul.f32 0.5, %v2685_v26 }
 0x66b   :  { %v2716_v19 = vmul.f32 0.5, %v2684_v52 }
 0x66c   :  { %v2749_v57 = vmul.f32 %v2717_v54, %v2459_v6 }
 0x66d   :  { %v2748_v56 = vmul.f32 %v2716_v19, %v2454_v46 }
 0x66f   :  { %4198 = vmatprep.mubr.msk.f32.mxu0 %vm2756_vm4, %v2748_v56 }
 0x670   :  { %4199 = vmatmul.mubr.msk.f32.gmra.mrb[142].mxu0 %vm2756_vm4, %v2749_v57 }
 0x6cb   :  { %v4155_v20 = vpop.f32.mrb[112].mxu0 }
 0x6cc   :  { %v2929_v55 = vadd.f32 %v4155_v20, %v5558_v16  ;;  %v2923_v18 = vpop.f32.mrb[113].mxu0 }
 0x6cd   :  { %v2924_v33 = vadd.f32 %v5558_v16, %v2923_v18 }
 0x6ce   :  { %v3510_v43 = vmul.f32 -1.442695, %v2929_v55 }
 0x6cf   :  { %v3509_v44 = vmul.f32 -1.442695, %v2924_v33 }
 0x6d0   :  { %4463 = vpow2.f32 %v3510_v43 }
 0x6d1   :  { %4465 = vpow2.f32 %v3509_v44 }
 0x6d3   :  { %v4158_v45 = vpop.f32.mrb[114].mxu0 }
 0x6d4   :  { %v2939_v48 = vadd.f32 %v4158_v45, %v5558_v16  ;;  %v2933_v14 = vpop.f32.mrb[115].mxu0 }
 0x6d5   :  { %v2934_v24 = vadd.f32 %v5558_v16, %v2933_v14 }
 0x6d6   :  { %v3512_v50 = vmul.f32 -1.442695, %v2939_v48 }
 0x6d7   :  { %v3511_v60 = vmul.f32 -1.442695, %v2934_v24 }
 0x6d8   :  { %4467 = vpow2.f32 %v3512_v50 }
 0x6d9   :  { %4469 = vpow2.f32 %v3511_v60 }
 0x6da   :  { %v4464_v61 = vpop.eup %4463 }
 0x6db   :  { %v4466_v2 = vpop.eup %4465  ;;  %v3179_v63 = vadd.f32 1.0, %v4464_v61  ;;  %v4161_v1 = vpop.f32.mrb[116].mxu0 }
 0x6dc   :  { %v3178_v4 = vadd.f32 1.0, %v4466_v2  ;;  %v2949_v7 = vadd.f32 %v4161_v1, %v5558_v16  ;;  %v2943_v6 = vpop.f32.mrb[117].mxu0 }
 0x6dd   :  { %4471 = vrcp.f32 %v3179_v63  ;;  %v2944_v12 = vadd.f32 %v5558_v16, %v2943_v6 }
 0x6de   :  { %4473 = vrcp.f32 %v3178_v4  ;;  %v3514_v3 = vmul.f32 -1.442695, %v2949_v7 }
 0x6df   :  { %v3513_v9 = vmul.f32 -1.442695, %v2944_v12 }
 0x6e0   :  { %4475 = vpow2.f32 %v3514_v3 }
 0x6e1   :  { %4477 = vpow2.f32 %v3513_v9 }
 0x6e2   :  { %v4468_v46 = vpop.eup %4467 }
 0x6e3   :  { %v4470_v5 = vpop.eup %4469  ;;  %v3181_v59 = vadd.f32 1.0, %v4468_v46  ;;  %v4164_v35 = vpop.f32.mrb[118].mxu0 }
 0x6e4   :  { %v3180_v8 = vadd.f32 1.0, %v4470_v5  ;;  %v2959_v11 = vadd.f32 %v4164_v35, %v5558_v16  ;;  %v2953_v13 = vpop.f32.mrb[119].mxu0 }
 0x6e5   :  { %4479 = vrcp.f32 %v3181_v59  ;;  %v2954_v17 = vadd.f32 %v5558_v16, %v2953_v13 }
 0x6e6   :  { %4481 = vrcp.f32 %v3180_v8  ;;  %v3516_v30 = vmul.f32 -1.442695, %v2959_v11 }
 0x6e7   :  { %v4472_v21 = vpop.eup %4471  ;;  %v3515_v22 = vmul.f32 -1.442695, %v2954_v17 }
 0x6e8   :  { %v4474_v23 = vpop.eup %4473  ;;  %3276 = vst.msk [vmem:[%s5732_s12 + $0x8] sm:$0xff] %vm3274_vm5, %v4472_v21  ;;  %4483 = vpow2.f32 %v3516_v30 }
 0x6e9   :  { %3275 = vst.msk [vmem:[%s5732_s12] sm:$0xff] %vm3274_vm5, %v4474_v23  ;;  %4485 = vpow2.f32 %v3515_v22 }
 0x6ea   :  { %v4476_v25 = vpop.eup %4475 }
 0x6eb   :  { %v4478_v32 = vpop.eup %4477  ;;  %v3183_v0 = vadd.f32 1.0, %v4476_v25  ;;  %v4167_v27 = vpop.f32.mrb[120].mxu0 }
 0x6ec   :  { %v3182_v28 = vadd.f32 1.0, %v4478_v32  ;;  %v2969_v29 = vadd.f32 %v4167_v27, %v5558_v16  ;;  %v2963_v31 = vpop.f32.mrb[121].mxu0 }
 0x6ed   :  { %4487 = vrcp.f32 %v3183_v0  ;;  %v2964_v15 = vadd.f32 %v5558_v16, %v2963_v31 }
 0x6ee   :  { %4489 = vrcp.f32 %v3182_v28  ;;  %v3518_v34 = vmul.f32 -1.442695, %v2969_v29 }
 0x6ef   :  { %v4480_v36 = vpop.eup %4479  ;;  %v3517_v38 = vmul.f32 -1.442695, %v2964_v15 }
 0x6f0   :  { %v4482_v58 = vpop.eup %4481  ;;  %3278 = vst.msk [vmem:[%s5732_s12 + $0x18] sm:$0xff] %vm3274_vm5, %v4480_v36  ;;  %4491 = vpow2.f32 %v3518_v34 }
 0x6f1   :  { %3277 = vst.msk [vmem:[%s5732_s12 + $0x10] sm:$0xff] %vm3274_vm5, %v4482_v58  ;;  %4493 = vpow2.f32 %v3517_v38 }
 0x6f2   :  { %v4484_v62 = vpop.eup %4483 }
 0x6f3   :  { %v4486_v37 = vpop.eup %4485  ;;  %v3185_v10 = vadd.f32 1.0, %v4484_v62  ;;  %v4170_v39 = vpop.f32.mrb[122].mxu0 }
 0x6f4   :  { %v3184_v40 = vadd.f32 1.0, %v4486_v37  ;;  %v2979_v41 = vadd.f32 %v4170_v39, %v5558_v16  ;;  %v2973_v42 = vpop.f32.mrb[123].mxu0 }
 0x6f5   :  { %4495 = vrcp.f32 %v3185_v10  ;;  %v2974_v53 = vadd.f32 %v5558_v16, %v2973_v42 }
 0x6f6   :  { %4497 = vrcp.f32 %v3184_v40  ;;  %v3520_v47 = vmul.f32 -1.442695, %v2979_v41 }
 0x6f7   :  { %v4488_v51 = vpop.eup %4487  ;;  %v3519_v49 = vmul.f32 -1.442695, %v2974_v53 }
 0x6f8   :  { %v4490_v26 = vpop.eup %4489  ;;  %3280 = vst.msk [vmem:[%s5732_s12 + $0x28] sm:$0xff] %vm3274_vm5, %v4488_v51  ;;  %4499 = vpow2.f32 %v3520_v47 }
 0x6f9   :  { %3279 = vst.msk [vmem:[%s5732_s12 + $0x20] sm:$0xff] %vm3274_vm5, %v4490_v26  ;;  %4501 = vpow2.f32 %v3519_v49 }
 0x6fa   :  { %v4492_v52 = vpop.eup %4491 }
 0x6fb   :  { %v4494_v54 = vpop.eup %4493  ;;  %v3187_v19 = vadd.f32 1.0, %v4492_v52  ;;  %v4173_v56 = vpop.f32.mrb[124].mxu0 }
 0x6fc   :  { %v3186_v57 = vadd.f32 1.0, %v4494_v54  ;;  %v2989_v20 = vadd.f32 %v4173_v56, %v5558_v16  ;;  %v2983_v55 = vpop.f32.mrb[125].mxu0 }
 0x6fd   :  { %4503 = vrcp.f32 %v3187_v19  ;;  %v2984_v18 = vadd.f32 %v5558_v16, %v2983_v55 }
 0x6fe   :  { %4505 = vrcp.f32 %v3186_v57  ;;  %v3522_v33 = vmul.f32 -1.442695, %v2989_v20 }
 0x6ff   :  { %v4496_v43 = vpop.eup %4495  ;;  %v3521_v44 = vmul.f32 -1.442695, %v2984_v18 }
 0x700   :  { %v4498_v45 = vpop.eup %4497  ;;  %3282 = vst.msk [vmem:[%s5732_s12 + $0x38] sm:$0xff] %vm3274_vm5, %v4496_v43  ;;  %4507 = vpow2.f32 %v3522_v33 }
 0x701   :  { %3281 = vst.msk [vmem:[%s5732_s12 + $0x30] sm:$0xff] %vm3274_vm5, %v4498_v45  ;;  %4509 = vpow2.f32 %v3521_v44 }
 0x702   :  { %v4500_v48 = vpop.eup %4499 }
 0x703   :  { %v4502_v14 = vpop.eup %4501  ;;  %v3189_v24 = vadd.f32 1.0, %v4500_v48  ;;  %v4176_v50 = vpop.f32.mrb[126].mxu0 }
 0x704   :  { %v3188_v60 = vadd.f32 1.0, %v4502_v14  ;;  %v2999_v61 = vadd.f32 %v4176_v50, %v5558_v16  ;;  %v2993_v2 = vpop.f32.mrb[127].mxu0 }
 0x705   :  { %4511 = vrcp.f32 %v3189_v24  ;;  %v2994_v63 = vadd.f32 %v5558_v16, %v2993_v2 }
 0x706   :  { %4513 = vrcp.f32 %v3188_v60  ;;  %v3524_v1 = vmul.f32 -1.442695, %v2999_v61 }
 0x707   :  { %v4504_v4 = vpop.eup %4503  ;;  %v3523_v7 = vmul.f32 -1.442695, %v2994_v63 }
 0x708   :  { %v4506_v6 = vpop.eup %4505  ;;  %3284 = vst.msk [vmem:[%s5732_s12 + $0x48] sm:$0xff] %vm3274_vm5, %v4504_v4  ;;  %4515 = vpow2.f32 %v3524_v1 }
 0x709   :  { %3283 = vst.msk [vmem:[%s5732_s12 + $0x40] sm:$0xff] %vm3274_vm5, %v4506_v6  ;;  %4517 = vpow2.f32 %v3523_v7 }
 0x70a   :  { %v4508_v12 = vpop.eup %4507 }
 0x70b   :  { %v4510_v3 = vpop.eup %4509  ;;  %v3191_v9 = vadd.f32 1.0, %v4508_v12  ;;  %v4179_v46 = vpop.f32.mrb[128].mxu0 }
 0x70c   :  { %v3190_v5 = vadd.f32 1.0, %v4510_v3  ;;  %v3009_v59 = vadd.f32 %v4179_v46, %v5558_v16  ;;  %v3003_v35 = vpop.f32.mrb[129].mxu0 }
 0x70d   :  { %4519 = vrcp.f32 %v3191_v9  ;;  %v3004_v8 = vadd.f32 %v5558_v16, %v3003_v35 }
 0x70e   :  { %4521 = vrcp.f32 %v3190_v5  ;;  %v3526_v11 = vmul.f32 -1.442695, %v3009_v59 }
 0x70f   :  { %v4512_v13 = vpop.eup %4511  ;;  %v3525_v17 = vmul.f32 -1.442695, %v3004_v8 }
 0x710   :  { %v4514_v30 = vpop.eup %4513  ;;  %3286 = vst.msk [vmem:[%s5732_s12 + $0x58] sm:$0xff] %vm3274_vm5, %v4512_v13  ;;  %4523 = vpow2.f32 %v3526_v11 }
 0x711   :  { %3285 = vst.msk [vmem:[%s5732_s12 + $0x50] sm:$0xff] %vm3274_vm5, %v4514_v30  ;;  %4525 = vpow2.f32 %v3525_v17 }
 0x712   :  { %v4516_v21 = vpop.eup %4515 }
 0x713   :  { %v4518_v22 = vpop.eup %4517  ;;  %v3193_v23 = vadd.f32 1.0, %v4516_v21  ;;  %v4182_v25 = vpop.f32.mrb[130].mxu0 }
 0x714   :  { %v3192_v32 = vadd.f32 1.0, %v4518_v22  ;;  %v3019_v0 = vadd.f32 %v4182_v25, %v5558_v16  ;;  %v3013_v27 = vpop.f32.mrb[131].mxu0 }
 0x715   :  { %4527 = vrcp.f32 %v3193_v23  ;;  %v3014_v28 = vadd.f32 %v5558_v16, %v3013_v27 }
 0x716   :  { %4529 = vrcp.f32 %v3192_v32  ;;  %v3528_v29 = vmul.f32 -1.442695, %v3019_v0 }
 0x717   :  { %v4520_v31 = vpop.eup %4519  ;;  %v3527_v15 = vmul.f32 -1.442695, %v3014_v28 }
 0x718   :  { %v4522_v34 = vpop.eup %4521  ;;  %3288 = vst.msk [vmem:[%s5732_s12 + $0x68] sm:$0xff] %vm3274_vm5, %v4520_v31  ;;  %4531 = vpow2.f32 %v3528_v29 }
 0x719   :  { %3287 = vst.msk [vmem:[%s5732_s12 + $0x60] sm:$0xff] %vm3274_vm5, %v4522_v34  ;;  %4533 = vpow2.f32 %v3527_v15 }
 0x71a   :  { %v4524_v36 = vpop.eup %4523 }
 0x71b   :  { %v4526_v38 = vpop.eup %4525  ;;  %v3195_v58 = vadd.f32 1.0, %v4524_v36  ;;  %v4185_v62 = vpop.f32.mrb[132].mxu0 }
 0x71c   :  { %v3194_v37 = vadd.f32 1.0, %v4526_v38  ;;  %v3029_v10 = vadd.f32 %v4185_v62, %v5558_v16  ;;  %v3023_v39 = vpop.f32.mrb[133].mxu0 }
 0x71d   :  { %4535 = vrcp.f32 %v3195_v58  ;;  %v3024_v40 = vadd.f32 %v5558_v16, %v3023_v39 }
 0x71e   :  { %4537 = vrcp.f32 %v3194_v37  ;;  %v3530_v41 = vmul.f32 -1.442695, %v3029_v10 }
 0x71f   :  { %v4528_v42 = vpop.eup %4527  ;;  %v3529_v53 = vmul.f32 -1.442695, %v3024_v40 }
 0x720   :  { %v4530_v47 = vpop.eup %4529  ;;  %3290 = vst.msk [vmem:[%s5732_s12 + $0x78] sm:$0xff] %vm3274_vm5, %v4528_v42  ;;  %4539 = vpow2.f32 %v3530_v41 }
 0x721   :  { %3289 = vst.msk [vmem:[%s5732_s12 + $0x70] sm:$0xff] %vm3274_vm5, %v4530_v47  ;;  %4541 = vpow2.f32 %v3529_v53 }
 0x722   :  { %v4532_v51 = vpop.eup %4531 }
 0x723   :  { %v4534_v49 = vpop.eup %4533  ;;  %v3197_v26 = vadd.f32 1.0, %v4532_v51  ;;  %v4188_v52 = vpop.f32.mrb[134].mxu0 }
 0x724   :  { %v3196_v54 = vadd.f32 1.0, %v4534_v49  ;;  %v3039_v19 = vadd.f32 %v4188_v52, %v5558_v16  ;;  %v3033_v56 = vpop.f32.mrb[135].mxu0 }
 0x725   :  { %4543 = vrcp.f32 %v3197_v26  ;;  %v3034_v57 = vadd.f32 %v5558_v16, %v3033_v56 }
 0x726   :  { %4545 = vrcp.f32 %v3196_v54  ;;  %v3532_v20 = vmul.f32 -1.442695, %v3039_v19 }
 0x727   :  { %v4536_v55 = vpop.eup %4535  ;;  %v3531_v18 = vmul.f32 -1.442695, %v3034_v57 }
 0x728   :  { %v4538_v33 = vpop.eup %4537  ;;  %3292 = vst.msk [vmem:[%s5732_s12 + $0x88] sm:$0xff] %vm3274_vm5, %v4536_v55  ;;  %4547 = vpow2.f32 %v3532_v20 }
 0x729   :  { %3291 = vst.msk [vmem:[%s5732_s12 + $0x80] sm:$0xff] %vm3274_vm5, %v4538_v33  ;;  %4549 = vpow2.f32 %v3531_v18 }
 0x72a   :  { %v4540_v43 = vpop.eup %4539 }
 0x72b   :  { %v4542_v44 = vpop.eup %4541  ;;  %v3199_v45 = vadd.f32 1.0, %v4540_v43  ;;  %v4191_v48 = vpop.f32.mrb[136].mxu0 }
 0x72c   :  { %v3198_v14 = vadd.f32 1.0, %v4542_v44  ;;  %v3049_v24 = vadd.f32 %v4191_v48, %v5558_v16  ;;  %v3043_v50 = vpop.f32.mrb[137].mxu0 }
 0x72d   :  { %4551 = vrcp.f32 %v3199_v45  ;;  %v3044_v60 = vadd.f32 %v5558_v16, %v3043_v50 }
 0x72e   :  { %4553 = vrcp.f32 %v3198_v14  ;;  %v3534_v61 = vmul.f32 -1.442695, %v3049_v24 }
 0x72f   :  { %v4544_v2 = vpop.eup %4543  ;;  %v3533_v63 = vmul.f32 -1.442695, %v3044_v60 }
 0x730   :  { %v4546_v1 = vpop.eup %4545  ;;  %3294 = vst.msk [vmem:[%s5732_s12 + $0x98] sm:$0xff] %vm3274_vm5, %v4544_v2  ;;  %4555 = vpow2.f32 %v3534_v61 }
 0x731   :  { %3293 = vst.msk [vmem:[%s5732_s12 + $0x90] sm:$0xff] %vm3274_vm5, %v4546_v1  ;;  %4557 = vpow2.f32 %v3533_v63 }
 0x732   :  { %v4548_v4 = vpop.eup %4547 }
 0x733   :  { %v4550_v7 = vpop.eup %4549  ;;  %v3201_v6 = vadd.f32 1.0, %v4548_v4  ;;  %v4194_v12 = vpop.f32.mrb[138].mxu0 }
 0x734   :  { %v3200_v3 = vadd.f32 1.0, %v4550_v7  ;;  %v3059_v9 = vadd.f32 %v4194_v12, %v5558_v16  ;;  %v3053_v46 = vpop.f32.mrb[139].mxu0 }
 0x735   :  { %4559 = vrcp.f32 %v3201_v6  ;;  %v3054_v5 = vadd.f32 %v5558_v16, %v3053_v46 }
 0x736   :  { %4561 = vrcp.f32 %v3200_v3  ;;  %v3536_v59 = vmul.f32 -1.442695, %v3059_v9 }
 0x737   :  { %v4552_v35 = vpop.eup %4551  ;;  %v3535_v8 = vmul.f32 -1.442695, %v3054_v5 }
 0x738   :  { %v4554_v11 = vpop.eup %4553  ;;  %3296 = vst.msk [vmem:[%s5732_s12 + $0xa8] sm:$0xff] %vm3274_vm5, %v4552_v35  ;;  %4563 = vpow2.f32 %v3536_v59 }
 0x739   :  { %3295 = vst.msk [vmem:[%s5732_s12 + $0xa0] sm:$0xff] %vm3274_vm5, %v4554_v11  ;;  %4565 = vpow2.f32 %v3535_v8 }
 0x73a   :  { %v4556_v13 = vpop.eup %4555 }
 0x73b   :  { %v4558_v17 = vpop.eup %4557  ;;  %v3203_v30 = vadd.f32 1.0, %v4556_v13  ;;  %v4197_v21 = vpop.f32.mrb[140].mxu0 }
 0x73c   :  { %v3202_v22 = vadd.f32 1.0, %v4558_v17  ;;  %v3069_v23 = vadd.f32 %v4197_v21, %v5558_v16  ;;  %v3063_v25 = vpop.f32.mrb[141].mxu0 }
 0x73d   :  { %4567 = vrcp.f32 %v3203_v30  ;;  %v3064_v32 = vadd.f32 %v5558_v16, %v3063_v25 }
 0x73e   :  { %4569 = vrcp.f32 %v3202_v22  ;;  %v3538_v0 = vmul.f32 -1.442695, %v3069_v23 }
 0x73f   :  { %v4560_v27 = vpop.eup %4559  ;;  %v3537_v28 = vmul.f32 -1.442695, %v3064_v32 }
 0x740   :  { %v4562_v29 = vpop.eup %4561  ;;  %3298 = vst.msk [vmem:[%s5732_s12 + $0xb8] sm:$0xff] %vm3274_vm5, %v4560_v27  ;;  %4571 = vpow2.f32 %v3538_v0 }
 0x741   :  { %3297 = vst.msk [vmem:[%s5732_s12 + $0xb0] sm:$0xff] %vm3274_vm5, %v4562_v29  ;;  %4573 = vpow2.f32 %v3537_v28 }
 0x742   :  { %v4564_v31 = vpop.eup %4563 }
 0x743   :  { %v4566_v15 = vpop.eup %4565  ;;  %v3205_v34 = vadd.f32 1.0, %v4564_v31  ;;  %v4200_v36 = vpop.f32.mrb[142].mxu0 }
 0x744   :  { %v3204_v38 = vadd.f32 1.0, %v4566_v15  ;;  %v3079_v58 = vadd.f32 %v4200_v36, %v5558_v16  ;;  %v3073_v62 = vpop.f32.mrb[143].mxu0 }
 0x745   :  { %4575 = vrcp.f32 %v3205_v34  ;;  %v3074_v37 = vadd.f32 %v5558_v16, %v3073_v62 }
 0x746   :  { %4577 = vrcp.f32 %v3204_v38  ;;  %v3540_v10 = vmul.f32 -1.442695, %v3079_v58 }
 0x747   :  { %v4568_v39 = vpop.eup %4567  ;;  %v3539_v40 = vmul.f32 -1.442695, %v3074_v37 }
 0x748   :  { %v4570_v41 = vpop.eup %4569  ;;  %3300 = vst.msk [vmem:[%s5732_s12 + $0xc8] sm:$0xff] %vm3274_vm5, %v4568_v39  ;;  %4579 = vpow2.f32 %v3540_v10 }
 0x749   :  { %3299 = vst.msk [vmem:[%s5732_s12 + $0xc0] sm:$0xff] %vm3274_vm5, %v4570_v41  ;;  %4581 = vpow2.f32 %v3539_v40 }
 0x74a   :  { %v4572_v42 = vpop.eup %4571 }
 0x74b   :  { %v4574_v53 = vpop.eup %4573  ;;  %v3207_v16 = vadd.f32 1.0, %v4572_v42 }
 0x74c   :  { %v3206_v47 = vadd.f32 1.0, %v4574_v53 }
 0x74d   :  { %4583 = vrcp.f32 %v3207_v16 }
 0x74e   :  { %4585 = vrcp.f32 %v3206_v47 }
 0x74f   :  { %v4576_v51 = vpop.eup %4575 }
 0x750   :  { %v4578_v49 = vpop.eup %4577  ;;  %3302 = vst.msk [vmem:[%s5732_s12 + $0xd8] sm:$0xff] %vm3274_vm5, %v4576_v51 }
 0x751   :  { %3301 = vst.msk [vmem:[%s5732_s12 + $0xd0] sm:$0xff] %vm3274_vm5, %v4578_v49 }
 0x752   :  { %v4580_v26 = vpop.eup %4579 }
 0x753   :  { %v4582_v52 = vpop.eup %4581  ;;  %v3209_v54 = vadd.f32 1.0, %v4580_v26 }
 0x754   :  { %v3208_v19 = vadd.f32 1.0, %v4582_v52 }
 0x755   :  { %4587 = vrcp.f32 %v3209_v54 }
 0x756   :  { %4589 = vrcp.f32 %v3208_v19 }
 0x757   :  { %v4584_v56 = vpop.eup %4583 }
 0x758   :  { %v4586_v57 = vpop.eup %4585  ;;  %3304 = vst.msk [vmem:[%s5732_s12 + $0xe8] sm:$0xff] %vm3274_vm5, %v4584_v56 }
 0x759   :  { %3303 = vst.msk [vmem:[%s5732_s12 + $0xe0] sm:$0xff] %vm3274_vm5, %v4586_v57 }
 0x75f   :  { %v4588_v20 = vpop.eup %4587 }
 0x760   :  { %v4590_v55 = vpop.eup %4589  ;;  %3306 = vst.msk [vmem:[%s5732_s12 + $0xf8] sm:$0xff] %vm3274_vm5, %v4588_v20 }
 0x761   :  { %3305 = vst.msk [vmem:[%s5732_s12 + $0xf0] sm:$0xff] %vm3274_vm5, %v4590_v55 }

</bundles_post_ra>
